<compile_context>
chip_gen: v6e
topology: v6e:2x2x1
jax: 0.10.0
libtpu: 0.0.40
codegen_flags: <defaults>
</compile_context>

<pallas_src>
import jax
import jax.numpy as jnp
from jax.experimental import pallas as pl
from jax.experimental.pallas import tpu as pltpu

# ----------------------------- configuration --------------------------------
IMG_SIZE = 16
PATCH_SIZE = 4
IN_CHANNELS = 3
EMBED_DIM = 32
DEPTH = 2
NUM_HEADS = 4
FACTOR = 4
NUM_CLASSES = 10
BATCH = 2

HEAD_DIM = EMBED_DIM // NUM_HEADS
HIDDEN = EMBED_DIM * FACTOR
NUM_PATCHES = (IMG_SIZE // PATCH_SIZE) ** 2
SEQ_LEN = NUM_PATCHES + 1
PATCH_FEATS = IN_CHANNELS * PATCH_SIZE * PATCH_SIZE
ATTN_SCALE = HEAD_DIM ** -0.5
LN_EPS = 1e-6                     # matches partial(nn.LayerNorm, eps=1e-06)

NUM_CLASSES_PAD = 128             # lane-dense classifier output

# Images processed per grid step.  BATCH  -> single grid step (best on
# single-TC v5e/v6e).  Set to 1 on v7x to split images across the 2 TCs.
IMAGES_PER_STEP = BATCH


# ------------------------------ fused kernel ---------------------------------
def _layernorm(v, g, b):
    # Two independent XLU reductions (mean, mean-of-squares); var = E[x^2]-mu^2.
    mu = jnp.mean(v, axis=-1, keepdims=True)
    ms = jnp.mean(v * v, axis=-1, keepdims=True)
    var = ms - mu * mu
    return (v - mu) * jax.lax.rsqrt(var + LN_EPS) * g + b


def _gelu(y):
    # TODO(synk): nn.GELU default is exact erf-GELU; tanh approximation used
    # since erf lowering inside Mosaic kernels is not guaranteed.
    c = jnp.float32(0.7978845608028654)  # sqrt(2/pi)
    return 0.5 * y * (1.0 + jnp.tanh(c * (y + 0.044715 * (y * y * y))))


def _vit_kernel(
    patches_ref,            # (G, S, C*P*P)  G images, row 0 zeroed (cls slot)
    patch_w_ref,            # (C*P*P, E)
    addend_ref,             # (S, E)  = concat([cls, patch_b x N]) + pos_embed
    ln1_g_ref, ln1_b_ref,   # (D, 1, E)
    qkv_w_ref, qkv_b_ref,   # (D, E, 3E), (D, 1, 3E)   (q part pre-scaled)
    proj_w_ref, proj_b_ref, # (D, E, E), (D, 1, E)
    ln2_g_ref, ln2_b_ref,   # (D, 1, E)
    fc1_w_ref, fc1_b_ref,   # (D, E, H), (D, 1, H)
    fc2_w_ref, fc2_b_ref,   # (D, H, E), (D, 1, E)
    head_w_ref, head_b_ref, # (E, 128), (1, 128)       (zero-padded past NC)
    out_ref,                # (G, 1, 128)
):
    patch_w = patch_w_ref[...]
    addend = addend_ref[...]
    head_w = head_w_ref[...]
    head_b = head_b_ref[...]

    # Static unroll over the images in this grid step: the per-image chains
    # are independent, giving the scheduler extra ILP in a latency-bound body.
    for bb in range(IMAGES_PER_STEP):
        # -- patch embedding (single matmul; cls/pos/bias folded into addend) --
        x = (
            jnp.dot(patches_ref[bb], patch_w,
                    preferred_element_type=jnp.float32)
            + addend
        )  # (S, E)

        # -------------------- transformer blocks --------------------
        for d in range(DEPTH):
            # attention branch
            hn = _layernorm(x, ln1_g_ref[d], ln1_b_ref[d])
            qkv = (
                jnp.dot(hn, qkv_w_ref[d], preferred_element_type=jnp.float32)
                + qkv_b_ref[d]
            )  # (S, 3E)

            # One relayout per layer: stack heads on a leading batch axis so
            # scores / softmax / ctx run as single head-batched ops.
            def _head_slab(base, _qkv=qkv):
                return jnp.concatenate(
                    [
                        _qkv[:, base + h * HEAD_DIM:
                                base + (h + 1) * HEAD_DIM]
                        .reshape(1, SEQ_LEN, HEAD_DIM)
                        for h in range(NUM_HEADS)
                    ],
                    axis=0,
                )  # (H, S, Dh)

            q3 = _head_slab(0)
            k3 = _head_slab(EMBED_DIM)
            v3 = _head_slab(2 * EMBED_DIM)

            # batched scores (ATTN_SCALE already folded into q weights/bias)
            s = jnp.einsum('hqd,hkd->hqk', q3, k3,
                           preferred_element_type=jnp.float32)   # (H, S, S)
            s = s - jnp.max(s, axis=-1, keepdims=True)
            p = jnp.exp(s)
            p = p * pl.reciprocal(jnp.sum(p, axis=-1, keepdims=True),
                                  approx=True)
            ctx = jnp.einsum('hqk,hkd->hqd', p, v3,
                             preferred_element_type=jnp.float32)  # (H, S, Dh)

            # merge heads along lanes, then ONE output-projection matmul
            ctx_m = jnp.concatenate(
                [ctx[h] for h in range(NUM_HEADS)], axis=-1)      # (S, E)
            x = x + (
                jnp.dot(ctx_m, proj_w_ref[d],
                        preferred_element_type=jnp.float32)
                + proj_b_ref[d]
            )

            # MLP branch
            h2 = _layernorm(x, ln2_g_ref[d], ln2_b_ref[d])
            mid = (
                jnp.dot(h2, fc1_w_ref[d], preferred_element_type=jnp.float32)
                + fc1_b_ref[d]
            )  # (S, HIDDEN)
            mid = _gelu(mid)
            x = x + (
                jnp.dot(mid, fc2_w_ref[d], preferred_element_type=jnp.float32)
                + fc2_b_ref[d]
            )

        # -------- classifier head on the cls token (lane-dense, padded) -----
        logits = (
            jnp.dot(x[0:1, :], head_w, preferred_element_type=jnp.float32)
            + head_b
        )  # (1, 128)
        out_ref[bb] = logits


# ------------------------------ parameter init --------------------------------
def init_params(key):
    keys = iter(jax.random.split(key, 16))

    def nrm(shape):
        return 0.02 * jax.random.normal(next(keys), shape, jnp.float32)

    # Fold the attention scale into the q portion of qkv at init (zero runtime
    # cost; removes the per-head score scaling from the kernel).
    scale_vec = jnp.concatenate(
        [jnp.full((EMBED_DIM,), ATTN_SCALE, jnp.float32),
         jnp.ones((2 * EMBED_DIM,), jnp.float32)]
    )  # (3E,)
    qkv_w = nrm((DEPTH, EMBED_DIM, 3 * EMBED_DIM)) * scale_vec
    qkv_b = nrm((DEPTH, 1, 3 * EMBED_DIM)) * scale_vec

    # Classifier padded to a lane-dense (E, 128) / (1, 128) at init; the
    # forward wrapper slices the first NUM_CLASSES columns back out.
    head_w = jnp.pad(nrm((EMBED_DIM, NUM_CLASSES)),
                     ((0, 0), (0, NUM_CLASSES_PAD - NUM_CLASSES)))
    head_b = jnp.pad(nrm((NUM_CLASSES,)),
                     (0, NUM_CLASSES_PAD - NUM_CLASSES)).reshape(
                         1, NUM_CLASSES_PAD)

    return {
        # patch_embed: Conv2d(C, E, P, stride=P) == matmul over flat patches
        "patch_w": nrm((PATCH_FEATS, EMBED_DIM)),
        "patch_b": nrm((EMBED_DIM,)),
        "cls_token": nrm((1, 1, EMBED_DIM)),
        "pos_embed": nrm((1, SEQ_LEN, EMBED_DIM)),
        "head_w": head_w,
        "head_b": head_b,
        # per-block params stacked along a leading depth axis
        "ln1_g": jnp.ones((DEPTH, 1, EMBED_DIM), jnp.float32),
        "ln1_b": jnp.zeros((DEPTH, 1, EMBED_DIM), jnp.float32),
        "qkv_w": qkv_w,
        "qkv_b": qkv_b,
        "proj_w": nrm((DEPTH, EMBED_DIM, EMBED_DIM)),
        "proj_b": nrm((DEPTH, 1, EMBED_DIM)),
        "ln2_g": jnp.ones((DEPTH, 1, EMBED_DIM), jnp.float32),
        "ln2_b": jnp.zeros((DEPTH, 1, EMBED_DIM), jnp.float32),
        "fc1_w": nrm((DEPTH, EMBED_DIM, HIDDEN)),
        "fc1_b": nrm((DEPTH, 1, HIDDEN)),
        "fc2_w": nrm((DEPTH, HIDDEN, EMBED_DIM)),
        "fc2_b": nrm((DEPTH, 1, EMBED_DIM)),
    }


# ------------------------------ forward wrapper --------------------------------
def _full_spec(shape):
    nd = len(shape)
    return pl.BlockSpec(shape, lambda i, _nd=nd: (0,) * _nd)


def vit_forward(x, params):
    """x: (B, C, H, W) NCHW float32 -> (B, NUM_CLASSES)."""
    b, c, hh, ww = x.shape
    p = PATCH_SIZE
    nh, nw = hh // p, ww // p
    cpp = c * p * p
    assert b % IMAGES_PER_STEP == 0

    # patch extraction (pure layout glue): (B,C,H,W) -> (B, num_patches, C*P*P)
    # feature order (c, ph, pw) matching Conv2d weight flattening.
    patches = (
        x.reshape(b, c, nh, p, nw, p)
        .transpose(0, 2, 4, 1, 3, 5)
        .reshape(b, nh * nw, cpp)
    )
    # zero row 0 (cls slot) so the fused kernel's single patch matmul produces
    # the full (S, E) token slab once `addend` is added.
    patches_ext = jnp.pad(patches, ((0, 0), (1, 0), (0, 0)))
    # addend[0]   = cls + pos[0]
    # addend[i>0] = patch_b + pos[i]      (pos_drop has rate 0.0 -> identity)
    addend = (
        jnp.concatenate(
            [
                params["cls_token"].reshape(1, EMBED_DIM),
                jnp.broadcast_to(
                    params["patch_b"].reshape(1, EMBED_DIM),
                    (nh * nw, EMBED_DIM),
                ),
            ],
            axis=0,
        )
        + params["pos_embed"].reshape(SEQ_LEN, EMBED_DIM)
    )

    grid_len = b // IMAGES_PER_STEP
    out = pl.pallas_call(
        _vit_kernel,
        out_shape=jax.ShapeDtypeStruct((b, 1, NUM_CLASSES_PAD), jnp.float32),
        grid=(grid_len,),
        in_specs=[
            pl.BlockSpec((IMAGES_PER_STEP, SEQ_LEN, cpp),
                         lambda i: (i, 0, 0)),                   # patches
            _full_spec((cpp, EMBED_DIM)),                        # patch_w
            _full_spec((SEQ_LEN, EMBED_DIM)),                    # addend
            _full_spec((DEPTH, 1, EMBED_DIM)),                   # ln1_g
            _full_spec((DEPTH, 1, EMBED_DIM)),                   # ln1_b
            _full_spec((DEPTH, EMBED_DIM, 3 * EMBED_DIM)),       # qkv_w
            _full_spec((DEPTH, 1, 3 * EMBED_DIM)),               # qkv_b
            _full_spec((DEPTH, EMBED_DIM, EMBED_DIM)),           # proj_w
            _full_spec((DEPTH, 1, EMBED_DIM)),                   # proj_b
            _full_spec((DEPTH, 1, EMBED_DIM)),                   # ln2_g
            _full_spec((DEPTH, 1, EMBED_DIM)),                   # ln2_b
            _full_spec((DEPTH, EMBED_DIM, HIDDEN)),              # fc1_w
            _full_spec((DEPTH, 1, HIDDEN)),                      # fc1_b
            _full_spec((DEPTH, HIDDEN, EMBED_DIM)),              # fc2_w
            _full_spec((DEPTH, 1, EMBED_DIM)),                   # fc2_b
            _full_spec((EMBED_DIM, NUM_CLASSES_PAD)),            # head_w
            _full_spec((1, NUM_CLASSES_PAD)),                    # head_b
        ],
        out_specs=pl.BlockSpec((IMAGES_PER_STEP, 1, NUM_CLASSES_PAD),
                               lambda i: (i, 0, 0)),
        compiler_params=pltpu.CompilerParams(
            dimension_semantics=("parallel",),
        ),
    )(
        patches_ext, params["patch_w"], addend,
        params["ln1_g"], params["ln1_b"], params["qkv_w"], params["qkv_b"],
        params["proj_w"], params["proj_b"], params["ln2_g"], params["ln2_b"],
        params["fc1_w"], params["fc1_b"], params["fc2_w"], params["fc2_b"],
        params["head_w"], params["head_b"],
    )
    return out.reshape(b, NUM_CLASSES_PAD)[:, :NUM_CLASSES]


# ----------------------------------- main -------------------------------------
if __name__ == "__main__":
    key = jax.random.PRNGKey(0)
    k_params, k_input = jax.random.split(key)

    params = init_params(k_params)
    x = jax.random.normal(
        k_input, (BATCH, IN_CHANNELS, IMG_SIZE, IMG_SIZE), jnp.float32
    )

    logits = jax.jit(vit_forward)(x, params)
    jax.block_until_ready(logits)
    assert logits.shape == (BATCH, NUM_CLASSES), logits.shape
    assert bool(jnp.all(jnp.isfinite(logits)))
    print("KERNEL_OK")
</pallas_src>

<mosaic_0001>
module attributes {stable_mosaic.version = 11 : i64} {
  func.func @_vit_kernel(%arg0: i32, %arg1: memref<2x17x48xf32, #tpu.memory_space<vmem>>, %arg2: memref<48x32xf32, #tpu.memory_space<vmem>>, %arg3: memref<17x32xf32, #tpu.memory_space<vmem>>, %arg4: memref<2x1x32xf32, #tpu.memory_space<vmem>>, %arg5: memref<2x1x32xf32, #tpu.memory_space<vmem>>, %arg6: memref<2x32x96xf32, #tpu.memory_space<vmem>>, %arg7: memref<2x1x96xf32, #tpu.memory_space<vmem>>, %arg8: memref<2x32x32xf32, #tpu.memory_space<vmem>>, %arg9: memref<2x1x32xf32, #tpu.memory_space<vmem>>, %arg10: memref<2x1x32xf32, #tpu.memory_space<vmem>>, %arg11: memref<2x1x32xf32, #tpu.memory_space<vmem>>, %arg12: memref<2x32x128xf32, #tpu.memory_space<vmem>>, %arg13: memref<2x1x128xf32, #tpu.memory_space<vmem>>, %arg14: memref<2x128x32xf32, #tpu.memory_space<vmem>>, %arg15: memref<2x1x32xf32, #tpu.memory_space<vmem>>, %arg16: memref<32x128xf32, #tpu.memory_space<vmem>>, %arg17: memref<1x128xf32, #tpu.memory_space<vmem>>, %arg18: memref<2x1x128xf32, #tpu.memory_space<vmem>>) attributes {dimension_semantics = [#tpu.dimension_semantics<parallel>], iteration_bounds = array<i64: 1>, scalar_prefetch = 0 : i64, scratch_operands = 0 : i64, tpu.core_type = #tpu.core_type<tc>, window_params = [{transform_indices = @transform_0, window_bounds = array<i64: 2, 17, 48>}, {pipeline_mode = #tpu.pipeline_mode<synchronous>, transform_indices = @transform_1, window_bounds = array<i64: 48, 32>}, {pipeline_mode = #tpu.pipeline_mode<synchronous>, transform_indices = @transform_2, window_bounds = array<i64: 17, 32>}, {pipeline_mode = #tpu.pipeline_mode<synchronous>, transform_indices = @transform_3, window_bounds = array<i64: 2, 1, 32>}, {pipeline_mode = #tpu.pipeline_mode<synchronous>, transform_indices = @transform_4, window_bounds = array<i64: 2, 1, 32>}, {pipeline_mode = #tpu.pipeline_mode<synchronous>, transform_indices = @transform_5, window_bounds = array<i64: 2, 32, 96>}, {pipeline_mode = #tpu.pipeline_mode<synchronous>, transform_indices = @transform_6, window_bounds = array<i64: 2, 1, 96>}, {pipeline_mode = #tpu.pipeline_mode<synchronous>, transform_indices = @transform_7, window_bounds = array<i64: 2, 32, 32>}, {pipeline_mode = #tpu.pipeline_mode<synchronous>, transform_indices = @transform_8, window_bounds = array<i64: 2, 1, 32>}, {pipeline_mode = #tpu.pipeline_mode<synchronous>, transform_indices = @transform_9, window_bounds = array<i64: 2, 1, 32>}, {pipeline_mode = #tpu.pipeline_mode<synchronous>, transform_indices = @transform_10, window_bounds = array<i64: 2, 1, 32>}, {pipeline_mode = #tpu.pipeline_mode<synchronous>, transform_indices = @transform_11, window_bounds = array<i64: 2, 32, 128>}, {pipeline_mode = #tpu.pipeline_mode<synchronous>, transform_indices = @transform_12, window_bounds = array<i64: 2, 1, 128>}, {pipeline_mode = #tpu.pipeline_mode<synchronous>, transform_indices = @transform_13, window_bounds = array<i64: 2, 128, 32>}, {pipeline_mode = #tpu.pipeline_mode<synchronous>, transform_indices = @transform_14, window_bounds = array<i64: 2, 1, 32>}, {pipeline_mode = #tpu.pipeline_mode<synchronous>, transform_indices = @transform_15, window_bounds = array<i64: 32, 128>}, {pipeline_mode = #tpu.pipeline_mode<synchronous>, transform_indices = @transform_16, window_bounds = array<i64: 1, 128>}, {transform_indices = @transform_17, window_bounds = array<i64: 2, 1, 128>}]} {
    %c0 = arith.constant 0 : index
    %c0_0 = arith.constant 0 : index
    %0 = vector.load %arg2[%c0, %c0_0] : memref<48x32xf32, #tpu.memory_space<vmem>>, vector<48x32xf32>
    %c0_1 = arith.constant 0 : index
    %c0_2 = arith.constant 0 : index
    %1 = vector.load %arg3[%c0_1, %c0_2] : memref<17x32xf32, #tpu.memory_space<vmem>>, vector<17x32xf32>
    %c0_3 = arith.constant 0 : index
    %c0_4 = arith.constant 0 : index
    %2 = vector.load %arg16[%c0_3, %c0_4] : memref<32x128xf32, #tpu.memory_space<vmem>>, vector<32x128xf32>
    %c0_5 = arith.constant 0 : index
    %c0_6 = arith.constant 0 : index
    %3 = vector.load %arg17[%c0_5, %c0_6] : memref<1x128xf32, #tpu.memory_space<vmem>>, vector<1x128xf32>
    %c0_7 = arith.constant 0 : index
    %c0_8 = arith.constant 0 : index
    %c0_9 = arith.constant 0 : index
    %4 = vector.load %arg1[%c0_7, %c0_8, %c0_9] : memref<2x17x48xf32, #tpu.memory_space<vmem>>, vector<1x17x48xf32>
    %5 = vector.shape_cast %4 : vector<1x17x48xf32> to vector<17x48xf32>
    %cst = arith.constant dense<0.000000e+00> : vector<17x32xf32>
    %6 = tpu.matmul %5, %0, %cst {dimension_numbers = #tpu.dot_dimension_numbers<[1], [0], [0], [1], [0, 0, 1, 1], [], []>} : vector<17x48xf32>, vector<48x32xf32>, vector<17x32xf32> -> vector<17x32xf32>
    %7 = arith.addf %6, %1 : vector<17x32xf32>
    %c0_10 = arith.constant 0 : index
    %c0_11 = arith.constant 0 : index
    %c0_12 = arith.constant 0 : index
    %8 = vector.load %arg4[%c0_10, %c0_11, %c0_12] : memref<2x1x32xf32, #tpu.memory_space<vmem>>, vector<1x1x32xf32>
    %9 = vector.shape_cast %8 : vector<1x1x32xf32> to vector<1x32xf32>
    %c0_13 = arith.constant 0 : index
    %c0_14 = arith.constant 0 : index
    %c0_15 = arith.constant 0 : index
    %10 = vector.load %arg5[%c0_13, %c0_14, %c0_15] : memref<2x1x32xf32, #tpu.memory_space<vmem>>, vector<1x1x32xf32>
    %11 = vector.shape_cast %10 : vector<1x1x32xf32> to vector<1x32xf32>
    %cst_16 = arith.constant dense<0.000000e+00> : vector<17xf32>
    %12 = vector.multi_reduction <add>, %7, %cst_16 [1] : vector<17x32xf32> to vector<17xf32>
    %13 = vector.shape_cast %12 : vector<17xf32> to vector<17x1xf32>
    %cst_17 = arith.constant 3.200000e+01 : f32
    %14 = vector.broadcast %cst_17 : f32 to vector<17x1xf32>
    %15 = arith.divf %13, %14 : vector<17x1xf32>
    %16 = arith.mulf %7, %7 : vector<17x32xf32>
    %cst_18 = arith.constant dense<0.000000e+00> : vector<17xf32>
    %17 = vector.multi_reduction <add>, %16, %cst_18 [1] : vector<17x32xf32> to vector<17xf32>
    %18 = vector.shape_cast %17 : vector<17xf32> to vector<17x1xf32>
    %cst_19 = arith.constant 3.200000e+01 : f32
    %19 = vector.broadcast %cst_19 : f32 to vector<17x1xf32>
    %20 = arith.divf %18, %19 : vector<17x1xf32>
    %21 = arith.mulf %15, %15 : vector<17x1xf32>
    %22 = arith.subf %20, %21 : vector<17x1xf32>
    %23 = vector.broadcast %15 : vector<17x1xf32> to vector<17x32xf32>
    %24 = arith.subf %7, %23 : vector<17x32xf32>
    %cst_20 = arith.constant 9.99999997E-7 : f32
    %25 = vector.broadcast %cst_20 : f32 to vector<17x1xf32>
    %26 = arith.addf %22, %25 : vector<17x1xf32>
    %27 = math.rsqrt %26 : vector<17x1xf32>
    %28 = vector.broadcast %27 : vector<17x1xf32> to vector<17x32xf32>
    %29 = arith.mulf %24, %28 : vector<17x32xf32>
    %30 = vector.broadcast %9 : vector<1x32xf32> to vector<17x32xf32>
    %31 = arith.mulf %29, %30 : vector<17x32xf32>
    %32 = vector.broadcast %11 : vector<1x32xf32> to vector<17x32xf32>
    %33 = arith.addf %31, %32 : vector<17x32xf32>
    %c0_21 = arith.constant 0 : index
    %c0_22 = arith.constant 0 : index
    %c0_23 = arith.constant 0 : index
    %34 = vector.load %arg6[%c0_21, %c0_22, %c0_23] : memref<2x32x96xf32, #tpu.memory_space<vmem>>, vector<1x32x96xf32>
    %35 = vector.shape_cast %34 : vector<1x32x96xf32> to vector<32x96xf32>
    %cst_24 = arith.constant dense<0.000000e+00> : vector<17x96xf32>
    %36 = tpu.matmul %33, %35, %cst_24 {dimension_numbers = #tpu.dot_dimension_numbers<[1], [0], [0], [1], [0, 0, 1, 1], [], []>} : vector<17x32xf32>, vector<32x96xf32>, vector<17x96xf32> -> vector<17x96xf32>
    %c0_25 = arith.constant 0 : index
    %c0_26 = arith.constant 0 : index
    %c0_27 = arith.constant 0 : index
    %37 = vector.load %arg7[%c0_25, %c0_26, %c0_27] : memref<2x1x96xf32, #tpu.memory_space<vmem>>, vector<1x1x96xf32>
    %38 = vector.shape_cast %37 : vector<1x1x96xf32> to vector<1x96xf32>
    %39 = vector.broadcast %38 : vector<1x96xf32> to vector<17x96xf32>
    %40 = arith.addf %36, %39 : vector<17x96xf32>
    %41 = vector.extract_strided_slice %40 {offsets = [0, 0], sizes = [17, 8], strides = [1, 1]} : vector<17x96xf32> to vector<17x8xf32>
    %42 = vector.shape_cast %41 : vector<17x8xf32> to vector<1x17x8xf32>
    %43 = vector.extract_strided_slice %40 {offsets = [0, 8], sizes = [17, 8], strides = [1, 1]} : vector<17x96xf32> to vector<17x8xf32>
    %44 = vector.shape_cast %43 : vector<17x8xf32> to vector<1x17x8xf32>
    %45 = vector.extract_strided_slice %40 {offsets = [0, 16], sizes = [17, 8], strides = [1, 1]} : vector<17x96xf32> to vector<17x8xf32>
    %46 = vector.shape_cast %45 : vector<17x8xf32> to vector<1x17x8xf32>
    %47 = vector.extract_strided_slice %40 {offsets = [0, 24], sizes = [17, 8], strides = [1, 1]} : vector<17x96xf32> to vector<17x8xf32>
    %48 = vector.shape_cast %47 : vector<17x8xf32> to vector<1x17x8xf32>
    %49 = tpu.concatenate %42, %44, %46, %48 in 0 : vector<1x17x8xf32>, vector<1x17x8xf32>, vector<1x17x8xf32>, vector<1x17x8xf32> -> vector<4x17x8xf32>
    %50 = vector.extract_strided_slice %40 {offsets = [0, 32], sizes = [17, 8], strides = [1, 1]} : vector<17x96xf32> to vector<17x8xf32>
    %51 = vector.shape_cast %50 : vector<17x8xf32> to vector<1x17x8xf32>
    %52 = vector.extract_strided_slice %40 {offsets = [0, 40], sizes = [17, 8], strides = [1, 1]} : vector<17x96xf32> to vector<17x8xf32>
    %53 = vector.shape_cast %52 : vector<17x8xf32> to vector<1x17x8xf32>
    %54 = vector.extract_strided_slice %40 {offsets = [0, 48], sizes = [17, 8], strides = [1, 1]} : vector<17x96xf32> to vector<17x8xf32>
    %55 = vector.shape_cast %54 : vector<17x8xf32> to vector<1x17x8xf32>
    %56 = vector.extract_strided_slice %40 {offsets = [0, 56], sizes = [17, 8], strides = [1, 1]} : vector<17x96xf32> to vector<17x8xf32>
    %57 = vector.shape_cast %56 : vector<17x8xf32> to vector<1x17x8xf32>
    %58 = tpu.concatenate %51, %53, %55, %57 in 0 : vector<1x17x8xf32>, vector<1x17x8xf32>, vector<1x17x8xf32>, vector<1x17x8xf32> -> vector<4x17x8xf32>
    %59 = vector.extract_strided_slice %40 {offsets = [0, 64], sizes = [17, 8], strides = [1, 1]} : vector<17x96xf32> to vector<17x8xf32>
    %60 = vector.shape_cast %59 : vector<17x8xf32> to vector<1x17x8xf32>
    %61 = vector.extract_strided_slice %40 {offsets = [0, 72], sizes = [17, 8], strides = [1, 1]} : vector<17x96xf32> to vector<17x8xf32>
    %62 = vector.shape_cast %61 : vector<17x8xf32> to vector<1x17x8xf32>
    %63 = vector.extract_strided_slice %40 {offsets = [0, 80], sizes = [17, 8], strides = [1, 1]} : vector<17x96xf32> to vector<17x8xf32>
    %64 = vector.shape_cast %63 : vector<17x8xf32> to vector<1x17x8xf32>
    %65 = vector.extract_strided_slice %40 {offsets = [0, 88], sizes = [17, 8], strides = [1, 1]} : vector<17x96xf32> to vector<17x8xf32>
    %66 = vector.shape_cast %65 : vector<17x8xf32> to vector<1x17x8xf32>
    %67 = tpu.concatenate %60, %62, %64, %66 in 0 : vector<1x17x8xf32>, vector<1x17x8xf32>, vector<1x17x8xf32>, vector<1x17x8xf32> -> vector<4x17x8xf32>
    "tpu.trace_start"() <{level = 10 : i32, message = "hqd,hkd->hqk"}> : () -> ()
    %cst_28 = arith.constant dense<0.000000e+00> : vector<4x17x17xf32>
    %68 = tpu.matmul %49, %58, %cst_28 {dimension_numbers = #tpu.dot_dimension_numbers<[2], [2], [1], [1], [0, 0, 0, 1, 1, 1], [0], [0]>} : vector<4x17x8xf32>, vector<4x17x8xf32>, vector<4x17x17xf32> -> vector<4x17x17xf32>
    "tpu.trace_stop"() : () -> ()
    %cst_29 = arith.constant dense<0xFF800000> : vector<4x17xf32>
    %69 = vector.multi_reduction <maximumf>, %68, %cst_29 [2] : vector<4x17x17xf32> to vector<4x17xf32>
    %70 = vector.shape_cast %69 : vector<4x17xf32> to vector<4x17x1xf32>
    %71 = vector.broadcast %70 : vector<4x17x1xf32> to vector<4x17x17xf32>
    %72 = arith.subf %68, %71 : vector<4x17x17xf32>
    %73 = math.exp %72 : vector<4x17x17xf32>
    %cst_30 = arith.constant dense<0.000000e+00> : vector<4x17xf32>
    %74 = vector.multi_reduction <add>, %73, %cst_30 [2] : vector<4x17x17xf32> to vector<4x17xf32>
    %75 = vector.shape_cast %74 : vector<4x17xf32> to vector<4x17x1xf32>
    %76 = tpu.reciprocal %75 {approx = true} : vector<4x17x1xf32> -> vector<4x17x1xf32>
    %77 = vector.broadcast %76 : vector<4x17x1xf32> to vector<4x17x17xf32>
    %78 = arith.mulf %73, %77 : vector<4x17x17xf32>
    "tpu.trace_start"() <{level = 10 : i32, message = "hqk,hkd->hqd"}> : () -> ()
    %cst_31 = arith.constant dense<0.000000e+00> : vector<4x17x8xf32>
    %79 = tpu.matmul %78, %67, %cst_31 {dimension_numbers = #tpu.dot_dimension_numbers<[2], [1], [1], [2], [0, 0, 0, 1, 1, 2], [0], [0]>} : vector<4x17x17xf32>, vector<4x17x8xf32>, vector<4x17x8xf32> -> vector<4x17x8xf32>
    "tpu.trace_stop"() : () -> ()
    %80 = vector.extract_strided_slice %79 {offsets = [0, 0, 0], sizes = [1, 17, 8], strides = [1, 1, 1]} : vector<4x17x8xf32> to vector<1x17x8xf32>
    %81 = vector.shape_cast %80 : vector<1x17x8xf32> to vector<17x8xf32>
    %82 = vector.extract_strided_slice %79 {offsets = [1, 0, 0], sizes = [1, 17, 8], strides = [1, 1, 1]} : vector<4x17x8xf32> to vector<1x17x8xf32>
    %83 = vector.shape_cast %82 : vector<1x17x8xf32> to vector<17x8xf32>
    %84 = vector.extract_strided_slice %79 {offsets = [2, 0, 0], sizes = [1, 17, 8], strides = [1, 1, 1]} : vector<4x17x8xf32> to vector<1x17x8xf32>
    %85 = vector.shape_cast %84 : vector<1x17x8xf32> to vector<17x8xf32>
    %86 = vector.extract_strided_slice %79 {offsets = [3, 0, 0], sizes = [1, 17, 8], strides = [1, 1, 1]} : vector<4x17x8xf32> to vector<1x17x8xf32>
    %87 = vector.shape_cast %86 : vector<1x17x8xf32> to vector<17x8xf32>
    %88 = tpu.concatenate %81, %83, %85, %87 in 1 : vector<17x8xf32>, vector<17x8xf32>, vector<17x8xf32>, vector<17x8xf32> -> vector<17x32xf32>
    %c0_32 = arith.constant 0 : index
    %c0_33 = arith.constant 0 : index
    %c0_34 = arith.constant 0 : index
    %89 = vector.load %arg8[%c0_32, %c0_33, %c0_34] : memref<2x32x32xf32, #tpu.memory_space<vmem>>, vector<1x32x32xf32>
    %90 = vector.shape_cast %89 : vector<1x32x32xf32> to vector<32x32xf32>
    %cst_35 = arith.constant dense<0.000000e+00> : vector<17x32xf32>
    %91 = tpu.matmul %88, %90, %cst_35 {dimension_numbers = #tpu.dot_dimension_numbers<[1], [0], [0], [1], [0, 0, 1, 1], [], []>} : vector<17x32xf32>, vector<32x32xf32>, vector<17x32xf32> -> vector<17x32xf32>
    %c0_36 = arith.constant 0 : index
    %c0_37 = arith.constant 0 : index
    %c0_38 = arith.constant 0 : index
    %92 = vector.load %arg9[%c0_36, %c0_37, %c0_38] : memref<2x1x32xf32, #tpu.memory_space<vmem>>, vector<1x1x32xf32>
    %93 = vector.shape_cast %92 : vector<1x1x32xf32> to vector<1x32xf32>
    %94 = vector.broadcast %93 : vector<1x32xf32> to vector<17x32xf32>
    %95 = arith.addf %91, %94 : vector<17x32xf32>
    %96 = arith.addf %7, %95 : vector<17x32xf32>
    %c0_39 = arith.constant 0 : index
    %c0_40 = arith.constant 0 : index
    %c0_41 = arith.constant 0 : index
    %97 = vector.load %arg10[%c0_39, %c0_40, %c0_41] : memref<2x1x32xf32, #tpu.memory_space<vmem>>, vector<1x1x32xf32>
    %98 = vector.shape_cast %97 : vector<1x1x32xf32> to vector<1x32xf32>
    %c0_42 = arith.constant 0 : index
    %c0_43 = arith.constant 0 : index
    %c0_44 = arith.constant 0 : index
    %99 = vector.load %arg11[%c0_42, %c0_43, %c0_44] : memref<2x1x32xf32, #tpu.memory_space<vmem>>, vector<1x1x32xf32>
    %100 = vector.shape_cast %99 : vector<1x1x32xf32> to vector<1x32xf32>
    %cst_45 = arith.constant dense<0.000000e+00> : vector<17xf32>
    %101 = vector.multi_reduction <add>, %96, %cst_45 [1] : vector<17x32xf32> to vector<17xf32>
    %102 = vector.shape_cast %101 : vector<17xf32> to vector<17x1xf32>
    %cst_46 = arith.constant 3.200000e+01 : f32
    %103 = vector.broadcast %cst_46 : f32 to vector<17x1xf32>
    %104 = arith.divf %102, %103 : vector<17x1xf32>
    %105 = arith.mulf %96, %96 : vector<17x32xf32>
    %cst_47 = arith.constant dense<0.000000e+00> : vector<17xf32>
    %106 = vector.multi_reduction <add>, %105, %cst_47 [1] : vector<17x32xf32> to vector<17xf32>
    %107 = vector.shape_cast %106 : vector<17xf32> to vector<17x1xf32>
    %cst_48 = arith.constant 3.200000e+01 : f32
    %108 = vector.broadcast %cst_48 : f32 to vector<17x1xf32>
    %109 = arith.divf %107, %108 : vector<17x1xf32>
    %110 = arith.mulf %104, %104 : vector<17x1xf32>
    %111 = arith.subf %109, %110 : vector<17x1xf32>
    %112 = vector.broadcast %104 : vector<17x1xf32> to vector<17x32xf32>
    %113 = arith.subf %96, %112 : vector<17x32xf32>
    %cst_49 = arith.constant 9.99999997E-7 : f32
    %114 = vector.broadcast %cst_49 : f32 to vector<17x1xf32>
    %115 = arith.addf %111, %114 : vector<17x1xf32>
    %116 = math.rsqrt %115 : vector<17x1xf32>
    %117 = vector.broadcast %116 : vector<17x1xf32> to vector<17x32xf32>
    %118 = arith.mulf %113, %117 : vector<17x32xf32>
    %119 = vector.broadcast %98 : vector<1x32xf32> to vector<17x32xf32>
    %120 = arith.mulf %118, %119 : vector<17x32xf32>
    %121 = vector.broadcast %100 : vector<1x32xf32> to vector<17x32xf32>
    %122 = arith.addf %120, %121 : vector<17x32xf32>
    %c0_50 = arith.constant 0 : index
    %c0_51 = arith.constant 0 : index
    %c0_52 = arith.constant 0 : index
    %123 = vector.load %arg12[%c0_50, %c0_51, %c0_52] : memref<2x32x128xf32, #tpu.memory_space<vmem>>, vector<1x32x128xf32>
    %124 = vector.shape_cast %123 : vector<1x32x128xf32> to vector<32x128xf32>
    %cst_53 = arith.constant dense<0.000000e+00> : vector<17x128xf32>
    %125 = tpu.matmul %122, %124, %cst_53 {dimension_numbers = #tpu.dot_dimension_numbers<[1], [0], [0], [1], [0, 0, 1, 1], [], []>} : vector<17x32xf32>, vector<32x128xf32>, vector<17x128xf32> -> vector<17x128xf32>
    %c0_54 = arith.constant 0 : index
    %c0_55 = arith.constant 0 : index
    %c0_56 = arith.constant 0 : index
    %126 = vector.load %arg13[%c0_54, %c0_55, %c0_56] : memref<2x1x128xf32, #tpu.memory_space<vmem>>, vector<1x1x128xf32>
    %127 = vector.shape_cast %126 : vector<1x1x128xf32> to vector<1x128xf32>
    %128 = vector.broadcast %127 : vector<1x128xf32> to vector<17x128xf32>
    %129 = arith.addf %125, %128 : vector<17x128xf32>
    %cst_57 = arith.constant 5.000000e-01 : f32
    %130 = vector.broadcast %cst_57 : f32 to vector<17x128xf32>
    %131 = arith.mulf %130, %129 : vector<17x128xf32>
    %132 = arith.mulf %129, %129 : vector<17x128xf32>
    %133 = arith.mulf %132, %129 : vector<17x128xf32>
    %cst_58 = arith.constant 4.471500e-02 : f32
    %134 = vector.broadcast %cst_58 : f32 to vector<17x128xf32>
    %135 = arith.mulf %134, %133 : vector<17x128xf32>
    %136 = arith.addf %129, %135 : vector<17x128xf32>
    %cst_59 = arith.constant 0.797884583 : f32
    %137 = vector.broadcast %cst_59 : f32 to vector<17x128xf32>
    %138 = arith.mulf %137, %136 : vector<17x128xf32>
    %139 = math.tanh %138 : vector<17x128xf32>
    %cst_60 = arith.constant 1.000000e+00 : f32
    %140 = vector.broadcast %cst_60 : f32 to vector<17x128xf32>
    %141 = arith.addf %140, %139 : vector<17x128xf32>
    %142 = arith.mulf %131, %141 : vector<17x128xf32>
    %c0_61 = arith.constant 0 : index
    %c0_62 = arith.constant 0 : index
    %c0_63 = arith.constant 0 : index
    %143 = vector.load %arg14[%c0_61, %c0_62, %c0_63] : memref<2x128x32xf32, #tpu.memory_space<vmem>>, vector<1x128x32xf32>
    %144 = vector.shape_cast %143 : vector<1x128x32xf32> to vector<128x32xf32>
    %cst_64 = arith.constant dense<0.000000e+00> : vector<17x32xf32>
    %145 = tpu.matmul %142, %144, %cst_64 {dimension_numbers = #tpu.dot_dimension_numbers<[1], [0], [0], [1], [0, 0, 1, 1], [], []>} : vector<17x128xf32>, vector<128x32xf32>, vector<17x32xf32> -> vector<17x32xf32>
    %c0_65 = arith.constant 0 : index
    %c0_66 = arith.constant 0 : index
    %c0_67 = arith.constant 0 : index
    %146 = vector.load %arg15[%c0_65, %c0_66, %c0_67] : memref<2x1x32xf32, #tpu.memory_space<vmem>>, vector<1x1x32xf32>
    %147 = vector.shape_cast %146 : vector<1x1x32xf32> to vector<1x32xf32>
    %148 = vector.broadcast %147 : vector<1x32xf32> to vector<17x32xf32>
    %149 = arith.addf %145, %148 : vector<17x32xf32>
    %150 = arith.addf %96, %149 : vector<17x32xf32>
    %c1 = arith.constant 1 : index
    %c0_68 = arith.constant 0 : index
    %c0_69 = arith.constant 0 : index
    %151 = vector.load %arg4[%c1, %c0_68, %c0_69] : memref<2x1x32xf32, #tpu.memory_space<vmem>>, vector<1x1x32xf32>
    %152 = vector.shape_cast %151 : vector<1x1x32xf32> to vector<1x32xf32>
    %c1_70 = arith.constant 1 : index
    %c0_71 = arith.constant 0 : index
    %c0_72 = arith.constant 0 : index
    %153 = vector.load %arg5[%c1_70, %c0_71, %c0_72] : memref<2x1x32xf32, #tpu.memory_space<vmem>>, vector<1x1x32xf32>
    %154 = vector.shape_cast %153 : vector<1x1x32xf32> to vector<1x32xf32>
    %cst_73 = arith.constant dense<0.000000e+00> : vector<17xf32>
    %155 = vector.multi_reduction <add>, %150, %cst_73 [1] : vector<17x32xf32> to vector<17xf32>
    %156 = vector.shape_cast %155 : vector<17xf32> to vector<17x1xf32>
    %cst_74 = arith.constant 3.200000e+01 : f32
    %157 = vector.broadcast %cst_74 : f32 to vector<17x1xf32>
    %158 = arith.divf %156, %157 : vector<17x1xf32>
    %159 = arith.mulf %150, %150 : vector<17x32xf32>
    %cst_75 = arith.constant dense<0.000000e+00> : vector<17xf32>
    %160 = vector.multi_reduction <add>, %159, %cst_75 [1] : vector<17x32xf32> to vector<17xf32>
    %161 = vector.shape_cast %160 : vector<17xf32> to vector<17x1xf32>
    %cst_76 = arith.constant 3.200000e+01 : f32
    %162 = vector.broadcast %cst_76 : f32 to vector<17x1xf32>
    %163 = arith.divf %161, %162 : vector<17x1xf32>
    %164 = arith.mulf %158, %158 : vector<17x1xf32>
    %165 = arith.subf %163, %164 : vector<17x1xf32>
    %166 = vector.broadcast %158 : vector<17x1xf32> to vector<17x32xf32>
    %167 = arith.subf %150, %166 : vector<17x32xf32>
    %cst_77 = arith.constant 9.99999997E-7 : f32
    %168 = vector.broadcast %cst_77 : f32 to vector<17x1xf32>
    %169 = arith.addf %165, %168 : vector<17x1xf32>
    %170 = math.rsqrt %169 : vector<17x1xf32>
    %171 = vector.broadcast %170 : vector<17x1xf32> to vector<17x32xf32>
    %172 = arith.mulf %167, %171 : vector<17x32xf32>
    %173 = vector.broadcast %152 : vector<1x32xf32> to vector<17x32xf32>
    %174 = arith.mulf %172, %173 : vector<17x32xf32>
    %175 = vector.broadcast %154 : vector<1x32xf32> to vector<17x32xf32>
    %176 = arith.addf %174, %175 : vector<17x32xf32>
    %c1_78 = arith.constant 1 : index
    %c0_79 = arith.constant 0 : index
    %c0_80 = arith.constant 0 : index
    %177 = vector.load %arg6[%c1_78, %c0_79, %c0_80] : memref<2x32x96xf32, #tpu.memory_space<vmem>>, vector<1x32x96xf32>
    %178 = vector.shape_cast %177 : vector<1x32x96xf32> to vector<32x96xf32>
    %cst_81 = arith.constant dense<0.000000e+00> : vector<17x96xf32>
    %179 = tpu.matmul %176, %178, %cst_81 {dimension_numbers = #tpu.dot_dimension_numbers<[1], [0], [0], [1], [0, 0, 1, 1], [], []>} : vector<17x32xf32>, vector<32x96xf32>, vector<17x96xf32> -> vector<17x96xf32>
    %c1_82 = arith.constant 1 : index
    %c0_83 = arith.constant 0 : index
    %c0_84 = arith.constant 0 : index
    %180 = vector.load %arg7[%c1_82, %c0_83, %c0_84] : memref<2x1x96xf32, #tpu.memory_space<vmem>>, vector<1x1x96xf32>
    %181 = vector.shape_cast %180 : vector<1x1x96xf32> to vector<1x96xf32>
    %182 = vector.broadcast %181 : vector<1x96xf32> to vector<17x96xf32>
    %183 = arith.addf %179, %182 : vector<17x96xf32>
    %184 = vector.extract_strided_slice %183 {offsets = [0, 0], sizes = [17, 8], strides = [1, 1]} : vector<17x96xf32> to vector<17x8xf32>
    %185 = vector.shape_cast %184 : vector<17x8xf32> to vector<1x17x8xf32>
    %186 = vector.extract_strided_slice %183 {offsets = [0, 8], sizes = [17, 8], strides = [1, 1]} : vector<17x96xf32> to vector<17x8xf32>
    %187 = vector.shape_cast %186 : vector<17x8xf32> to vector<1x17x8xf32>
    %188 = vector.extract_strided_slice %183 {offsets = [0, 16], sizes = [17, 8], strides = [1, 1]} : vector<17x96xf32> to vector<17x8xf32>
    %189 = vector.shape_cast %188 : vector<17x8xf32> to vector<1x17x8xf32>
    %190 = vector.extract_strided_slice %183 {offsets = [0, 24], sizes = [17, 8], strides = [1, 1]} : vector<17x96xf32> to vector<17x8xf32>
    %191 = vector.shape_cast %190 : vector<17x8xf32> to vector<1x17x8xf32>
    %192 = tpu.concatenate %185, %187, %189, %191 in 0 : vector<1x17x8xf32>, vector<1x17x8xf32>, vector<1x17x8xf32>, vector<1x17x8xf32> -> vector<4x17x8xf32>
    %193 = vector.extract_strided_slice %183 {offsets = [0, 32], sizes = [17, 8], strides = [1, 1]} : vector<17x96xf32> to vector<17x8xf32>
    %194 = vector.shape_cast %193 : vector<17x8xf32> to vector<1x17x8xf32>
    %195 = vector.extract_strided_slice %183 {offsets = [0, 40], sizes = [17, 8], strides = [1, 1]} : vector<17x96xf32> to vector<17x8xf32>
    %196 = vector.shape_cast %195 : vector<17x8xf32> to vector<1x17x8xf32>
    %197 = vector.extract_strided_slice %183 {offsets = [0, 48], sizes = [17, 8], strides = [1, 1]} : vector<17x96xf32> to vector<17x8xf32>
    %198 = vector.shape_cast %197 : vector<17x8xf32> to vector<1x17x8xf32>
    %199 = vector.extract_strided_slice %183 {offsets = [0, 56], sizes = [17, 8], strides = [1, 1]} : vector<17x96xf32> to vector<17x8xf32>
    %200 = vector.shape_cast %199 : vector<17x8xf32> to vector<1x17x8xf32>
    %201 = tpu.concatenate %194, %196, %198, %200 in 0 : vector<1x17x8xf32>, vector<1x17x8xf32>, vector<1x17x8xf32>, vector<1x17x8xf32> -> vector<4x17x8xf32>
    %202 = vector.extract_strided_slice %183 {offsets = [0, 64], sizes = [17, 8], strides = [1, 1]} : vector<17x96xf32> to vector<17x8xf32>
    %203 = vector.shape_cast %202 : vector<17x8xf32> to vector<1x17x8xf32>
    %204 = vector.extract_strided_slice %183 {offsets = [0, 72], sizes = [17, 8], strides = [1, 1]} : vector<17x96xf32> to vector<17x8xf32>
    %205 = vector.shape_cast %204 : vector<17x8xf32> to vector<1x17x8xf32>
    %206 = vector.extract_strided_slice %183 {offsets = [0, 80], sizes = [17, 8], strides = [1, 1]} : vector<17x96xf32> to vector<17x8xf32>
    %207 = vector.shape_cast %206 : vector<17x8xf32> to vector<1x17x8xf32>
    %208 = vector.extract_strided_slice %183 {offsets = [0, 88], sizes = [17, 8], strides = [1, 1]} : vector<17x96xf32> to vector<17x8xf32>
    %209 = vector.shape_cast %208 : vector<17x8xf32> to vector<1x17x8xf32>
    %210 = tpu.concatenate %203, %205, %207, %209 in 0 : vector<1x17x8xf32>, vector<1x17x8xf32>, vector<1x17x8xf32>, vector<1x17x8xf32> -> vector<4x17x8xf32>
    "tpu.trace_start"() <{level = 10 : i32, message = "hqd,hkd->hqk"}> : () -> ()
    %cst_85 = arith.constant dense<0.000000e+00> : vector<4x17x17xf32>
    %211 = tpu.matmul %192, %201, %cst_85 {dimension_numbers = #tpu.dot_dimension_numbers<[2], [2], [1], [1], [0, 0, 0, 1, 1, 1], [0], [0]>} : vector<4x17x8xf32>, vector<4x17x8xf32>, vector<4x17x17xf32> -> vector<4x17x17xf32>
    "tpu.trace_stop"() : () -> ()
    %cst_86 = arith.constant dense<0xFF800000> : vector<4x17xf32>
    %212 = vector.multi_reduction <maximumf>, %211, %cst_86 [2] : vector<4x17x17xf32> to vector<4x17xf32>
    %213 = vector.shape_cast %212 : vector<4x17xf32> to vector<4x17x1xf32>
    %214 = vector.broadcast %213 : vector<4x17x1xf32> to vector<4x17x17xf32>
    %215 = arith.subf %211, %214 : vector<4x17x17xf32>
    %216 = math.exp %215 : vector<4x17x17xf32>
    %cst_87 = arith.constant dense<0.000000e+00> : vector<4x17xf32>
    %217 = vector.multi_reduction <add>, %216, %cst_87 [2] : vector<4x17x17xf32> to vector<4x17xf32>
    %218 = vector.shape_cast %217 : vector<4x17xf32> to vector<4x17x1xf32>
    %219 = tpu.reciprocal %218 {approx = true} : vector<4x17x1xf32> -> vector<4x17x1xf32>
    %220 = vector.broadcast %219 : vector<4x17x1xf32> to vector<4x17x17xf32>
    %221 = arith.mulf %216, %220 : vector<4x17x17xf32>
    "tpu.trace_start"() <{level = 10 : i32, message = "hqk,hkd->hqd"}> : () -> ()
    %cst_88 = arith.constant dense<0.000000e+00> : vector<4x17x8xf32>
    %222 = tpu.matmul %221, %210, %cst_88 {dimension_numbers = #tpu.dot_dimension_numbers<[2], [1], [1], [2], [0, 0, 0, 1, 1, 2], [0], [0]>} : vector<4x17x17xf32>, vector<4x17x8xf32>, vector<4x17x8xf32> -> vector<4x17x8xf32>
    "tpu.trace_stop"() : () -> ()
    %223 = vector.extract_strided_slice %222 {offsets = [0, 0, 0], sizes = [1, 17, 8], strides = [1, 1, 1]} : vector<4x17x8xf32> to vector<1x17x8xf32>
    %224 = vector.shape_cast %223 : vector<1x17x8xf32> to vector<17x8xf32>
    %225 = vector.extract_strided_slice %222 {offsets = [1, 0, 0], sizes = [1, 17, 8], strides = [1, 1, 1]} : vector<4x17x8xf32> to vector<1x17x8xf32>
    %226 = vector.shape_cast %225 : vector<1x17x8xf32> to vector<17x8xf32>
    %227 = vector.extract_strided_slice %222 {offsets = [2, 0, 0], sizes = [1, 17, 8], strides = [1, 1, 1]} : vector<4x17x8xf32> to vector<1x17x8xf32>
    %228 = vector.shape_cast %227 : vector<1x17x8xf32> to vector<17x8xf32>
    %229 = vector.extract_strided_slice %222 {offsets = [3, 0, 0], sizes = [1, 17, 8], strides = [1, 1, 1]} : vector<4x17x8xf32> to vector<1x17x8xf32>
    %230 = vector.shape_cast %229 : vector<1x17x8xf32> to vector<17x8xf32>
    %231 = tpu.concatenate %224, %226, %228, %230 in 1 : vector<17x8xf32>, vector<17x8xf32>, vector<17x8xf32>, vector<17x8xf32> -> vector<17x32xf32>
    %c1_89 = arith.constant 1 : index
    %c0_90 = arith.constant 0 : index
    %c0_91 = arith.constant 0 : index
    %232 = vector.load %arg8[%c1_89, %c0_90, %c0_91] : memref<2x32x32xf32, #tpu.memory_space<vmem>>, vector<1x32x32xf32>
    %233 = vector.shape_cast %232 : vector<1x32x32xf32> to vector<32x32xf32>
    %cst_92 = arith.constant dense<0.000000e+00> : vector<17x32xf32>
    %234 = tpu.matmul %231, %233, %cst_92 {dimension_numbers = #tpu.dot_dimension_numbers<[1], [0], [0], [1], [0, 0, 1, 1], [], []>} : vector<17x32xf32>, vector<32x32xf32>, vector<17x32xf32> -> vector<17x32xf32>
    %c1_93 = arith.constant 1 : index
    %c0_94 = arith.constant 0 : index
    %c0_95 = arith.constant 0 : index
    %235 = vector.load %arg9[%c1_93, %c0_94, %c0_95] : memref<2x1x32xf32, #tpu.memory_space<vmem>>, vector<1x1x32xf32>
    %236 = vector.shape_cast %235 : vector<1x1x32xf32> to vector<1x32xf32>
    %237 = vector.broadcast %236 : vector<1x32xf32> to vector<17x32xf32>
    %238 = arith.addf %234, %237 : vector<17x32xf32>
    %239 = arith.addf %150, %238 : vector<17x32xf32>
    %c1_96 = arith.constant 1 : index
    %c0_97 = arith.constant 0 : index
    %c0_98 = arith.constant 0 : index
    %240 = vector.load %arg10[%c1_96, %c0_97, %c0_98] : memref<2x1x32xf32, #tpu.memory_space<vmem>>, vector<1x1x32xf32>
    %241 = vector.shape_cast %240 : vector<1x1x32xf32> to vector<1x32xf32>
    %c1_99 = arith.constant 1 : index
    %c0_100 = arith.constant 0 : index
    %c0_101 = arith.constant 0 : index
    %242 = vector.load %arg11[%c1_99, %c0_100, %c0_101] : memref<2x1x32xf32, #tpu.memory_space<vmem>>, vector<1x1x32xf32>
    %243 = vector.shape_cast %242 : vector<1x1x32xf32> to vector<1x32xf32>
    %cst_102 = arith.constant dense<0.000000e+00> : vector<17xf32>
    %244 = vector.multi_reduction <add>, %239, %cst_102 [1] : vector<17x32xf32> to vector<17xf32>
    %245 = vector.shape_cast %244 : vector<17xf32> to vector<17x1xf32>
    %cst_103 = arith.constant 3.200000e+01 : f32
    %246 = vector.broadcast %cst_103 : f32 to vector<17x1xf32>
    %247 = arith.divf %245, %246 : vector<17x1xf32>
    %248 = arith.mulf %239, %239 : vector<17x32xf32>
    %cst_104 = arith.constant dense<0.000000e+00> : vector<17xf32>
    %249 = vector.multi_reduction <add>, %248, %cst_104 [1] : vector<17x32xf32> to vector<17xf32>
    %250 = vector.shape_cast %249 : vector<17xf32> to vector<17x1xf32>
    %cst_105 = arith.constant 3.200000e+01 : f32
    %251 = vector.broadcast %cst_105 : f32 to vector<17x1xf32>
    %252 = arith.divf %250, %251 : vector<17x1xf32>
    %253 = arith.mulf %247, %247 : vector<17x1xf32>
    %254 = arith.subf %252, %253 : vector<17x1xf32>
    %255 = vector.broadcast %247 : vector<17x1xf32> to vector<17x32xf32>
    %256 = arith.subf %239, %255 : vector<17x32xf32>
    %cst_106 = arith.constant 9.99999997E-7 : f32
    %257 = vector.broadcast %cst_106 : f32 to vector<17x1xf32>
    %258 = arith.addf %254, %257 : vector<17x1xf32>
    %259 = math.rsqrt %258 : vector<17x1xf32>
    %260 = vector.broadcast %259 : vector<17x1xf32> to vector<17x32xf32>
    %261 = arith.mulf %256, %260 : vector<17x32xf32>
    %262 = vector.broadcast %241 : vector<1x32xf32> to vector<17x32xf32>
    %263 = arith.mulf %261, %262 : vector<17x32xf32>
    %264 = vector.broadcast %243 : vector<1x32xf32> to vector<17x32xf32>
    %265 = arith.addf %263, %264 : vector<17x32xf32>
    %c1_107 = arith.constant 1 : index
    %c0_108 = arith.constant 0 : index
    %c0_109 = arith.constant 0 : index
    %266 = vector.load %arg12[%c1_107, %c0_108, %c0_109] : memref<2x32x128xf32, #tpu.memory_space<vmem>>, vector<1x32x128xf32>
    %267 = vector.shape_cast %266 : vector<1x32x128xf32> to vector<32x128xf32>
    %cst_110 = arith.constant dense<0.000000e+00> : vector<17x128xf32>
    %268 = tpu.matmul %265, %267, %cst_110 {dimension_numbers = #tpu.dot_dimension_numbers<[1], [0], [0], [1], [0, 0, 1, 1], [], []>} : vector<17x32xf32>, vector<32x128xf32>, vector<17x128xf32> -> vector<17x128xf32>
    %c1_111 = arith.constant 1 : index
    %c0_112 = arith.constant 0 : index
    %c0_113 = arith.constant 0 : index
    %269 = vector.load %arg13[%c1_111, %c0_112, %c0_113] : memref<2x1x128xf32, #tpu.memory_space<vmem>>, vector<1x1x128xf32>
    %270 = vector.shape_cast %269 : vector<1x1x128xf32> to vector<1x128xf32>
    %271 = vector.broadcast %270 : vector<1x128xf32> to vector<17x128xf32>
    %272 = arith.addf %268, %271 : vector<17x128xf32>
    %cst_114 = arith.constant 5.000000e-01 : f32
    %273 = vector.broadcast %cst_114 : f32 to vector<17x128xf32>
    %274 = arith.mulf %273, %272 : vector<17x128xf32>
    %275 = arith.mulf %272, %272 : vector<17x128xf32>
    %276 = arith.mulf %275, %272 : vector<17x128xf32>
    %cst_115 = arith.constant 4.471500e-02 : f32
    %277 = vector.broadcast %cst_115 : f32 to vector<17x128xf32>
    %278 = arith.mulf %277, %276 : vector<17x128xf32>
    %279 = arith.addf %272, %278 : vector<17x128xf32>
    %cst_116 = arith.constant 0.797884583 : f32
    %280 = vector.broadcast %cst_116 : f32 to vector<17x128xf32>
    %281 = arith.mulf %280, %279 : vector<17x128xf32>
    %282 = math.tanh %281 : vector<17x128xf32>
    %cst_117 = arith.constant 1.000000e+00 : f32
    %283 = vector.broadcast %cst_117 : f32 to vector<17x128xf32>
    %284 = arith.addf %283, %282 : vector<17x128xf32>
    %285 = arith.mulf %274, %284 : vector<17x128xf32>
    %c1_118 = arith.constant 1 : index
    %c0_119 = arith.constant 0 : index
    %c0_120 = arith.constant 0 : index
    %286 = vector.load %arg14[%c1_118, %c0_119, %c0_120] : memref<2x128x32xf32, #tpu.memory_space<vmem>>, vector<1x128x32xf32>
    %287 = vector.shape_cast %286 : vector<1x128x32xf32> to vector<128x32xf32>
    %cst_121 = arith.constant dense<0.000000e+00> : vector<17x32xf32>
    %288 = tpu.matmul %285, %287, %cst_121 {dimension_numbers = #tpu.dot_dimension_numbers<[1], [0], [0], [1], [0, 0, 1, 1], [], []>} : vector<17x128xf32>, vector<128x32xf32>, vector<17x32xf32> -> vector<17x32xf32>
    %c1_122 = arith.constant 1 : index
    %c0_123 = arith.constant 0 : index
    %c0_124 = arith.constant 0 : index
    %289 = vector.load %arg15[%c1_122, %c0_123, %c0_124] : memref<2x1x32xf32, #tpu.memory_space<vmem>>, vector<1x1x32xf32>
    %290 = vector.shape_cast %289 : vector<1x1x32xf32> to vector<1x32xf32>
    %291 = vector.broadcast %290 : vector<1x32xf32> to vector<17x32xf32>
    %292 = arith.addf %288, %291 : vector<17x32xf32>
    %293 = arith.addf %239, %292 : vector<17x32xf32>
    %294 = vector.extract_strided_slice %293 {offsets = [0, 0], sizes = [1, 32], strides = [1, 1]} : vector<17x32xf32> to vector<1x32xf32>
    %cst_125 = arith.constant dense<0.000000e+00> : vector<1x128xf32>
    %295 = tpu.matmul %294, %2, %cst_125 {dimension_numbers = #tpu.dot_dimension_numbers<[1], [0], [0], [1], [0, 0, 1, 1], [], []>} : vector<1x32xf32>, vector<32x128xf32>, vector<1x128xf32> -> vector<1x128xf32>
    %296 = arith.addf %295, %3 : vector<1x128xf32>
    %c0_126 = arith.constant 0 : index
    %c0_127 = arith.constant 0 : index
    %c0_128 = arith.constant 0 : index
    %297 = vector.load %arg18[%c0_126, %c0_127, %c0_128] : memref<2x1x128xf32, #tpu.memory_space<vmem>>, vector<1x1x128xf32>
    %298 = vector.shape_cast %297 : vector<1x1x128xf32> to vector<1x128xf32>
    %299 = vector.shape_cast %296 : vector<1x128xf32> to vector<1x1x128xf32>
    tpu.vector_store %arg18[%c0_126, %c0_127, %c0_128], %299 {strides = array<i32>} : memref<2x1x128xf32, #tpu.memory_space<vmem>>, vector<1x1x128xf32>,
    %c1_129 = arith.constant 1 : index
    %c0_130 = arith.constant 0 : index
    %c0_131 = arith.constant 0 : index
    %300 = vector.load %arg1[%c1_129, %c0_130, %c0_131] : memref<2x17x48xf32, #tpu.memory_space<vmem>>, vector<1x17x48xf32>
    %301 = vector.shape_cast %300 : vector<1x17x48xf32> to vector<17x48xf32>
    %cst_132 = arith.constant dense<0.000000e+00> : vector<17x32xf32>
    %302 = tpu.matmul %301, %0, %cst_132 {dimension_numbers = #tpu.dot_dimension_numbers<[1], [0], [0], [1], [0, 0, 1, 1], [], []>} : vector<17x48xf32>, vector<48x32xf32>, vector<17x32xf32> -> vector<17x32xf32>
    %303 = arith.addf %302, %1 : vector<17x32xf32>
    %c0_133 = arith.constant 0 : index
    %c0_134 = arith.constant 0 : index
    %c0_135 = arith.constant 0 : index
    %304 = vector.load %arg4[%c0_133, %c0_134, %c0_135] : memref<2x1x32xf32, #tpu.memory_space<vmem>>, vector<1x1x32xf32>
    %305 = vector.shape_cast %304 : vector<1x1x32xf32> to vector<1x32xf32>
    %c0_136 = arith.constant 0 : index
    %c0_137 = arith.constant 0 : index
    %c0_138 = arith.constant 0 : index
    %306 = vector.load %arg5[%c0_136, %c0_137, %c0_138] : memref<2x1x32xf32, #tpu.memory_space<vmem>>, vector<1x1x32xf32>
    %307 = vector.shape_cast %306 : vector<1x1x32xf32> to vector<1x32xf32>
    %cst_139 = arith.constant dense<0.000000e+00> : vector<17xf32>
    %308 = vector.multi_reduction <add>, %303, %cst_139 [1] : vector<17x32xf32> to vector<17xf32>
    %309 = vector.shape_cast %308 : vector<17xf32> to vector<17x1xf32>
    %cst_140 = arith.constant 3.200000e+01 : f32
    %310 = vector.broadcast %cst_140 : f32 to vector<17x1xf32>
    %311 = arith.divf %309, %310 : vector<17x1xf32>
    %312 = arith.mulf %303, %303 : vector<17x32xf32>
    %cst_141 = arith.constant dense<0.000000e+00> : vector<17xf32>
    %313 = vector.multi_reduction <add>, %312, %cst_141 [1] : vector<17x32xf32> to vector<17xf32>
    %314 = vector.shape_cast %313 : vector<17xf32> to vector<17x1xf32>
    %cst_142 = arith.constant 3.200000e+01 : f32
    %315 = vector.broadcast %cst_142 : f32 to vector<17x1xf32>
    %316 = arith.divf %314, %315 : vector<17x1xf32>
    %317 = arith.mulf %311, %311 : vector<17x1xf32>
    %318 = arith.subf %316, %317 : vector<17x1xf32>
    %319 = vector.broadcast %311 : vector<17x1xf32> to vector<17x32xf32>
    %320 = arith.subf %303, %319 : vector<17x32xf32>
    %cst_143 = arith.constant 9.99999997E-7 : f32
    %321 = vector.broadcast %cst_143 : f32 to vector<17x1xf32>
    %322 = arith.addf %318, %321 : vector<17x1xf32>
    %323 = math.rsqrt %322 : vector<17x1xf32>
    %324 = vector.broadcast %323 : vector<17x1xf32> to vector<17x32xf32>
    %325 = arith.mulf %320, %324 : vector<17x32xf32>
    %326 = vector.broadcast %305 : vector<1x32xf32> to vector<17x32xf32>
    %327 = arith.mulf %325, %326 : vector<17x32xf32>
    %328 = vector.broadcast %307 : vector<1x32xf32> to vector<17x32xf32>
    %329 = arith.addf %327, %328 : vector<17x32xf32>
    %c0_144 = arith.constant 0 : index
    %c0_145 = arith.constant 0 : index
    %c0_146 = arith.constant 0 : index
    %330 = vector.load %arg6[%c0_144, %c0_145, %c0_146] : memref<2x32x96xf32, #tpu.memory_space<vmem>>, vector<1x32x96xf32>
    %331 = vector.shape_cast %330 : vector<1x32x96xf32> to vector<32x96xf32>
    %cst_147 = arith.constant dense<0.000000e+00> : vector<17x96xf32>
    %332 = tpu.matmul %329, %331, %cst_147 {dimension_numbers = #tpu.dot_dimension_numbers<[1], [0], [0], [1], [0, 0, 1, 1], [], []>} : vector<17x32xf32>, vector<32x96xf32>, vector<17x96xf32> -> vector<17x96xf32>
    %c0_148 = arith.constant 0 : index
    %c0_149 = arith.constant 0 : index
    %c0_150 = arith.constant 0 : index
    %333 = vector.load %arg7[%c0_148, %c0_149, %c0_150] : memref<2x1x96xf32, #tpu.memory_space<vmem>>, vector<1x1x96xf32>
    %334 = vector.shape_cast %333 : vector<1x1x96xf32> to vector<1x96xf32>
    %335 = vector.broadcast %334 : vector<1x96xf32> to vector<17x96xf32>
    %336 = arith.addf %332, %335 : vector<17x96xf32>
    %337 = vector.extract_strided_slice %336 {offsets = [0, 0], sizes = [17, 8], strides = [1, 1]} : vector<17x96xf32> to vector<17x8xf32>
    %338 = vector.shape_cast %337 : vector<17x8xf32> to vector<1x17x8xf32>
    %339 = vector.extract_strided_slice %336 {offsets = [0, 8], sizes = [17, 8], strides = [1, 1]} : vector<17x96xf32> to vector<17x8xf32>
    %340 = vector.shape_cast %339 : vector<17x8xf32> to vector<1x17x8xf32>
    %341 = vector.extract_strided_slice %336 {offsets = [0, 16], sizes = [17, 8], strides = [1, 1]} : vector<17x96xf32> to vector<17x8xf32>
    %342 = vector.shape_cast %341 : vector<17x8xf32> to vector<1x17x8xf32>
    %343 = vector.extract_strided_slice %336 {offsets = [0, 24], sizes = [17, 8], strides = [1, 1]} : vector<17x96xf32> to vector<17x8xf32>
    %344 = vector.shape_cast %343 : vector<17x8xf32> to vector<1x17x8xf32>
    %345 = tpu.concatenate %338, %340, %342, %344 in 0 : vector<1x17x8xf32>, vector<1x17x8xf32>, vector<1x17x8xf32>, vector<1x17x8xf32> -> vector<4x17x8xf32>
    %346 = vector.extract_strided_slice %336 {offsets = [0, 32], sizes = [17, 8], strides = [1, 1]} : vector<17x96xf32> to vector<17x8xf32>
    %347 = vector.shape_cast %346 : vector<17x8xf32> to vector<1x17x8xf32>
    %348 = vector.extract_strided_slice %336 {offsets = [0, 40], sizes = [17, 8], strides = [1, 1]} : vector<17x96xf32> to vector<17x8xf32>
    %349 = vector.shape_cast %348 : vector<17x8xf32> to vector<1x17x8xf32>
    %350 = vector.extract_strided_slice %336 {offsets = [0, 48], sizes = [17, 8], strides = [1, 1]} : vector<17x96xf32> to vector<17x8xf32>
    %351 = vector.shape_cast %350 : vector<17x8xf32> to vector<1x17x8xf32>
    %352 = vector.extract_strided_slice %336 {offsets = [0, 56], sizes = [17, 8], strides = [1, 1]} : vector<17x96xf32> to vector<17x8xf32>
    %353 = vector.shape_cast %352 : vector<17x8xf32> to vector<1x17x8xf32>
    %354 = tpu.concatenate %347, %349, %351, %353 in 0 : vector<1x17x8xf32>, vector<1x17x8xf32>, vector<1x17x8xf32>, vector<1x17x8xf32> -> vector<4x17x8xf32>
    %355 = vector.extract_strided_slice %336 {offsets = [0, 64], sizes = [17, 8], strides = [1, 1]} : vector<17x96xf32> to vector<17x8xf32>
    %356 = vector.shape_cast %355 : vector<17x8xf32> to vector<1x17x8xf32>
    %357 = vector.extract_strided_slice %336 {offsets = [0, 72], sizes = [17, 8], strides = [1, 1]} : vector<17x96xf32> to vector<17x8xf32>
    %358 = vector.shape_cast %357 : vector<17x8xf32> to vector<1x17x8xf32>
    %359 = vector.extract_strided_slice %336 {offsets = [0, 80], sizes = [17, 8], strides = [1, 1]} : vector<17x96xf32> to vector<17x8xf32>
    %360 = vector.shape_cast %359 : vector<17x8xf32> to vector<1x17x8xf32>
    %361 = vector.extract_strided_slice %336 {offsets = [0, 88], sizes = [17, 8], strides = [1, 1]} : vector<17x96xf32> to vector<17x8xf32>
    %362 = vector.shape_cast %361 : vector<17x8xf32> to vector<1x17x8xf32>
    %363 = tpu.concatenate %356, %358, %360, %362 in 0 : vector<1x17x8xf32>, vector<1x17x8xf32>, vector<1x17x8xf32>, vector<1x17x8xf32> -> vector<4x17x8xf32>
    "tpu.trace_start"() <{level = 10 : i32, message = "hqd,hkd->hqk"}> : () -> ()
    %cst_151 = arith.constant dense<0.000000e+00> : vector<4x17x17xf32>
    %364 = tpu.matmul %345, %354, %cst_151 {dimension_numbers = #tpu.dot_dimension_numbers<[2], [2], [1], [1], [0, 0, 0, 1, 1, 1], [0], [0]>} : vector<4x17x8xf32>, vector<4x17x8xf32>, vector<4x17x17xf32> -> vector<4x17x17xf32>
    "tpu.trace_stop"() : () -> ()
    %cst_152 = arith.constant dense<0xFF800000> : vector<4x17xf32>
    %365 = vector.multi_reduction <maximumf>, %364, %cst_152 [2] : vector<4x17x17xf32> to vector<4x17xf32>
    %366 = vector.shape_cast %365 : vector<4x17xf32> to vector<4x17x1xf32>
    %367 = vector.broadcast %366 : vector<4x17x1xf32> to vector<4x17x17xf32>
    %368 = arith.subf %364, %367 : vector<4x17x17xf32>
    %369 = math.exp %368 : vector<4x17x17xf32>
    %cst_153 = arith.constant dense<0.000000e+00> : vector<4x17xf32>
    %370 = vector.multi_reduction <add>, %369, %cst_153 [2] : vector<4x17x17xf32> to vector<4x17xf32>
    %371 = vector.shape_cast %370 : vector<4x17xf32> to vector<4x17x1xf32>
    %372 = tpu.reciprocal %371 {approx = true} : vector<4x17x1xf32> -> vector<4x17x1xf32>
    %373 = vector.broadcast %372 : vector<4x17x1xf32> to vector<4x17x17xf32>
    %374 = arith.mulf %369, %373 : vector<4x17x17xf32>
    "tpu.trace_start"() <{level = 10 : i32, message = "hqk,hkd->hqd"}> : () -> ()
    %cst_154 = arith.constant dense<0.000000e+00> : vector<4x17x8xf32>
    %375 = tpu.matmul %374, %363, %cst_154 {dimension_numbers = #tpu.dot_dimension_numbers<[2], [1], [1], [2], [0, 0, 0, 1, 1, 2], [0], [0]>} : vector<4x17x17xf32>, vector<4x17x8xf32>, vector<4x17x8xf32> -> vector<4x17x8xf32>
    "tpu.trace_stop"() : () -> ()
    %376 = vector.extract_strided_slice %375 {offsets = [0, 0, 0], sizes = [1, 17, 8], strides = [1, 1, 1]} : vector<4x17x8xf32> to vector<1x17x8xf32>
    %377 = vector.shape_cast %376 : vector<1x17x8xf32> to vector<17x8xf32>
    %378 = vector.extract_strided_slice %375 {offsets = [1, 0, 0], sizes = [1, 17, 8], strides = [1, 1, 1]} : vector<4x17x8xf32> to vector<1x17x8xf32>
    %379 = vector.shape_cast %378 : vector<1x17x8xf32> to vector<17x8xf32>
    %380 = vector.extract_strided_slice %375 {offsets = [2, 0, 0], sizes = [1, 17, 8], strides = [1, 1, 1]} : vector<4x17x8xf32> to vector<1x17x8xf32>
    %381 = vector.shape_cast %380 : vector<1x17x8xf32> to vector<17x8xf32>
    %382 = vector.extract_strided_slice %375 {offsets = [3, 0, 0], sizes = [1, 17, 8], strides = [1, 1, 1]} : vector<4x17x8xf32> to vector<1x17x8xf32>
    %383 = vector.shape_cast %382 : vector<1x17x8xf32> to vector<17x8xf32>
    %384 = tpu.concatenate %377, %379, %381, %383 in 1 : vector<17x8xf32>, vector<17x8xf32>, vector<17x8xf32>, vector<17x8xf32> -> vector<17x32xf32>
    %c0_155 = arith.constant 0 : index
    %c0_156 = arith.constant 0 : index
    %c0_157 = arith.constant 0 : index
    %385 = vector.load %arg8[%c0_155, %c0_156, %c0_157] : memref<2x32x32xf32, #tpu.memory_space<vmem>>, vector<1x32x32xf32>
    %386 = vector.shape_cast %385 : vector<1x32x32xf32> to vector<32x32xf32>
    %cst_158 = arith.constant dense<0.000000e+00> : vector<17x32xf32>
    %387 = tpu.matmul %384, %386, %cst_158 {dimension_numbers = #tpu.dot_dimension_numbers<[1], [0], [0], [1], [0, 0, 1, 1], [], []>} : vector<17x32xf32>, vector<32x32xf32>, vector<17x32xf32> -> vector<17x32xf32>
    %c0_159 = arith.constant 0 : index
    %c0_160 = arith.constant 0 : index
    %c0_161 = arith.constant 0 : index
    %388 = vector.load %arg9[%c0_159, %c0_160, %c0_161] : memref<2x1x32xf32, #tpu.memory_space<vmem>>, vector<1x1x32xf32>
    %389 = vector.shape_cast %388 : vector<1x1x32xf32> to vector<1x32xf32>
    %390 = vector.broadcast %389 : vector<1x32xf32> to vector<17x32xf32>
    %391 = arith.addf %387, %390 : vector<17x32xf32>
    %392 = arith.addf %303, %391 : vector<17x32xf32>
    %c0_162 = arith.constant 0 : index
    %c0_163 = arith.constant 0 : index
    %c0_164 = arith.constant 0 : index
    %393 = vector.load %arg10[%c0_162, %c0_163, %c0_164] : memref<2x1x32xf32, #tpu.memory_space<vmem>>, vector<1x1x32xf32>
    %394 = vector.shape_cast %393 : vector<1x1x32xf32> to vector<1x32xf32>
    %c0_165 = arith.constant 0 : index
    %c0_166 = arith.constant 0 : index
    %c0_167 = arith.constant 0 : index
    %395 = vector.load %arg11[%c0_165, %c0_166, %c0_167] : memref<2x1x32xf32, #tpu.memory_space<vmem>>, vector<1x1x32xf32>
    %396 = vector.shape_cast %395 : vector<1x1x32xf32> to vector<1x32xf32>
    %cst_168 = arith.constant dense<0.000000e+00> : vector<17xf32>
    %397 = vector.multi_reduction <add>, %392, %cst_168 [1] : vector<17x32xf32> to vector<17xf32>
    %398 = vector.shape_cast %397 : vector<17xf32> to vector<17x1xf32>
    %cst_169 = arith.constant 3.200000e+01 : f32
    %399 = vector.broadcast %cst_169 : f32 to vector<17x1xf32>
    %400 = arith.divf %398, %399 : vector<17x1xf32>
    %401 = arith.mulf %392, %392 : vector<17x32xf32>
    %cst_170 = arith.constant dense<0.000000e+00> : vector<17xf32>
    %402 = vector.multi_reduction <add>, %401, %cst_170 [1] : vector<17x32xf32> to vector<17xf32>
    %403 = vector.shape_cast %402 : vector<17xf32> to vector<17x1xf32>
    %cst_171 = arith.constant 3.200000e+01 : f32
    %404 = vector.broadcast %cst_171 : f32 to vector<17x1xf32>
    %405 = arith.divf %403, %404 : vector<17x1xf32>
    %406 = arith.mulf %400, %400 : vector<17x1xf32>
    %407 = arith.subf %405, %406 : vector<17x1xf32>
    %408 = vector.broadcast %400 : vector<17x1xf32> to vector<17x32xf32>
    %409 = arith.subf %392, %408 : vector<17x32xf32>
    %cst_172 = arith.constant 9.99999997E-7 : f32
    %410 = vector.broadcast %cst_172 : f32 to vector<17x1xf32>
    %411 = arith.addf %407, %410 : vector<17x1xf32>
    %412 = math.rsqrt %411 : vector<17x1xf32>
    %413 = vector.broadcast %412 : vector<17x1xf32> to vector<17x32xf32>
    %414 = arith.mulf %409, %413 : vector<17x32xf32>
    %415 = vector.broadcast %394 : vector<1x32xf32> to vector<17x32xf32>
    %416 = arith.mulf %414, %415 : vector<17x32xf32>
    %417 = vector.broadcast %396 : vector<1x32xf32> to vector<17x32xf32>
    %418 = arith.addf %416, %417 : vector<17x32xf32>
    %c0_173 = arith.constant 0 : index
    %c0_174 = arith.constant 0 : index
    %c0_175 = arith.constant 0 : index
    %419 = vector.load %arg12[%c0_173, %c0_174, %c0_175] : memref<2x32x128xf32, #tpu.memory_space<vmem>>, vector<1x32x128xf32>
    %420 = vector.shape_cast %419 : vector<1x32x128xf32> to vector<32x128xf32>
    %cst_176 = arith.constant dense<0.000000e+00> : vector<17x128xf32>
    %421 = tpu.matmul %418, %420, %cst_176 {dimension_numbers = #tpu.dot_dimension_numbers<[1], [0], [0], [1], [0, 0, 1, 1], [], []>} : vector<17x32xf32>, vector<32x128xf32>, vector<17x128xf32> -> vector<17x128xf32>
    %c0_177 = arith.constant 0 : index
    %c0_178 = arith.constant 0 : index
    %c0_179 = arith.constant 0 : index
    %422 = vector.load %arg13[%c0_177, %c0_178, %c0_179] : memref<2x1x128xf32, #tpu.memory_space<vmem>>, vector<1x1x128xf32>
    %423 = vector.shape_cast %422 : vector<1x1x128xf32> to vector<1x128xf32>
    %424 = vector.broadcast %423 : vector<1x128xf32> to vector<17x128xf32>
    %425 = arith.addf %421, %424 : vector<17x128xf32>
    %cst_180 = arith.constant 5.000000e-01 : f32
    %426 = vector.broadcast %cst_180 : f32 to vector<17x128xf32>
    %427 = arith.mulf %426, %425 : vector<17x128xf32>
    %428 = arith.mulf %425, %425 : vector<17x128xf32>
    %429 = arith.mulf %428, %425 : vector<17x128xf32>
    %cst_181 = arith.constant 4.471500e-02 : f32
    %430 = vector.broadcast %cst_181 : f32 to vector<17x128xf32>
    %431 = arith.mulf %430, %429 : vector<17x128xf32>
    %432 = arith.addf %425, %431 : vector<17x128xf32>
    %cst_182 = arith.constant 0.797884583 : f32
    %433 = vector.broadcast %cst_182 : f32 to vector<17x128xf32>
    %434 = arith.mulf %433, %432 : vector<17x128xf32>
    %435 = math.tanh %434 : vector<17x128xf32>
    %cst_183 = arith.constant 1.000000e+00 : f32
    %436 = vector.broadcast %cst_183 : f32 to vector<17x128xf32>
    %437 = arith.addf %436, %435 : vector<17x128xf32>
    %438 = arith.mulf %427, %437 : vector<17x128xf32>
    %c0_184 = arith.constant 0 : index
    %c0_185 = arith.constant 0 : index
    %c0_186 = arith.constant 0 : index
    %439 = vector.load %arg14[%c0_184, %c0_185, %c0_186] : memref<2x128x32xf32, #tpu.memory_space<vmem>>, vector<1x128x32xf32>
    %440 = vector.shape_cast %439 : vector<1x128x32xf32> to vector<128x32xf32>
    %cst_187 = arith.constant dense<0.000000e+00> : vector<17x32xf32>
    %441 = tpu.matmul %438, %440, %cst_187 {dimension_numbers = #tpu.dot_dimension_numbers<[1], [0], [0], [1], [0, 0, 1, 1], [], []>} : vector<17x128xf32>, vector<128x32xf32>, vector<17x32xf32> -> vector<17x32xf32>
    %c0_188 = arith.constant 0 : index
    %c0_189 = arith.constant 0 : index
    %c0_190 = arith.constant 0 : index
    %442 = vector.load %arg15[%c0_188, %c0_189, %c0_190] : memref<2x1x32xf32, #tpu.memory_space<vmem>>, vector<1x1x32xf32>
    %443 = vector.shape_cast %442 : vector<1x1x32xf32> to vector<1x32xf32>
    %444 = vector.broadcast %443 : vector<1x32xf32> to vector<17x32xf32>
    %445 = arith.addf %441, %444 : vector<17x32xf32>
    %446 = arith.addf %392, %445 : vector<17x32xf32>
    %c1_191 = arith.constant 1 : index
    %c0_192 = arith.constant 0 : index
    %c0_193 = arith.constant 0 : index
    %447 = vector.load %arg4[%c1_191, %c0_192, %c0_193] : memref<2x1x32xf32, #tpu.memory_space<vmem>>, vector<1x1x32xf32>
    %448 = vector.shape_cast %447 : vector<1x1x32xf32> to vector<1x32xf32>
    %c1_194 = arith.constant 1 : index
    %c0_195 = arith.constant 0 : index
    %c0_196 = arith.constant 0 : index
    %449 = vector.load %arg5[%c1_194, %c0_195, %c0_196] : memref<2x1x32xf32, #tpu.memory_space<vmem>>, vector<1x1x32xf32>
    %450 = vector.shape_cast %449 : vector<1x1x32xf32> to vector<1x32xf32>
    %cst_197 = arith.constant dense<0.000000e+00> : vector<17xf32>
    %451 = vector.multi_reduction <add>, %446, %cst_197 [1] : vector<17x32xf32> to vector<17xf32>
    %452 = vector.shape_cast %451 : vector<17xf32> to vector<17x1xf32>
    %cst_198 = arith.constant 3.200000e+01 : f32
    %453 = vector.broadcast %cst_198 : f32 to vector<17x1xf32>
    %454 = arith.divf %452, %453 : vector<17x1xf32>
    %455 = arith.mulf %446, %446 : vector<17x32xf32>
    %cst_199 = arith.constant dense<0.000000e+00> : vector<17xf32>
    %456 = vector.multi_reduction <add>, %455, %cst_199 [1] : vector<17x32xf32> to vector<17xf32>
    %457 = vector.shape_cast %456 : vector<17xf32> to vector<17x1xf32>
    %cst_200 = arith.constant 3.200000e+01 : f32
    %458 = vector.broadcast %cst_200 : f32 to vector<17x1xf32>
    %459 = arith.divf %457, %458 : vector<17x1xf32>
    %460 = arith.mulf %454, %454 : vector<17x1xf32>
    %461 = arith.subf %459, %460 : vector<17x1xf32>
    %462 = vector.broadcast %454 : vector<17x1xf32> to vector<17x32xf32>
    %463 = arith.subf %446, %462 : vector<17x32xf32>
    %cst_201 = arith.constant 9.99999997E-7 : f32
    %464 = vector.broadcast %cst_201 : f32 to vector<17x1xf32>
    %465 = arith.addf %461, %464 : vector<17x1xf32>
    %466 = math.rsqrt %465 : vector<17x1xf32>
    %467 = vector.broadcast %466 : vector<17x1xf32> to vector<17x32xf32>
    %468 = arith.mulf %463, %467 : vector<17x32xf32>
    %469 = vector.broadcast %448 : vector<1x32xf32> to vector<17x32xf32>
    %470 = arith.mulf %468, %469 : vector<17x32xf32>
    %471 = vector.broadcast %450 : vector<1x32xf32> to vector<17x32xf32>
    %472 = arith.addf %470, %471 : vector<17x32xf32>
    %c1_202 = arith.constant 1 : index
    %c0_203 = arith.constant 0 : index
    %c0_204 = arith.constant 0 : index
    %473 = vector.load %arg6[%c1_202, %c0_203, %c0_204] : memref<2x32x96xf32, #tpu.memory_space<vmem>>, vector<1x32x96xf32>
    %474 = vector.shape_cast %473 : vector<1x32x96xf32> to vector<32x96xf32>
    %cst_205 = arith.constant dense<0.000000e+00> : vector<17x96xf32>
    %475 = tpu.matmul %472, %474, %cst_205 {dimension_numbers = #tpu.dot_dimension_numbers<[1], [0], [0], [1], [0, 0, 1, 1], [], []>} : vector<17x32xf32>, vector<32x96xf32>, vector<17x96xf32> -> vector<17x96xf32>
    %c1_206 = arith.constant 1 : index
    %c0_207 = arith.constant 0 : index
    %c0_208 = arith.constant 0 : index
    %476 = vector.load %arg7[%c1_206, %c0_207, %c0_208] : memref<2x1x96xf32, #tpu.memory_space<vmem>>, vector<1x1x96xf32>
    %477 = vector.shape_cast %476 : vector<1x1x96xf32> to vector<1x96xf32>
    %478 = vector.broadcast %477 : vector<1x96xf32> to vector<17x96xf32>
    %479 = arith.addf %475, %478 : vector<17x96xf32>
    %480 = vector.extract_strided_slice %479 {offsets = [0, 0], sizes = [17, 8], strides = [1, 1]} : vector<17x96xf32> to vector<17x8xf32>
    %481 = vector.shape_cast %480 : vector<17x8xf32> to vector<1x17x8xf32>
    %482 = vector.extract_strided_slice %479 {offsets = [0, 8], sizes = [17, 8], strides = [1, 1]} : vector<17x96xf32> to vector<17x8xf32>
    %483 = vector.shape_cast %482 : vector<17x8xf32> to vector<1x17x8xf32>
    %484 = vector.extract_strided_slice %479 {offsets = [0, 16], sizes = [17, 8], strides = [1, 1]} : vector<17x96xf32> to vector<17x8xf32>
    %485 = vector.shape_cast %484 : vector<17x8xf32> to vector<1x17x8xf32>
    %486 = vector.extract_strided_slice %479 {offsets = [0, 24], sizes = [17, 8], strides = [1, 1]} : vector<17x96xf32> to vector<17x8xf32>
    %487 = vector.shape_cast %486 : vector<17x8xf32> to vector<1x17x8xf32>
    %488 = tpu.concatenate %481, %483, %485, %487 in 0 : vector<1x17x8xf32>, vector<1x17x8xf32>, vector<1x17x8xf32>, vector<1x17x8xf32> -> vector<4x17x8xf32>
    %489 = vector.extract_strided_slice %479 {offsets = [0, 32], sizes = [17, 8], strides = [1, 1]} : vector<17x96xf32> to vector<17x8xf32>
    %490 = vector.shape_cast %489 : vector<17x8xf32> to vector<1x17x8xf32>
    %491 = vector.extract_strided_slice %479 {offsets = [0, 40], sizes = [17, 8], strides = [1, 1]} : vector<17x96xf32> to vector<17x8xf32>
    %492 = vector.shape_cast %491 : vector<17x8xf32> to vector<1x17x8xf32>
    %493 = vector.extract_strided_slice %479 {offsets = [0, 48], sizes = [17, 8], strides = [1, 1]} : vector<17x96xf32> to vector<17x8xf32>
    %494 = vector.shape_cast %493 : vector<17x8xf32> to vector<1x17x8xf32>
    %495 = vector.extract_strided_slice %479 {offsets = [0, 56], sizes = [17, 8], strides = [1, 1]} : vector<17x96xf32> to vector<17x8xf32>
    %496 = vector.shape_cast %495 : vector<17x8xf32> to vector<1x17x8xf32>
    %497 = tpu.concatenate %490, %492, %494, %496 in 0 : vector<1x17x8xf32>, vector<1x17x8xf32>, vector<1x17x8xf32>, vector<1x17x8xf32> -> vector<4x17x8xf32>
    %498 = vector.extract_strided_slice %479 {offsets = [0, 64], sizes = [17, 8], strides = [1, 1]} : vector<17x96xf32> to vector<17x8xf32>
    %499 = vector.shape_cast %498 : vector<17x8xf32> to vector<1x17x8xf32>
    %500 = vector.extract_strided_slice %479 {offsets = [0, 72], sizes = [17, 8], strides = [1, 1]} : vector<17x96xf32> to vector<17x8xf32>
    %501 = vector.shape_cast %500 : vector<17x8xf32> to vector<1x17x8xf32>
    %502 = vector.extract_strided_slice %479 {offsets = [0, 80], sizes = [17, 8], strides = [1, 1]} : vector<17x96xf32> to vector<17x8xf32>
    %503 = vector.shape_cast %502 : vector<17x8xf32> to vector<1x17x8xf32>
    %504 = vector.extract_strided_slice %479 {offsets = [0, 88], sizes = [17, 8], strides = [1, 1]} : vector<17x96xf32> to vector<17x8xf32>
    %505 = vector.shape_cast %504 : vector<17x8xf32> to vector<1x17x8xf32>
    %506 = tpu.concatenate %499, %501, %503, %505 in 0 : vector<1x17x8xf32>, vector<1x17x8xf32>, vector<1x17x8xf32>, vector<1x17x8xf32> -> vector<4x17x8xf32>
    "tpu.trace_start"() <{level = 10 : i32, message = "hqd,hkd->hqk"}> : () -> ()
    %cst_209 = arith.constant dense<0.000000e+00> : vector<4x17x17xf32>
    %507 = tpu.matmul %488, %497, %cst_209 {dimension_numbers = #tpu.dot_dimension_numbers<[2], [2], [1], [1], [0, 0, 0, 1, 1, 1], [0], [0]>} : vector<4x17x8xf32>, vector<4x17x8xf32>, vector<4x17x17xf32> -> vector<4x17x17xf32>
    "tpu.trace_stop"() : () -> ()
    %cst_210 = arith.constant dense<0xFF800000> : vector<4x17xf32>
    %508 = vector.multi_reduction <maximumf>, %507, %cst_210 [2] : vector<4x17x17xf32> to vector<4x17xf32>
    %509 = vector.shape_cast %508 : vector<4x17xf32> to vector<4x17x1xf32>
    %510 = vector.broadcast %509 : vector<4x17x1xf32> to vector<4x17x17xf32>
    %511 = arith.subf %507, %510 : vector<4x17x17xf32>
    %512 = math.exp %511 : vector<4x17x17xf32>
    %cst_211 = arith.constant dense<0.000000e+00> : vector<4x17xf32>
    %513 = vector.multi_reduction <add>, %512, %cst_211 [2] : vector<4x17x17xf32> to vector<4x17xf32>
    %514 = vector.shape_cast %513 : vector<4x17xf32> to vector<4x17x1xf32>
    %515 = tpu.reciprocal %514 {approx = true} : vector<4x17x1xf32> -> vector<4x17x1xf32>
    %516 = vector.broadcast %515 : vector<4x17x1xf32> to vector<4x17x17xf32>
    %517 = arith.mulf %512, %516 : vector<4x17x17xf32>
    "tpu.trace_start"() <{level = 10 : i32, message = "hqk,hkd->hqd"}> : () -> ()
    %cst_212 = arith.constant dense<0.000000e+00> : vector<4x17x8xf32>
    %518 = tpu.matmul %517, %506, %cst_212 {dimension_numbers = #tpu.dot_dimension_numbers<[2], [1], [1], [2], [0, 0, 0, 1, 1, 2], [0], [0]>} : vector<4x17x17xf32>, vector<4x17x8xf32>, vector<4x17x8xf32> -> vector<4x17x8xf32>
    "tpu.trace_stop"() : () -> ()
    %519 = vector.extract_strided_slice %518 {offsets = [0, 0, 0], sizes = [1, 17, 8], strides = [1, 1, 1]} : vector<4x17x8xf32> to vector<1x17x8xf32>
    %520 = vector.shape_cast %519 : vector<1x17x8xf32> to vector<17x8xf32>
    %521 = vector.extract_strided_slice %518 {offsets = [1, 0, 0], sizes = [1, 17, 8], strides = [1, 1, 1]} : vector<4x17x8xf32> to vector<1x17x8xf32>
    %522 = vector.shape_cast %521 : vector<1x17x8xf32> to vector<17x8xf32>
    %523 = vector.extract_strided_slice %518 {offsets = [2, 0, 0], sizes = [1, 17, 8], strides = [1, 1, 1]} : vector<4x17x8xf32> to vector<1x17x8xf32>
    %524 = vector.shape_cast %523 : vector<1x17x8xf32> to vector<17x8xf32>
    %525 = vector.extract_strided_slice %518 {offsets = [3, 0, 0], sizes = [1, 17, 8], strides = [1, 1, 1]} : vector<4x17x8xf32> to vector<1x17x8xf32>
    %526 = vector.shape_cast %525 : vector<1x17x8xf32> to vector<17x8xf32>
    %527 = tpu.concatenate %520, %522, %524, %526 in 1 : vector<17x8xf32>, vector<17x8xf32>, vector<17x8xf32>, vector<17x8xf32> -> vector<17x32xf32>
    %c1_213 = arith.constant 1 : index
    %c0_214 = arith.constant 0 : index
    %c0_215 = arith.constant 0 : index
    %528 = vector.load %arg8[%c1_213, %c0_214, %c0_215] : memref<2x32x32xf32, #tpu.memory_space<vmem>>, vector<1x32x32xf32>
    %529 = vector.shape_cast %528 : vector<1x32x32xf32> to vector<32x32xf32>
    %cst_216 = arith.constant dense<0.000000e+00> : vector<17x32xf32>
    %530 = tpu.matmul %527, %529, %cst_216 {dimension_numbers = #tpu.dot_dimension_numbers<[1], [0], [0], [1], [0, 0, 1, 1], [], []>} : vector<17x32xf32>, vector<32x32xf32>, vector<17x32xf32> -> vector<17x32xf32>
    %c1_217 = arith.constant 1 : index
    %c0_218 = arith.constant 0 : index
    %c0_219 = arith.constant 0 : index
    %531 = vector.load %arg9[%c1_217, %c0_218, %c0_219] : memref<2x1x32xf32, #tpu.memory_space<vmem>>, vector<1x1x32xf32>
    %532 = vector.shape_cast %531 : vector<1x1x32xf32> to vector<1x32xf32>
    %533 = vector.broadcast %532 : vector<1x32xf32> to vector<17x32xf32>
    %534 = arith.addf %530, %533 : vector<17x32xf32>
    %535 = arith.addf %446, %534 : vector<17x32xf32>
    %c1_220 = arith.constant 1 : index
    %c0_221 = arith.constant 0 : index
    %c0_222 = arith.constant 0 : index
    %536 = vector.load %arg10[%c1_220, %c0_221, %c0_222] : memref<2x1x32xf32, #tpu.memory_space<vmem>>, vector<1x1x32xf32>
    %537 = vector.shape_cast %536 : vector<1x1x32xf32> to vector<1x32xf32>
    %c1_223 = arith.constant 1 : index
    %c0_224 = arith.constant 0 : index
    %c0_225 = arith.constant 0 : index
    %538 = vector.load %arg11[%c1_223, %c0_224, %c0_225] : memref<2x1x32xf32, #tpu.memory_space<vmem>>, vector<1x1x32xf32>
    %539 = vector.shape_cast %538 : vector<1x1x32xf32> to vector<1x32xf32>
    %cst_226 = arith.constant dense<0.000000e+00> : vector<17xf32>
    %540 = vector.multi_reduction <add>, %535, %cst_226 [1] : vector<17x32xf32> to vector<17xf32>
    %541 = vector.shape_cast %540 : vector<17xf32> to vector<17x1xf32>
    %cst_227 = arith.constant 3.200000e+01 : f32
    %542 = vector.broadcast %cst_227 : f32 to vector<17x1xf32>
    %543 = arith.divf %541, %542 : vector<17x1xf32>
    %544 = arith.mulf %535, %535 : vector<17x32xf32>
    %cst_228 = arith.constant dense<0.000000e+00> : vector<17xf32>
    %545 = vector.multi_reduction <add>, %544, %cst_228 [1] : vector<17x32xf32> to vector<17xf32>
    %546 = vector.shape_cast %545 : vector<17xf32> to vector<17x1xf32>
    %cst_229 = arith.constant 3.200000e+01 : f32
    %547 = vector.broadcast %cst_229 : f32 to vector<17x1xf32>
    %548 = arith.divf %546, %547 : vector<17x1xf32>
    %549 = arith.mulf %543, %543 : vector<17x1xf32>
    %550 = arith.subf %548, %549 : vector<17x1xf32>
    %551 = vector.broadcast %543 : vector<17x1xf32> to vector<17x32xf32>
    %552 = arith.subf %535, %551 : vector<17x32xf32>
    %cst_230 = arith.constant 9.99999997E-7 : f32
    %553 = vector.broadcast %cst_230 : f32 to vector<17x1xf32>
    %554 = arith.addf %550, %553 : vector<17x1xf32>
    %555 = math.rsqrt %554 : vector<17x1xf32>
    %556 = vector.broadcast %555 : vector<17x1xf32> to vector<17x32xf32>
    %557 = arith.mulf %552, %556 : vector<17x32xf32>
    %558 = vector.broadcast %537 : vector<1x32xf32> to vector<17x32xf32>
    %559 = arith.mulf %557, %558 : vector<17x32xf32>
    %560 = vector.broadcast %539 : vector<1x32xf32> to vector<17x32xf32>
    %561 = arith.addf %559, %560 : vector<17x32xf32>
    %c1_231 = arith.constant 1 : index
    %c0_232 = arith.constant 0 : index
    %c0_233 = arith.constant 0 : index
    %562 = vector.load %arg12[%c1_231, %c0_232, %c0_233] : memref<2x32x128xf32, #tpu.memory_space<vmem>>, vector<1x32x128xf32>
    %563 = vector.shape_cast %562 : vector<1x32x128xf32> to vector<32x128xf32>
    %cst_234 = arith.constant dense<0.000000e+00> : vector<17x128xf32>
    %564 = tpu.matmul %561, %563, %cst_234 {dimension_numbers = #tpu.dot_dimension_numbers<[1], [0], [0], [1], [0, 0, 1, 1], [], []>} : vector<17x32xf32>, vector<32x128xf32>, vector<17x128xf32> -> vector<17x128xf32>
    %c1_235 = arith.constant 1 : index
    %c0_236 = arith.constant 0 : index
    %c0_237 = arith.constant 0 : index
    %565 = vector.load %arg13[%c1_235, %c0_236, %c0_237] : memref<2x1x128xf32, #tpu.memory_space<vmem>>, vector<1x1x128xf32>
    %566 = vector.shape_cast %565 : vector<1x1x128xf32> to vector<1x128xf32>
    %567 = vector.broadcast %566 : vector<1x128xf32> to vector<17x128xf32>
    %568 = arith.addf %564, %567 : vector<17x128xf32>
    %cst_238 = arith.constant 5.000000e-01 : f32
    %569 = vector.broadcast %cst_238 : f32 to vector<17x128xf32>
    %570 = arith.mulf %569, %568 : vector<17x128xf32>
    %571 = arith.mulf %568, %568 : vector<17x128xf32>
    %572 = arith.mulf %571, %568 : vector<17x128xf32>
    %cst_239 = arith.constant 4.471500e-02 : f32
    %573 = vector.broadcast %cst_239 : f32 to vector<17x128xf32>
    %574 = arith.mulf %573, %572 : vector<17x128xf32>
    %575 = arith.addf %568, %574 : vector<17x128xf32>
    %cst_240 = arith.constant 0.797884583 : f32
    %576 = vector.broadcast %cst_240 : f32 to vector<17x128xf32>
    %577 = arith.mulf %576, %575 : vector<17x128xf32>
    %578 = math.tanh %577 : vector<17x128xf32>
    %cst_241 = arith.constant 1.000000e+00 : f32
    %579 = vector.broadcast %cst_241 : f32 to vector<17x128xf32>
    %580 = arith.addf %579, %578 : vector<17x128xf32>
    %581 = arith.mulf %570, %580 : vector<17x128xf32>
    %c1_242 = arith.constant 1 : index
    %c0_243 = arith.constant 0 : index
    %c0_244 = arith.constant 0 : index
    %582 = vector.load %arg14[%c1_242, %c0_243, %c0_244] : memref<2x128x32xf32, #tpu.memory_space<vmem>>, vector<1x128x32xf32>
    %583 = vector.shape_cast %582 : vector<1x128x32xf32> to vector<128x32xf32>
    %cst_245 = arith.constant dense<0.000000e+00> : vector<17x32xf32>
    %584 = tpu.matmul %581, %583, %cst_245 {dimension_numbers = #tpu.dot_dimension_numbers<[1], [0], [0], [1], [0, 0, 1, 1], [], []>} : vector<17x128xf32>, vector<128x32xf32>, vector<17x32xf32> -> vector<17x32xf32>
    %c1_246 = arith.constant 1 : index
    %c0_247 = arith.constant 0 : index
    %c0_248 = arith.constant 0 : index
    %585 = vector.load %arg15[%c1_246, %c0_247, %c0_248] : memref<2x1x32xf32, #tpu.memory_space<vmem>>, vector<1x1x32xf32>
    %586 = vector.shape_cast %585 : vector<1x1x32xf32> to vector<1x32xf32>
    %587 = vector.broadcast %586 : vector<1x32xf32> to vector<17x32xf32>
    %588 = arith.addf %584, %587 : vector<17x32xf32>
    %589 = arith.addf %535, %588 : vector<17x32xf32>
    %590 = vector.extract_strided_slice %589 {offsets = [0, 0], sizes = [1, 32], strides = [1, 1]} : vector<17x32xf32> to vector<1x32xf32>
    %cst_249 = arith.constant dense<0.000000e+00> : vector<1x128xf32>
    %591 = tpu.matmul %590, %2, %cst_249 {dimension_numbers = #tpu.dot_dimension_numbers<[1], [0], [0], [1], [0, 0, 1, 1], [], []>} : vector<1x32xf32>, vector<32x128xf32>, vector<1x128xf32> -> vector<1x128xf32>
    %592 = arith.addf %591, %3 : vector<1x128xf32>
    %c1_250 = arith.constant 1 : index
    %c0_251 = arith.constant 0 : index
    %c0_252 = arith.constant 0 : index
    %593 = vector.load %arg18[%c1_250, %c0_251, %c0_252] : memref<2x1x128xf32, #tpu.memory_space<vmem>>, vector<1x1x128xf32>
    %594 = vector.shape_cast %593 : vector<1x1x128xf32> to vector<1x128xf32>
    %595 = vector.shape_cast %592 : vector<1x128xf32> to vector<1x1x128xf32>
    tpu.vector_store %arg18[%c1_250, %c0_251, %c0_252], %595 {strides = array<i32>} : memref<2x1x128xf32, #tpu.memory_space<vmem>>, vector<1x1x128xf32>,
    return
  }
  func.func @transform_0(%arg0: i32) -> (i32, i32, i32) {
    %c0_i32 = arith.constant 0 : i32
    %c0_i32_0 = arith.constant 0 : i32
    %c0_i32_1 = arith.constant 0 : i32
    return %arg0, %c0_i32, %c0_i32_0 : i32, i32, i32
  }
  func.func @transform_1(%arg0: i32) -> (i32, i32) {
    %c0_i32 = arith.constant 0 : i32
    %c0_i32_0 = arith.constant 0 : i32
    %c0_i32_1 = arith.constant 0 : i32
    return %c0_i32, %c0_i32_0 : i32, i32
  }
  func.func @transform_2(%arg0: i32) -> (i32, i32) {
    %c0_i32 = arith.constant 0 : i32
    %c0_i32_0 = arith.constant 0 : i32
    %c0_i32_1 = arith.constant 0 : i32
    return %c0_i32, %c0_i32_0 : i32, i32
  }
  func.func @transform_3(%arg0: i32) -> (i32, i32, i32) {
    %c0_i32 = arith.constant 0 : i32
    %c0_i32_0 = arith.constant 0 : i32
    %c0_i32_1 = arith.constant 0 : i32
    %c0_i32_2 = arith.constant 0 : i32
    return %c0_i32, %c0_i32_0, %c0_i32_1 : i32, i32, i32
  }
  func.func @transform_4(%arg0: i32) -> (i32, i32, i32) {
    %c0_i32 = arith.constant 0 : i32
    %c0_i32_0 = arith.constant 0 : i32
    %c0_i32_1 = arith.constant 0 : i32
    %c0_i32_2 = arith.constant 0 : i32
    return %c0_i32, %c0_i32_0, %c0_i32_1 : i32, i32, i32
  }
  func.func @transform_5(%arg0: i32) -> (i32, i32, i32) {
    %c0_i32 = arith.constant 0 : i32
    %c0_i32_0 = arith.constant 0 : i32
    %c0_i32_1 = arith.constant 0 : i32
    %c0_i32_2 = arith.constant 0 : i32
    return %c0_i32, %c0_i32_0, %c0_i32_1 : i32, i32, i32
  }
  func.func @transform_6(%arg0: i32) -> (i32, i32, i32) {
    %c0_i32 = arith.constant 0 : i32
    %c0_i32_0 = arith.constant 0 : i32
    %c0_i32_1 = arith.constant 0 : i32
    %c0_i32_2 = arith.constant 0 : i32
    return %c0_i32, %c0_i32_0, %c0_i32_1 : i32, i32, i32
  }
  func.func @transform_7(%arg0: i32) -> (i32, i32, i32) {
    %c0_i32 = arith.constant 0 : i32
    %c0_i32_0 = arith.constant 0 : i32
    %c0_i32_1 = arith.constant 0 : i32
    %c0_i32_2 = arith.constant 0 : i32
    return %c0_i32, %c0_i32_0, %c0_i32_1 : i32, i32, i32
  }
  func.func @transform_8(%arg0: i32) -> (i32, i32, i32) {
    %c0_i32 = arith.constant 0 : i32
    %c0_i32_0 = arith.constant 0 : i32
    %c0_i32_1 = arith.constant 0 : i32
    %c0_i32_2 = arith.constant 0 : i32
    return %c0_i32, %c0_i32_0, %c0_i32_1 : i32, i32, i32
  }
  func.func @transform_9(%arg0: i32) -> (i32, i32, i32) {
    %c0_i32 = arith.constant 0 : i32
    %c0_i32_0 = arith.constant 0 : i32
    %c0_i32_1 = arith.constant 0 : i32
    %c0_i32_2 = arith.constant 0 : i32
    return %c0_i32, %c0_i32_0, %c0_i32_1 : i32, i32, i32
  }
  func.func @transform_10(%arg0: i32) -> (i32, i32, i32) {
    %c0_i32 = arith.constant 0 : i32
    %c0_i32_0 = arith.constant 0 : i32
    %c0_i32_1 = arith.constant 0 : i32
    %c0_i32_2 = arith.constant 0 : i32
    return %c0_i32, %c0_i32_0, %c0_i32_1 : i32, i32, i32
  }
  func.func @transform_11(%arg0: i32) -> (i32, i32, i32) {
    %c0_i32 = arith.constant 0 : i32
    %c0_i32_0 = arith.constant 0 : i32
    %c0_i32_1 = arith.constant 0 : i32
    %c0_i32_2 = arith.constant 0 : i32
    return %c0_i32, %c0_i32_0, %c0_i32_1 : i32, i32, i32
  }
  func.func @transform_12(%arg0: i32) -> (i32, i32, i32) {
    %c0_i32 = arith.constant 0 : i32
    %c0_i32_0 = arith.constant 0 : i32
    %c0_i32_1 = arith.constant 0 : i32
    %c0_i32_2 = arith.constant 0 : i32
    return %c0_i32, %c0_i32_0, %c0_i32_1 : i32, i32, i32
  }
  func.func @transform_13(%arg0: i32) -> (i32, i32, i32) {
    %c0_i32 = arith.constant 0 : i32
    %c0_i32_0 = arith.constant 0 : i32
    %c0_i32_1 = arith.constant 0 : i32
    %c0_i32_2 = arith.constant 0 : i32
    return %c0_i32, %c0_i32_0, %c0_i32_1 : i32, i32, i32
  }
  func.func @transform_14(%arg0: i32) -> (i32, i32, i32) {
    %c0_i32 = arith.constant 0 : i32
    %c0_i32_0 = arith.constant 0 : i32
    %c0_i32_1 = arith.constant 0 : i32
    %c0_i32_2 = arith.constant 0 : i32
    return %c0_i32, %c0_i32_0, %c0_i32_1 : i32, i32, i32
  }
  func.func @transform_15(%arg0: i32) -> (i32, i32) {
    %c0_i32 = arith.constant 0 : i32
    %c0_i32_0 = arith.constant 0 : i32
    %c0_i32_1 = arith.constant 0 : i32
    return %c0_i32, %c0_i32_0 : i32, i32
  }
  func.func @transform_16(%arg0: i32) -> (i32, i32) {
    %c0_i32 = arith.constant 0 : i32
    %c0_i32_0 = arith.constant 0 : i32
    %c0_i32_1 = arith.constant 0 : i32
    return %c0_i32, %c0_i32_0 : i32, i32
  }
  func.func @transform_17(%arg0: i32) -> (i32, i32, i32) {
    %c0_i32 = arith.constant 0 : i32
    %c0_i32_0 = arith.constant 0 : i32
    %c0_i32_1 = arith.constant 0 : i32
    return %arg0, %c0_i32, %c0_i32_0 : i32, i32, i32
  }
}

</mosaic_0001>

<bundles_post_ra>
// kernel: vit_forward.1
= control target key start
LH: loop header
LB: loop body
LE: loop exit
PB: predicated region body
PF: predicated region fallthrough
CT: control target
= control target key end

     0   :  { %s10997_s0 = inlined_call_operand.vmem [shape: f32[2,17,48], index: 0, kind: input, shape index: {}]   ;;  %s10998_s1 = inlined_call_operand.vmem [shape: f32[48,32], index: 1, kind: input, shape index: {}]   ;;  %s10999_s2 = inlined_call_operand.vmem [shape: f32[17,32], index: 2, kind: input, shape index: {}]   ;;  %s11000_s3 = inlined_call_operand.vmem [shape: f32[2,1,32], index: 3, kind: input, shape index: {}]   ;;  %s11001_s4 = inlined_call_operand.vmem [shape: f32[2,1,32], index: 4, kind: input, shape index: {}]   ;;  %s11002_s5 = inlined_call_operand.vmem [shape: f32[2,32,96], index: 5, kind: input, shape index: {}]   ;;  %s11003_s6 = inlined_call_operand.vmem [shape: f32[2,1,96], index: 6, kind: input, shape index: {}]   ;;  %s11004_s7 = inlined_call_operand.vmem [shape: f32[2,32,32], index: 7, kind: input, shape index: {}]   ;;  %s11005_s8 = inlined_call_operand.vmem [shape: f32[2,1,32], index: 8, kind: input, shape index: {}]   ;;  %s11006_s9 = inlined_call_operand.vmem [shape: f32[2,1,32], index: 9, kind: input, shape index: {}]   ;;  %s11007_s10 = inlined_call_operand.vmem [shape: f32[2,1,32], index: 10, kind: input, shape index: {}]   ;;  %s11008_s11 = inlined_call_operand.vmem [shape: f32[2,32,128], index: 11, kind: input, shape index: {}]   ;;  %s11009_s12 = inlined_call_operand.vmem [shape: f32[2,1,128], index: 12, kind: input, shape index: {}]   ;;  %s11010_s13 = inlined_call_operand.vmem [shape: f32[2,128,32], index: 13, kind: input, shape index: {}]   ;;  %s11011_s14 = inlined_call_operand.vmem [shape: f32[2,1,32], index: 14, kind: input, shape index: {}]   ;;  %s11012_s15 = inlined_call_operand.vmem [shape: f32[32,128], index: 15, kind: input, shape index: {}]   ;;  %s11013_s16 = inlined_call_operand.vmem [shape: f32[1,128], index: 16, kind: input, shape index: {}]   ;;  %s11014_s17 = inlined_call_operand.hbm [shape: f32[2,1,128], index: 17, kind: output, shape index: {}]  }
   0x1   :  { %11029 = sst [smem:[#allocation5_spill]] %s10997_s0 }
   0x2   :  { %11030 = sst [smem:[#allocation6_spill]] %s10998_s1 }
   0x3   :  { %s11031_s26 = sld [smem:[#allocation6_spill]]  ;;  %v8558_v1 = vmov 0.0   ;;  %vm8559_vm0 = vmmov 0  }
   0x4   :  { %7334 = vmatprep.subr.mxu0 %v8558_v1  ;;  %7346 = vmatprep.mubr.msk.f32.mxu0 %vm8559_vm0, %v8558_v1 }
   0x5   :  { %7355 = vmatprep.subr.mxu1 %v8558_v1  ;;  %7363 = vmatprep.mubr.msk.f32.mxu1 %vm8559_vm0, %v8558_v1 }
   0x9   :  { %v62_v0 = vld [vmem:[%s11031_s26 + $0x28] sm:$0xff]  ;;  %v61_v2 = vld [vmem:[%s11031_s26 + $0x20] sm:$0xff]  ;;  %v60_v3 = vld [vmem:[%s11031_s26 + $0x18] sm:$0xff] }
   0xa   :  { %7335 = vmatpush3.msra.mxu0 %v62_v0 }
   0xb   :  { %7336 = vmatprep.subr.mxu0 %v8558_v1 }
   0xc   :  { %22 = vsyncpa [#allocation3], 0  ;;  %7337 = vmatpush3.msra.mxu0 %v61_v2  ;;  %v59_v4 = vld [vmem:[%s11031_s26 + $0x10] sm:$0xff]  ;;  %v58_v5 = vld [vmem:[%s11031_s26 + $0x8] sm:$0xff]  ;;  %s11032_s24 = sld [smem:[#allocation5_spill]]  ;;  %vm74_vm1 = vcmask 392192  }
   0xd   :  { %7338 = vmatprep.subr.mxu0 %v8558_v1  ;;  %v57_v6 = vld [vmem:[%s11031_s26] sm:$0xff]  ;;  %vm166_vm2 = vcmask 261120   ;;  %v64_v14 = vld [vmem:[%s10999_s2 + $0x8] sm:$0xff]  ;;  %v65_v20 = vld [vmem:[%s10999_s2 + $0x10] sm:$0x1]  ;;  %vm173_vm3 = vcmask 253952  }
   0xe   :  { %7339 = vmatpush3.msra.mxu0 %v60_v3  ;;  %v63_v10 = vld [vmem:[%s10999_s2] sm:$0xff]  ;;  %v235_v31 = vld [vmem:[%s11002_s5 + $0x18] sm:$0xff]  ;;  %v234_v32 = vld [vmem:[%s11002_s5 + $0x10] sm:$0xff]  ;;  %s8560_s22 = smov 120   ;;  %s8561_s23 = smov 112   ;;  %vm359_vm4 = vcmask 64512  }
   0xf   :  { %7340 = vmatprep.subr.mxu0 %v8558_v1  ;;  %7356 = vmatpush3.msra.mxu1 %v235_v31  ;;  %v233_v33 = vld [vmem:[%s11002_s5 + $0x8] sm:$0xff]  ;;  %v232_v34 = vld [vmem:[%s11002_s5] sm:$0xff]  ;;  %s11027_s25 = smov 104   ;;  %s11025_s27 = smov 96   ;;  %vm897_vm5 = vcmask 1040384   ;;  %vm746_vm6 = vcmask 138240  }
  0x10   :  { %7341 = vmatpush3.msra.mxu0 %v59_v4  ;;  %7357 = vmatprep.subr.mxu1 %v8558_v1  ;;  %v6646_v58 = vld [vmem:[%s11000_s3] ss:$0 sm:$0xff]  ;;  %s11023_s28 = smov 64   ;;  %vm753_vm7 = vcmask 131072   ;;  %s11021_s29 = smov 8   ;;  %vm1316_vm8 = vcmask 130048  }
  0x11   :  { %7342 = vmatprep.subr.mxu0 %v8558_v1  ;;  %7358 = vmatpush3.msra.mxu1 %v234_v32  ;;  %v6647_v60 = vld [vmem:[%s11001_s4] ss:$0 sm:$0xff]  ;;  %s11019_s21 = smov 16   ;;  %s11017_s18 = smov 24   ;;  %vm1320_vm9 = vcmask 195584  }
  0x12   :  { %7343 = vmatpush3.msra.mxu0 %v58_v5  ;;  %v71_v7 = vld [vmem:[%s11032_s24] sm:$0xff]  ;;  %v72_v8 = vld [vmem:[%s11032_s24 + $0x8] sm:$0xff]  ;;  %v73_v9 = vld [vmem:[%s11032_s24 + $0x10] sm:$0x1]  ;;  %7359 = vmatprep.subr.mxu1 %v8558_v1  ;;  %s11033_s19 = smov 8   ;;  %s11034_s1 = smov 16  }
  0x13   :  { %7344 = vmatprep.subr.mxu0 %v8558_v1  ;;  %7360 = vmatpush3.msra.mxu1 %v233_v33 }
  0x14   :  { %7345 = vmatpush3.msra.mxu0 %v57_v6  ;;  %7361 = vmatprep.subr.mxu1 %v8558_v1 }
  0x15   :  { %7347 = vmatmul.mubr.msk.f32.vlgmr.msra.gmra.mxu0 %vm74_vm1, %v71_v7  ;;  %7417 = vmatprep.subr.mxu0 %v8558_v1 }
  0x16   :  { %7349 = vmatprep.mubr.msk.f32.mxu0 %vm8559_vm0, %v8558_v1  ;;  %7362 = vmatpush3.msra.mxu1 %v232_v34 }
  0x17   :  { %7372 = vmatprep.subr.mxu1 %v8558_v1 }
  0x19   :  { %7350 = vmatmul.mubr.msk.f32.gmra.mxu0 %vm74_vm1, %v72_v8 }
  0x1a   :  { %7352 = vmatprep.mubr.msk.f32.mxu0 %vm8559_vm0, %v8558_v1 }
  0x1d   :  { %7353 = vmatmul.mubr.msk.f32.gmra.mxu0 %vm74_vm1, %v73_v9 }
  0x1e   :  { %7423 = vmatprep.mubr.msk.f32.mxu0 %vm8559_vm0, %v8558_v1 }
  0xd5   :  { %v150_v11 = vpop.f32.mrf.mxu0 }
  0xd6   :  { %v8711_v12 = vadd.f32 %v150_v11, %v63_v10 }
  0xd7   :  { %v7348_v13 = vpop.f32.mrf.mxu0 }
  0xd8   :  { %v167_v15 = vsel %vm166_vm2, %v8711_v12, 0.0  ;;  %v181_v16 = vmul.f32 %v8711_v12, %v8711_v12  ;;  %v6648_v13 = vld [vmem:[%s11003_s6] ss:$0 sm:$0xff] }
  0xd9   :  { %168 = vadd.xlane.f32.xlu0 %v167_v15  ;;  %v155_v17 = vpop.f32.mrf.mxu0 }
  0xda   :  { %v8720_v18 = vadd.f32 %v155_v17, %v64_v14  ;;  %v184_v21 = vsel %vm166_vm2, %v181_v16, 0.0 }
  0xdb   :  { %v7351_v19 = vpop.f32.mrf.mxu0 }
  0xdc   :  { %v170_v22 = vsel %vm166_vm2, %v8720_v18, 0.0  ;;  %v182_v23 = vmul.f32 %v8720_v18, %v8720_v18 }
  0xdd   :  { %185 = vadd.xlane.f32.xlu0 %v184_v21  ;;  %171 = vadd.xlane.f32.xlu1 %v170_v22  ;;  %v160_v24 = vpop.f32.mrf.mxu0 }
  0xde   :  { %v8730_v25 = vadd.f32 %v160_v24, %v65_v20  ;;  %v187_v27 = vsel %vm166_vm2, %v182_v23, 0.0 }
  0xdf   :  { %v7354_v26 = vpop.f32.mrf.mxu0 }
  0xe0   :  { %v174_v28 = vsel %vm173_vm3, %v8730_v25, 0.0  ;;  %v183_v29 = vmul.f32 %v8730_v25, %v8730_v25 }
  0xe1   :  { %188 = vadd.xlane.f32.xlu1 %v187_v27  ;;  %175 = vadd.xlane.f32.xlu0 %v174_v28 }
  0xe2   :  { %v190_v30 = vsel %vm173_vm3, %v183_v29, 0.0 }
  0xe5   :  { %191 = vadd.xlane.f32.xlu1 %v190_v30 }
 0x162   :  { %v169_v35 = vpop.xlane.xlu0 %168 }
 0x163   :  { %v178_v36 = vmul.f32 0.03125, %v169_v35 }
 0x165   :  { %v196_v39 = vmul.f32 %v178_v36, %v178_v36  ;;  %v202_v56 = vsub.f32 %v8711_v12, %v178_v36 }
 0x166   :  { %v186_v37 = vpop.xlane.xlu0 %185  ;;  %v172_v38 = vpop.xlane.xlu1 %171 }
 0x167   :  { %v193_v40 = vmul.f32 0.03125, %v186_v37  ;;  %v179_v41 = vmul.f32 0.03125, %v172_v38 }
 0x169   :  { %v199_v42 = vsub.f32 %v193_v40, %v196_v39  ;;  %v197_v46 = vmul.f32 %v179_v41, %v179_v41  ;;  %v203_v61 = vsub.f32 %v8720_v18, %v179_v41 }
 0x16a   :  { %v189_v43 = vpop.xlane.xlu1 %188  ;;  %v176_v44 = vpop.xlane.xlu0 %175 }
 0x16b   :  { %v205_v45 = vadd.f32 1e-06, %v199_v42  ;;  %v194_v47 = vmul.f32 0.03125, %v189_v43  ;;  %v180_v48 = vmul.f32 0.03125, %v176_v44 }
 0x16d   :  { %8258 = vrsqrt.f32 %v205_v45  ;;  %v200_v49 = vsub.f32 %v194_v47, %v197_v46  ;;  %v198_v50 = vmul.f32 %v180_v48, %v180_v48  ;;  %v204_v3 = vsub.f32 %v8730_v25, %v180_v48 }
 0x16e   :  { %v192_v51 = vpop.xlane.xlu1 %191 }
 0x16f   :  { %v206_v52 = vadd.f32 1e-06, %v200_v49  ;;  %v195_v53 = vmul.f32 0.03125, %v192_v51 }
 0x171   :  { %8260 = vrsqrt.f32 %v206_v52  ;;  %v201_v54 = vsub.f32 %v195_v53, %v198_v50 }
 0x173   :  { %v207_v55 = vadd.f32 1e-06, %v201_v54 }
 0x175   :  { %8262 = vrsqrt.f32 %v207_v55 }
 0x17a   :  { %v8259_v57 = vpop.eup %8258 }
 0x17b   :  { %v211_v59 = vmul.f32 %v8259_v57, %v202_v56 }
 0x17d   :  { %v220_v62 = vmul.f32 %v6646_v58, %v211_v59 }
 0x17e   :  { %v8261_v63 = vpop.eup %8260 }
 0x17f   :  { %v229_v0 = vadd.f32 %v6647_v60, %v220_v62  ;;  %v212_v2 = vmul.f32 %v8261_v63, %v203_v61 }
 0x181   :  { %7364 = vmatmul.mubr.msk.f32.vlgmr.msra.gmra.mxu1 %vm166_vm2, %v229_v0  ;;  %v221_v4 = vmul.f32 %v6646_v58, %v212_v2 }
 0x182   :  { %v8263_v5 = vpop.eup %8262  ;;  %7366 = vmatprep.mubr.msk.f32.mxu1 %vm8559_vm0, %v8558_v1 }
 0x183   :  { %v230_v6 = vadd.f32 %v6647_v60, %v221_v4  ;;  %v213_v7 = vmul.f32 %v8263_v5, %v204_v3 }
 0x185   :  { %7367 = vmatmul.mubr.msk.f32.gmra.mxu1 %vm166_vm2, %v230_v6  ;;  %v222_v8 = vmul.f32 %v6646_v58, %v213_v7 }
 0x186   :  { %7369 = vmatprep.mubr.msk.f32.mxu1 %vm8559_vm0, %v8558_v1 }
 0x187   :  { %v231_v9 = vadd.f32 %v6647_v60, %v222_v8 }
 0x189   :  { %7370 = vmatmul.mubr.msk.f32.gmra.mxu1 %vm166_vm2, %v231_v9 }
 0x18a   :  { %7378 = vmatprep.mubr.msk.f32.mxu1 %vm8559_vm0, %v8558_v1 }
 0x241   :  { %v318_v10 = vpop.f32.mrf.mxu1 }
 0x242   :  { %v319_v19 = vadd.f32 %v6648_v13, %v318_v10 }
 0x243   :  { %v7365_v11 = vpop.f32.mrf.mxu1 }
 0x245   :  { %v323_v14 = vpop.f32.mrf.mxu1 }
 0x246   :  { %v324_v15 = vadd.f32 %v6648_v13, %v323_v14 }
 0x247   :  { %v7368_v16 = vpop.f32.mrf.mxu1 }
 0x248   :  { %337 = vrot.lane.b32.xlu1 %v324_v15, %s8560_s22 }
 0x249   :  { %v328_v17 = vpop.f32.mrf.mxu1 }
 0x24a   :  { %v329_v20 = vadd.f32 %v6648_v13, %v328_v17 }
 0x24b   :  { %v7371_v21 = vpop.f32.mrf.mxu1 }
 0x24c   :  { %335 = vrot.lane.b32.xlu1 %v319_v19, %s8560_s22  ;;  %339 = vrot.lane.b32.xlu0 %v329_v20, %s8560_s22 }
 0x250   :  { %345 = vrot.lane.b32.xlu1 %v329_v20, %s8561_s23  ;;  %351 = vrot.lane.b32.xlu0 %v329_v20, %s11027_s25 }
 0x254   :  { %343 = vrot.lane.b32.xlu1 %v324_v15, %s8561_s23  ;;  %349 = vrot.lane.b32.xlu0 %v324_v15, %s11027_s25 }
 0x258   :  { %341 = vrot.lane.b32.xlu1 %v319_v19, %s8561_s23  ;;  %347 = vrot.lane.b32.xlu0 %v319_v19, %s11027_s25 }
 0x25c   :  { %357 = vrot.lane.b32.xlu1 %v329_v20, %s11025_s27  ;;  %355 = vrot.lane.b32.xlu0 %v324_v15, %s11025_s27 }
 0x260   :  { %353 = vrot.lane.b32.xlu1 %v319_v19, %s11025_s27 }
 0x2ba   :  { %v8787_v22 = vpop.permute.xlu1 %337 }
 0x2bb   :  { %454 = vrot.lane.b32.xlu1 %v8787_v22, %s11025_s27 }
 0x2be   :  { %v8791_v23 = vpop.permute.xlu1 %335  ;;  %v8793_v24 = vpop.permute.xlu0 %339 }
 0x2bf   :  { %456 = vrot.lane.b32.xlu0 %v8793_v24, %s11025_s27 }
 0x2c2   :  { %v8797_v26 = vpop.permute.xlu1 %345  ;;  %v8799_v27 = vpop.permute.xlu0 %351 }
 0x2c3   :  { %554 = vrot.lane.b32.xlu1 %v8797_v26, %s11025_s27  ;;  %452 = vrot.lane.b32.xlu0 %v8791_v23, %s11025_s27 }
 0x2c6   :  { %v8805_v28 = vpop.permute.xlu1 %343  ;;  %v8807_v29 = vpop.permute.xlu0 %349 }
 0x2c7   :  { %552 = vrot.lane.b32.xlu1 %v8805_v28, %s11025_s27  ;;  %652 = vrot.lane.b32.xlu0 %v8799_v27, %s11025_s27 }
 0x2ca   :  { %v8813_v30 = vpop.permute.xlu1 %341  ;;  %v8819_v31 = vpop.permute.xlu0 %347 }
 0x2cb   :  { %550 = vrot.lane.b32.xlu1 %v8813_v30, %s11025_s27  ;;  %650 = vrot.lane.b32.xlu0 %v8807_v29, %s11025_s27 }
 0x2ce   :  { %v358_v32 = vpop.permute.xlu1 %357  ;;  %v356_v33 = vpop.permute.xlu0 %355 }
 0x2cf   :  { %884 = vrot.lane.b32.xlu1 %v329_v20, %s11023_s28  ;;  %7373 = vmatpush3.xpose.msk.msra.mxu1 %vm359_vm4, %v358_v32 }
 0x2d0   :  { %648 = vrot.lane.b32.xlu0 %v8819_v31, %s11025_s27  ;;  %7374 = vmatprep.subr.mxu1 %v8558_v1 }
 0x2d2   :  { %v354_v34 = vpop.permute.xlu1 %353 }
 0x2d3   :  { %882 = vrot.lane.b32.xlu1 %v324_v15, %s11023_s28  ;;  %7375 = vmatpush3.xpose.msk.msra.mxu1 %vm359_vm4, %v356_v33 }
 0x2d4   :  { %984 = vrot.lane.b32.xlu0 %v8793_v24, %s11023_s28  ;;  %7376 = vmatprep.subr.mxu1 %v8558_v1 }
 0x2d7   :  { %982 = vrot.lane.b32.xlu1 %v8787_v22, %s11023_s28  ;;  %7377 = vmatpush3.xpose.msk.msra.mxu1 %vm359_vm4, %v354_v34 }
 0x2d8   :  { %7387 = vmatprep.subr.mxu1 %v8558_v1 }
 0x2da   :  { %7379 = vmatmul.mubr.msk.f32.vlgmr.msra.gmra.mxu1 %vm359_vm4, %v319_v19 }
 0x2db   :  { %880 = vrot.lane.b32.xlu1 %v319_v19, %s11023_s28  ;;  %7381 = vmatprep.mubr.msk.f32.mxu1 %vm8559_vm0, %v8558_v1 }
 0x2de   :  { %7382 = vmatmul.mubr.msk.f32.gmra.mxu1 %vm359_vm4, %v324_v15 }
 0x2df   :  { %7384 = vmatprep.mubr.msk.f32.mxu1 %vm8559_vm0, %v8558_v1 }
 0x2e2   :  { %7385 = vmatmul.mubr.msk.f32.gmra.mxu1 %vm359_vm4, %v329_v20 }
 0x2e3   :  { %7393 = vmatprep.mubr.msk.f32.mxu1 %vm8559_vm0, %v8558_v1 }
 0x32d   :  { %v455_v35 = vpop.permute.xlu1 %454 }
 0x331   :  { %v457_v36 = vpop.permute.xlu0 %456 }
 0x332   :  { %7388 = vmatpush3.xpose.msk.msra.mxu1 %vm359_vm4, %v457_v36 }
 0x333   :  { %7389 = vmatprep.subr.mxu1 %v8558_v1 }
 0x335   :  { %v555_v37 = vpop.permute.xlu1 %554  ;;  %v453_v38 = vpop.permute.xlu0 %452 }
 0x336   :  { %7390 = vmatpush3.xpose.msk.msra.mxu1 %vm359_vm4, %v455_v35 }
 0x337   :  { %7391 = vmatprep.subr.mxu1 %v8558_v1 }
 0x339   :  { %v553_v39 = vpop.permute.xlu1 %552  ;;  %v653_v40 = vpop.permute.xlu0 %652 }
 0x33a   :  { %7392 = vmatpush3.xpose.msk.msra.mxu1 %vm359_vm4, %v453_v38  ;;  %7418 = vmatpush3.xpose.msk.msra.mxu0 %vm359_vm4, %v653_v40 }
 0x33b   :  { %7402 = vmatprep.subr.mxu1 %v8558_v1  ;;  %7419 = vmatprep.subr.mxu0 %v8558_v1 }
 0x33d   :  { %v551_v41 = vpop.permute.xlu1 %550  ;;  %7394 = vmatmul.mubr.msk.f32.vlgmr.msra.gmra.mxu1 %vm359_vm4, %v8791_v23  ;;  %v651_v42 = vpop.permute.xlu0 %650 }
 0x33e   :  { %7403 = vmatpush3.xpose.msk.msra.mxu1 %vm359_vm4, %v555_v37  ;;  %7420 = vmatpush3.xpose.msk.msra.mxu0 %vm359_vm4, %v651_v42 }
 0x33f   :  { %7396 = vmatprep.mubr.msk.f32.mxu1 %vm8559_vm0, %v8558_v1  ;;  %7404 = vmatprep.subr.mxu1 %v8558_v1 }
 0x340   :  { %7421 = vmatprep.subr.mxu0 %v8558_v1 }
 0x341   :  { %v885_v43 = vpop.permute.xlu1 %884  ;;  %7397 = vmatmul.mubr.msk.f32.gmra.mxu1 %vm359_vm4, %v8787_v22 }
 0x342   :  { %v649_v44 = vpop.permute.xlu0 %648  ;;  %7405 = vmatpush3.xpose.msk.msra.mxu1 %vm359_vm4, %v553_v39  ;;  %7399 = vmatprep.mubr.msk.f32.mxu1 %vm8559_vm0, %v8558_v1 }
 0x343   :  { %7422 = vmatpush3.xpose.msk.msra.mxu0 %vm359_vm4, %v649_v44  ;;  %7406 = vmatprep.subr.mxu1 %v8558_v1 }
 0x344   :  { %7447 = vmatprep.subr.mxu0 %v8558_v1 }
 0x345   :  { %v883_v45 = vpop.permute.xlu1 %882  ;;  %7400 = vmatmul.mubr.msk.f32.gmra.mxu1 %vm359_vm4, %v8793_v24 }
 0x346   :  { %7424 = vmatmul.mubr.msk.f32.vlgmr.msra.gmra.mxu0 %vm359_vm4, %v8819_v31  ;;  %v985_v46 = vpop.permute.xlu0 %984  ;;  %7407 = vmatpush3.xpose.msk.msra.mxu1 %vm359_vm4, %v551_v41 }
 0x347   :  { %7448 = vmatpush3.msk.msra.mxu0 %vm897_vm5, %v985_v46  ;;  %7408 = vmatprep.mubr.msk.f32.mxu1 %vm8559_vm0, %v8558_v1 }
 0x348   :  { %7426 = vmatprep.mubr.msk.f32.mxu0 %vm8559_vm0, %v8558_v1  ;;  %7432 = vmatprep.subr.mxu1 %v8558_v1 }
 0x349   :  { %v983_v47 = vpop.permute.xlu1 %982  ;;  %7409 = vmatmul.mubr.msk.f32.vlgmr.msra.gmra.mxu1 %vm359_vm4, %v8813_v30  ;;  %7449 = vmatprep.subr.mxu0 %v8558_v1 }
 0x34a   :  { %7427 = vmatmul.mubr.msk.f32.gmra.mxu0 %vm359_vm4, %v8807_v29  ;;  %7433 = vmatpush3.msk.msra.mxu1 %vm897_vm5, %v885_v43 }
 0x34b   :  { %7450 = vmatpush3.msra.mxu0 %v983_v47  ;;  %7434 = vmatprep.subr.mxu1 %v8558_v1 }
 0x34c   :  { %7411 = vmatprep.mubr.msk.f32.mxu1 %vm8559_vm0, %v8558_v1  ;;  %7429 = vmatprep.mubr.msk.f32.mxu0 %vm8559_vm0, %v8558_v1 }
 0x34d   :  { %7435 = vmatpush3.msra.mxu1 %v883_v45  ;;  %v881_v48 = vpop.permute.xlu1 %880  ;;  %7451 = vmatprep.subr.mxu0 %v8558_v1 }
 0x34e   :  { %7412 = vmatmul.mubr.msk.f32.gmra.mxu1 %vm359_vm4, %v8805_v28  ;;  %7430 = vmatmul.mubr.msk.f32.gmra.mxu0 %vm359_vm4, %v8799_v27 }
 0x34f   :  { %7436 = vmatprep.subr.mxu1 %v8558_v1  ;;  %7414 = vmatprep.mubr.msk.f32.mxu1 %vm8559_vm0, %v8558_v1 }
 0x350   :  { %7437 = vmatpush3.msra.mxu1 %v881_v48  ;;  %7453 = vmatprep.mubr.msk.f32.mxu0 %vm8559_vm0, %v8558_v1 }
 0x351   :  { %7462 = vmatprep.subr.mxu1 %v8558_v1 }
 0x352   :  { %7415 = vmatmul.mubr.msk.f32.gmra.mxu1 %vm359_vm4, %v8797_v26 }
 0x353   :  { %7438 = vmatprep.mubr.msk.f32.mxu1 %vm8559_vm0, %v8558_v1 }
 0x39a   :  { %v438_v49 = vpop.f32.mrf.mxu1 }
 0x39b   :  { %v747_v50 = vsel %vm746_vm6, %v438_v49, -inf }
 0x39c   :  { %748 = vmax.xlane.f32.xlu1 %v747_v50  ;;  %v7380_v51 = vpop.f32.mrf.mxu1 }
 0x39e   :  { %v443_v52 = vpop.f32.mrf.mxu1 }
 0x39f   :  { %v750_v53 = vsel %vm746_vm6, %v443_v52, -inf }
 0x3a0   :  { %751 = vmax.xlane.f32.xlu0 %v750_v53  ;;  %v7383_v54 = vpop.f32.mrf.mxu1 }
 0x3a2   :  { %v448_v55 = vpop.f32.mrf.mxu1 }
 0x3a3   :  { %v754_v56 = vsel %vm753_vm7, %v448_v55, -inf }
 0x3a4   :  { %755 = vmax.xlane.f32.xlu1 %v754_v56  ;;  %v7386_v57 = vpop.f32.mrf.mxu1 }
 0x3b5   :  { %1083 = vrot.lane.b32.xlu1 %v8797_v26, %s11023_s28 }
 0x3fd   :  { %v8911_v58 = vpop.f32.mrf.mxu1 }
 0x3fe   :  { %v757_v59 = vsel %vm746_vm6, %v8911_v58, -inf }
 0x3ff   :  { %758 = vmax.xlane.f32.xlu0 %v757_v59  ;;  %v7395_v60 = vpop.f32.mrf.mxu1 }
 0x401   :  { %v8915_v61 = vpop.f32.mrf.mxu1 }
 0x402   :  { %v760_v9 = vsel %vm746_vm6, %v8915_v61, -inf }
 0x403   :  { %v7398_v62 = vpop.f32.mrf.mxu1 }
 0x405   :  { %v8917_v63 = vpop.f32.mrf.mxu1 }
 0x406   :  { %v732_v0 = vpop.f32.mrf.mxu0  ;;  %v763_v21 = vsel %vm753_vm7, %v8917_v63, -inf }
 0x407   :  { %v7401_v2 = vpop.f32.mrf.mxu1  ;;  %v775_v3 = vsel %vm746_vm6, %v732_v0, -inf }
 0x408   :  { %776 = vmax.xlane.f32.xlu0 %v775_v3  ;;  %v7425_v4 = vpop.f32.mrf.mxu0 }
 0x409   :  { %v634_v5 = vpop.f32.mrf.mxu1 }
 0x40a   :  { %v8920_v6 = vpop.f32.mrf.mxu0  ;;  %v766_v7 = vsel %vm746_vm6, %v634_v5, -inf }
 0x40b   :  { %767 = vmax.xlane.f32.xlu1 %v766_v7  ;;  %v7410_v8 = vpop.f32.mrf.mxu1  ;;  %v778_v15 = vsel %vm746_vm6, %v8920_v6, -inf }
 0x40c   :  { %761 = vmax.xlane.f32.xlu0 %v760_v9  ;;  %v7428_v10 = vpop.f32.mrf.mxu0 }
 0x40e   :  { %v8925_v11 = vpop.f32.mrf.mxu1  ;;  %v8927_v13 = vpop.f32.mrf.mxu0 }
 0x40f   :  { %v769_v14 = vsel %vm746_vm6, %v8925_v11, -inf }
 0x410   :  { %770 = vmax.xlane.f32.xlu1 %v769_v14  ;;  %v7413_v16 = vpop.f32.mrf.mxu1  ;;  %779 = vmax.xlane.f32.xlu0 %v778_v15  ;;  %v7431_v17 = vpop.f32.mrf.mxu0 }
 0x412   :  { %v8933_v19 = vpop.f32.mrf.mxu1 }
 0x413   :  { %v772_v20 = vsel %vm753_vm7, %v8933_v19, -inf }
 0x414   :  { %773 = vmax.xlane.f32.xlu1 %v772_v20  ;;  %v7416_v22 = vpop.f32.mrf.mxu1  ;;  %764 = vmax.xlane.f32.xlu0 %v763_v21 }
 0x425   :  { %1081 = vrot.lane.b32.xlu1 %v8805_v28, %s11023_s28  ;;  %v749_v24 = vpop.xlane.xlu1 %748 }
 0x426   :  { %v784_v26 = vsub.f32 %v438_v49, %v749_v24 }
 0x428   :  { %v796_v33 = vmul.f32 1.442695, %v784_v26 }
 0x429   :  { %v752_v32 = vpop.xlane.xlu0 %751 }
 0x42a   :  { %980 = vrot.lane.b32.xlu0 %v8791_v23, %s11023_s28  ;;  %v785_v34 = vsub.f32 %v443_v52, %v752_v32  ;;  %8264 = vpow2.f32 %v796_v33  ;;  %v781_v23 = vsel %vm753_vm7, %v8927_v13, -inf }
 0x42c   :  { %v798_v36 = vmul.f32 1.442695, %v785_v34 }
 0x42d   :  { %v756_v35 = vpop.xlane.xlu1 %755 }
 0x42e   :  { %v786_v37 = vsub.f32 %v448_v55, %v756_v35  ;;  %8266 = vpow2.f32 %v798_v36 }
 0x430   :  { %v800_v38 = vmul.f32 1.442695, %v786_v37 }
 0x431   :  { %v8962_v47 = vpop.permute.xlu1 %1083 }
 0x432   :  { %8268 = vpow2.f32 %v800_v38 }
 0x437   :  { %v8943_v39 = vpop.eup %8264 }
 0x438   :  { %v820_v28 = vsel %vm746_vm6, %v8943_v39, 0.0 }
 0x43b   :  { %v8949_v40 = vpop.eup %8266 }
 0x43c   :  { %v823_v41 = vsel %vm746_vm6, %v8949_v40, 0.0 }
 0x43f   :  { %v8953_v42 = vpop.eup %8268 }
 0x440   :  { %v826_v43 = vsel %vm753_vm7, %v8953_v42, 0.0 }
 0x449   :  { %821 = vadd.xlane.f32.xlu1 %v820_v28  ;;  %782 = vmax.xlane.f32.xlu0 %v781_v23 }
 0x44d   :  { %824 = vadd.xlane.f32.xlu1 %v823_v41 }
 0x451   :  { %827 = vadd.xlane.f32.xlu1 %v826_v43 }
 0x45f   :  { %1182 = vrot.lane.b32.xlu0 %v8799_v27, %s11023_s28 }
 0x463   :  { %1180 = vrot.lane.b32.xlu0 %v8807_v29, %s11023_s28 }
 0x488   :  { %v759_v44 = vpop.xlane.xlu0 %758 }
 0x489   :  { %v787_v45 = vsub.f32 %v8911_v58, %v759_v44 }
 0x48b   :  { %v802_v46 = vmul.f32 1.442695, %v787_v45 }
 0x48d   :  { %8270 = vpow2.f32 %v802_v46 }
 0x491   :  { %v777_v48 = vpop.xlane.xlu0 %776 }
 0x492   :  { %v793_v49 = vsub.f32 %v732_v0, %v777_v48 }
 0x494   :  { %v814_v50 = vmul.f32 1.442695, %v793_v49  ;;  %v768_v51 = vpop.xlane.xlu1 %767 }
 0x495   :  { %v790_v52 = vsub.f32 %v634_v5, %v768_v51  ;;  %v762_v53 = vpop.xlane.xlu0 %761 }
 0x496   :  { %8272 = vpow2.f32 %v814_v50  ;;  %v788_v54 = vsub.f32 %v8915_v61, %v762_v53 }
 0x497   :  { %v808_v27 = vmul.f32 1.442695, %v790_v52 }
 0x498   :  { %v804_v55 = vmul.f32 1.442695, %v788_v54 }
 0x499   :  { %8274 = vpow2.f32 %v808_v27  ;;  %v771_v29 = vpop.xlane.xlu1 %770  ;;  %v780_v56 = vpop.xlane.xlu0 %779 }
 0x49a   :  { %v8965_v57 = vpop.eup %8270  ;;  %8276 = vpow2.f32 %v804_v55  ;;  %v791_v58 = vsub.f32 %v8925_v11, %v771_v29  ;;  %v794_v59 = vsub.f32 %v8920_v6, %v780_v56 }
 0x49b   :  { %v829_v60 = vsel %vm746_vm6, %v8965_v57, 0.0 }
 0x49c   :  { %v810_v62 = vmul.f32 1.442695, %v791_v58  ;;  %v816_v0 = vmul.f32 1.442695, %v794_v59  ;;  %830 = vadd.xlane.f32.xlu0 %v829_v60 }
 0x49d   :  { %v774_v2 = vpop.xlane.xlu1 %773  ;;  %v765_v61 = vpop.xlane.xlu0 %764 }
 0x49e   :  { %8278 = vpow2.f32 %v810_v62  ;;  %v792_v3 = vsub.f32 %v8933_v19, %v774_v2  ;;  %v789_v4 = vsub.f32 %v8917_v63, %v765_v61 }
 0x49f   :  { %8280 = vpow2.f32 %v816_v0 }
 0x4a0   :  { %v812_v5 = vmul.f32 1.442695, %v792_v3  ;;  %v806_v7 = vmul.f32 1.442695, %v789_v4 }
 0x4a1   :  { %v981_v8 = vpop.permute.xlu0 %980  ;;  %v1082_v26 = vpop.permute.xlu1 %1081 }
 0x4a2   :  { %8282 = vpow2.f32 %v812_v5  ;;  %7452 = vmatpush3.msra.mxu0 %v981_v8 }
 0x4a3   :  { %v8973_v6 = vpop.eup %8272  ;;  %8284 = vpow2.f32 %v806_v7  ;;  %7477 = vmatprep.subr.mxu0 %v8558_v1 }
 0x4a4   :  { %v847_v9 = vsel %vm746_vm6, %v8973_v6, 0.0 }
 0x4a5   :  { %848 = vadd.xlane.f32.xlu0 %v847_v9 }
 0x4a6   :  { %v8978_v10 = vpop.eup %8274 }
 0x4a7   :  { %v8980_v11 = vpop.eup %8276  ;;  %v838_v63 = vsel %vm746_vm6, %v8978_v10, 0.0 }
 0x4a8   :  { %839 = vadd.xlane.f32.xlu1 %v838_v63  ;;  %v832_v14 = vsel %vm746_vm6, %v8980_v11, 0.0 }
 0x4a9   :  { %833 = vadd.xlane.f32.xlu0 %v832_v14 }
 0x4ab   :  { %v8986_v15 = vpop.eup %8278 }
 0x4ac   :  { %v8988_v16 = vpop.eup %8280  ;;  %v841_v17 = vsel %vm746_vm6, %v8986_v15, 0.0 }
 0x4ad   :  { %842 = vadd.xlane.f32.xlu1 %v841_v17  ;;  %v850_v19 = vsel %vm746_vm6, %v8988_v16, 0.0  ;;  %v1327_v17 = vld [vmem:[%s11004_s7 + $0x18] sm:$0xff] }
 0x4ae   :  { %851 = vadd.xlane.f32.xlu0 %v850_v19  ;;  %v1326_v19 = vld [vmem:[%s11004_s7 + $0x10] sm:$0xff] }
 0x4af   :  { %v8994_v20 = vpop.eup %8282 }
 0x4b0   :  { %v8996_v21 = vpop.eup %8284  ;;  %v844_v22 = vsel %vm753_vm7, %v8994_v20, 0.0 }
 0x4b1   :  { %845 = vadd.xlane.f32.xlu1 %v844_v22  ;;  %v835_v24 = vsel %vm753_vm7, %v8996_v21, 0.0 }
 0x4b2   :  { %836 = vadd.xlane.f32.xlu0 %v835_v24 }
 0x4c2   :  { %1079 = vrot.lane.b32.xlu1 %v8813_v30, %s11023_s28 }
 0x4d2   :  { %v822_v32 = vpop.xlane.xlu1 %821  ;;  %v783_v33 = vpop.xlane.xlu0 %782 }
 0x4d3   :  { %8286 = vrcp.f32 %v822_v32  ;;  %v795_v34 = vsub.f32 %v8927_v13, %v783_v33 }
 0x4d5   :  { %v818_v35 = vmul.f32 1.442695, %v795_v34 }
 0x4d6   :  { %v825_v36 = vpop.xlane.xlu1 %824  ;;  %v1183_v44 = vpop.permute.xlu0 %1182 }
 0x4d7   :  { %8288 = vpow2.f32 %v818_v35 }
 0x4d8   :  { %8290 = vrcp.f32 %v825_v36 }
 0x4da   :  { %v828_v37 = vpop.xlane.xlu1 %827 }
 0x4db   :  { %8292 = vrcp.f32 %v828_v37 }
 0x4e0   :  { %v8287_v38 = vpop.eup %8286 }
 0x4e1   :  { %v868_v28 = vmul.f32 %v8287_v38, %v8943_v39  ;;  %v1324_v38 = vld [vmem:[%s11004_s7] sm:$0xff] }
 0x4e3   :  { %7439 = vmatmul.mubr.msk.f32.vlgmr.msra.gmra.mxu1 %vm746_vm6, %v868_v28 }
 0x4e4   :  { %v9007_v23 = vpop.eup %8288  ;;  %7463 = vmatpush3.msk.msra.mxu1 %vm897_vm5, %v8962_v47  ;;  %7441 = vmatprep.mubr.msk.f32.mxu1 %vm8559_vm0, %v8558_v1 }
 0x4e5   :  { %v8291_v30 = vpop.eup %8290  ;;  %7464 = vmatprep.subr.mxu1 %v8558_v1  ;;  %v853_v13 = vsel %vm753_vm7, %v9007_v23, 0.0 }
 0x4e6   :  { %7465 = vmatpush3.msra.mxu1 %v1082_v26  ;;  %854 = vadd.xlane.f32.xlu0 %v853_v13  ;;  %v869_v39 = vmul.f32 %v8291_v30, %v8949_v40  ;;  %v1181_v40 = vpop.permute.xlu0 %1180 }
 0x4e7   :  { %7466 = vmatprep.subr.mxu1 %v8558_v1 }
 0x4e8   :  { %v8293_v41 = vpop.eup %8292  ;;  %7442 = vmatmul.mubr.msk.f32.gmra.mxu1 %vm746_vm6, %v869_v39 }
 0x4e9   :  { %7444 = vmatprep.mubr.msk.f32.mxu1 %vm8559_vm0, %v8558_v1  ;;  %v870_v43 = vmul.f32 %v8293_v41, %v8953_v42 }
 0x4ec   :  { %7445 = vmatmul.mubr.msk.f32.gmra.mxu1 %vm746_vm6, %v870_v43 }
 0x4ed   :  { %7468 = vmatprep.mubr.msk.f32.mxu1 %vm8559_vm0, %v8558_v1 }
 0x4fc   :  { %1178 = vrot.lane.b32.xlu0 %v8819_v31, %s11023_s28 }
 0x525   :  { %v831_v45 = vpop.xlane.xlu0 %830 }
 0x526   :  { %8294 = vrcp.f32 %v831_v45 }
 0x52e   :  { %v849_v46 = vpop.xlane.xlu0 %848 }
 0x531   :  { %v840_v47 = vpop.xlane.xlu1 %839 }
 0x532   :  { %8296 = vrcp.f32 %v840_v47  ;;  %v834_v48 = vpop.xlane.xlu0 %833 }
 0x533   :  { %v8295_v49 = vpop.eup %8294  ;;  %8298 = vrcp.f32 %v834_v48 }
 0x534   :  { %v871_v42 = vmul.f32 %v8295_v49, %v8965_v57 }
 0x536   :  { %v843_v50 = vpop.xlane.xlu1 %842  ;;  %7454 = vmatmul.mubr.msk.f32.vlgmr.msra.gmra.mxu0 %vm746_vm6, %v871_v42 }
 0x537   :  { %8300 = vrcp.f32 %v843_v50  ;;  %v852_v51 = vpop.xlane.xlu0 %851  ;;  %7478 = vmatpush3.msk.msra.mxu0 %vm897_vm5, %v1183_v44  ;;  %7456 = vmatprep.mubr.msk.f32.mxu0 %vm8559_vm0, %v8558_v1 }
 0x538   :  { %7479 = vmatprep.subr.mxu0 %v8558_v1 }
 0x539   :  { %7480 = vmatpush3.msra.mxu0 %v1181_v40 }
 0x53a   :  { %v846_v31 = vpop.xlane.xlu1 %845  ;;  %7481 = vmatprep.subr.mxu0 %v8558_v1 }
 0x53b   :  { %8302 = vrcp.f32 %v846_v31  ;;  %v837_v52 = vpop.xlane.xlu0 %836 }
 0x53c   :  { %8304 = vrcp.f32 %v837_v52 }
 0x53d   :  { %8306 = vrcp.f32 %v849_v46 }
 0x53e   :  { %v1080_v53 = vpop.permute.xlu1 %1079  ;;  %8308 = vrcp.f32 %v852_v51 }
 0x53f   :  { %v8297_v54 = vpop.eup %8296  ;;  %7467 = vmatpush3.msra.mxu1 %v1080_v53 }
 0x540   :  { %v8299_v27 = vpop.eup %8298  ;;  %v874_v55 = vmul.f32 %v8297_v54, %v8978_v10  ;;  %7492 = vmatprep.subr.mxu1 %v8558_v1 }
 0x541   :  { %v872_v29 = vmul.f32 %v8299_v27, %v8980_v11 }
 0x542   :  { %7469 = vmatmul.mubr.msk.f32.vlgmr.msra.gmra.mxu1 %vm746_vm6, %v874_v55 }
 0x543   :  { %7457 = vmatmul.mubr.msk.f32.gmra.mxu0 %vm746_vm6, %v872_v29  ;;  %7471 = vmatprep.mubr.msk.f32.mxu1 %vm8559_vm0, %v8558_v1 }
 0x544   :  { %v8301_v56 = vpop.eup %8300  ;;  %7459 = vmatprep.mubr.msk.f32.mxu0 %vm8559_vm0, %v8558_v1  ;;  %7493 = vmatpush3.msra.mxu1 %v1327_v17  ;;  %v1492_v17 = vld [vmem:[%s11008_s11] sm:$0xff] }
 0x545   :  { %v875_v57 = vmul.f32 %v8301_v56, %v8986_v15  ;;  %7494 = vmatprep.subr.mxu1 %v8558_v1  ;;  %v6692_v56 = vld [vmem:[%s11005_s8] ss:$0 sm:$0xff] }
 0x546   :  { %7495 = vmatpush3.msra.mxu1 %v1326_v19 }
 0x547   :  { %7472 = vmatmul.mubr.msk.f32.gmra.mxu1 %vm746_vm6, %v875_v57  ;;  %7496 = vmatprep.subr.mxu1 %v8558_v1 }
 0x548   :  { %v8303_v58 = vpop.eup %8302  ;;  %7474 = vmatprep.mubr.msk.f32.mxu1 %vm8559_vm0, %v8558_v1 }
 0x549   :  { %v8305_v59 = vpop.eup %8304  ;;  %v876_v60 = vmul.f32 %v8303_v58, %v8994_v20  ;;  %v1325_v20 = vld [vmem:[%s11004_s7 + $0x8] sm:$0xff] }
 0x54a   :  { %v873_v62 = vmul.f32 %v8305_v59, %v8996_v21  ;;  %v8307_v2 = vpop.eup %8306  ;;  %7497 = vmatpush3.msra.mxu1 %v1325_v20 }
 0x54b   :  { %7475 = vmatmul.mubr.msk.f32.gmra.mxu1 %vm746_vm6, %v876_v60  ;;  %v877_v61 = vmul.f32 %v8307_v2, %v8973_v6  ;;  %v8309_v4 = vpop.eup %8308  ;;  %7498 = vmatprep.subr.mxu1 %v8558_v1 }
 0x54c   :  { %7460 = vmatmul.mubr.msk.f32.gmra.mxu0 %vm746_vm6, %v873_v62  ;;  %7500 = vmatprep.mubr.msk.f32.mxu1 %vm8559_vm0, %v8558_v1  ;;  %v878_v5 = vmul.f32 %v8309_v4, %v8988_v16 }
 0x54d   :  { %7483 = vmatprep.mubr.msk.f32.mxu0 %vm8559_vm0, %v8558_v1  ;;  %7499 = vmatpush3.msra.mxu1 %v1324_v38 }
 0x54e   :  { %7526 = vmatprep.subr.mxu1 %v8558_v1 }
 0x56f   :  { %v855_v0 = vpop.xlane.xlu0 %854 }
 0x570   :  { %8310 = vrcp.f32 %v855_v0 }
 0x573   :  { %v1179_v3 = vpop.permute.xlu0 %1178 }
 0x574   :  { %7482 = vmatpush3.msra.mxu0 %v1179_v3 }
 0x575   :  { %7484 = vmatmul.mubr.msk.f32.vlgmr.msra.gmra.mxu0 %vm746_vm6, %v877_v61  ;;  %7509 = vmatprep.subr.mxu0 %v8558_v1 }
 0x576   :  { %7486 = vmatprep.mubr.msk.f32.mxu0 %vm8559_vm0, %v8558_v1 }
 0x579   :  { %7487 = vmatmul.mubr.msk.f32.gmra.mxu0 %vm746_vm6, %v878_v5 }
 0x57a   :  { %7489 = vmatprep.mubr.msk.f32.mxu0 %vm8559_vm0, %v8558_v1 }
 0x57d   :  { %v8311_v7 = vpop.eup %8310 }
 0x57e   :  { %v879_v8 = vmul.f32 %v8311_v7, %v9007_v23 }
 0x580   :  { %7490 = vmatmul.mubr.msk.f32.gmra.mxu0 %vm746_vm6, %v879_v8 }
 0x581   :  { %7517 = vmatprep.mubr.msk.f32.mxu0 %vm8559_vm0, %v8558_v1 }
 0x5a3   :  { %v966_v6 = vpop.f32.mrf.mxu1 }
 0x5a5   :  { %v7440_v9 = vpop.f32.mrf.mxu1 }
 0x5a8   :  { %v971_v10 = vpop.f32.mrf.mxu1 }
 0x5aa   :  { %v7443_v11 = vpop.f32.mrf.mxu1 }
 0x5ac   :  { %v9068_v63 = vpop.f32.mrf.mxu1 }
 0x5ae   :  { %v7446_v14 = vpop.f32.mrf.mxu1 }
 0x5f6   :  { %v1065_v15 = vpop.f32.mrf.mxu0 }
 0x5f7   :  { %1280 = vrot.lane.b32.xlu1 %v1065_v15, %s11021_s29  ;;  %v1495_v15 = vld [vmem:[%s11008_s11 + $0x18] sm:$0xff] }
 0x5f8   :  { %v7455_v16 = vpop.f32.mrf.mxu0  ;;  %7510 = vmatpush3.msra.mxu0 %v1495_v15 }
 0x5f9   :  { %7511 = vmatprep.subr.mxu0 %v8558_v1  ;;  %v1493_v16 = vld [vmem:[%s11008_s11 + $0x8] sm:$0xff] }
 0x602   :  { %v1164_v21 = vpop.f32.mrf.mxu1 }
 0x603   :  { %v1070_v22 = vpop.f32.mrf.mxu0 }
 0x604   :  { %1282 = vrot.lane.b32.xlu0 %v1070_v22, %s11021_s29  ;;  %v7470_v24 = vpop.f32.mrf.mxu1 }
 0x605   :  { %v7458_v26 = vpop.f32.mrf.mxu0 }
 0x607   :  { %v1169_v32 = vpop.f32.mrf.mxu1 }
 0x608   :  { %1292 = vrot.lane.b32.xlu0 %v1164_v21, %s11019_s21 }
 0x609   :  { %v7473_v33 = vpop.f32.mrf.mxu1 }
 0x60b   :  { %v1174_v34 = vpop.f32.mrf.mxu1 }
 0x60c   :  { %v1075_v35 = vpop.f32.mrf.mxu0 }
 0x60d   :  { %v7476_v36 = vpop.f32.mrf.mxu1 }
 0x60e   :  { %v7461_v37 = vpop.f32.mrf.mxu0 }
 0x635   :  { %v1263_v28 = vpop.f32.mrf.mxu0 }
 0x636   :  { %1304 = vrot.lane.b32.xlu1 %v1263_v28, %s11017_s18 }
 0x637   :  { %v7485_v23 = vpop.f32.mrf.mxu0 }
 0x639   :  { %v1268_v30 = vpop.f32.mrf.mxu0 }
 0x63a   :  { %1294 = vrot.lane.b32.xlu1 %v1169_v32, %s11019_s21  ;;  %1306 = vrot.lane.b32.xlu0 %v1268_v30, %s11017_s18 }
 0x63b   :  { %v7488_v13 = vpop.f32.mrf.mxu0 }
 0x63e   :  { %1284 = vrot.lane.b32.xlu1 %v1075_v35, %s11021_s29  ;;  %1296 = vrot.lane.b32.xlu0 %v1174_v34, %s11019_s21  ;;  %s11035_s29 = smov 24  }
 0x640   :  { %v1273_v39 = vpop.f32.mrf.mxu0 }
 0x642   :  { %1308 = vrot.lane.b32.xlu1 %v1273_v39, %s11017_s18  ;;  %v7491_v41 = vpop.f32.mrf.mxu0 }
 0x669   :  { %v1281_v44 = vpop.permute.xlu1 %1280 }
 0x66a   :  { %v1313_v45 = vsel %vm359_vm4, %v966_v6, %v1281_v44 }
 0x676   :  { %v1283_v43 = vpop.permute.xlu0 %1282 }
 0x677   :  { %v1314_v49 = vsel %vm359_vm4, %v971_v10, %v1283_v43 }
 0x67a   :  { %v1293_v40 = vpop.permute.xlu0 %1292 }
 0x67b   :  { %v1317_v46 = vsel %vm1316_vm8, %v1313_v45, %v1293_v40 }
 0x6a8   :  { %v1305_v47 = vpop.permute.xlu1 %1304 }
 0x6a9   :  { %v1321_v48 = vsel %vm1320_vm9, %v1317_v46, %v1305_v47  ;;  %v6696_v46 = vld [vmem:[%s11006_s9] ss:$0 sm:$0xff] }
 0x6aa   :  { %7501 = vmatmul.mubr.msk.f32.vlgmr.msra.gmra.mxu1 %vm166_vm2, %v1321_v48  ;;  %v6697_v48 = vld [vmem:[%s11007_s10] ss:$0 sm:$0xff] }
 0x6ab   :  { %7503 = vmatprep.mubr.msk.f32.mxu1 %vm8559_vm0, %v8558_v1 }
 0x6ac   :  { %v1295_v42 = vpop.permute.xlu1 %1294  ;;  %v1307_v50 = vpop.permute.xlu0 %1306 }
 0x6ad   :  { %v1318_v51 = vsel %vm1316_vm8, %v1314_v49, %v1295_v42 }
 0x6ae   :  { %v1322_v31 = vsel %vm1320_vm9, %v1318_v51, %v1307_v50 }
 0x6af   :  { %7504 = vmatmul.mubr.msk.f32.gmra.mxu1 %vm166_vm2, %v1322_v31 }
 0x6b0   :  { %v1285_v52 = vpop.permute.xlu1 %1284  ;;  %7506 = vmatprep.mubr.msk.f32.mxu1 %vm8559_vm0, %v8558_v1  ;;  %v1297_v54 = vpop.permute.xlu0 %1296 }
 0x6b1   :  { %v1315_v53 = vsel %vm359_vm4, %v9068_v63, %v1285_v52 }
 0x6b2   :  { %v1319_v27 = vsel %vm1316_vm8, %v1315_v53, %v1297_v54 }
 0x6b4   :  { %v1309_v55 = vpop.permute.xlu1 %1308 }
 0x6b5   :  { %v1323_v29 = vsel %vm1320_vm9, %v1319_v27, %v1309_v55 }
 0x6b6   :  { %7507 = vmatmul.mubr.msk.f32.gmra.mxu1 %vm166_vm2, %v1323_v29 }
 0x6b7   :  { %7558 = vmatprep.mubr.msk.f32.mxu1 %vm8559_vm0, %v8558_v1 }
 0x76a   :  { %v1410_v57 = vpop.f32.mrf.mxu1 }
 0x76b   :  { %v1411_v58 = vadd.f32 %v6692_v56, %v1410_v57  ;;  %v1634_v57 = vld [vmem:[%s11010_s13 + $0x78] sm:$0xff] }
 0x76c   :  { %v7502_v59 = vpop.f32.mrf.mxu1  ;;  %7527 = vmatpush3.msra.mxu1 %v1634_v57 }
 0x76d   :  { %v9118_v60 = vadd.f32 %v1411_v58, %v8711_v12  ;;  %7528 = vmatprep.subr.mxu1 %v8558_v1  ;;  %v1633_v58 = vld [vmem:[%s11010_s13 + $0x70] sm:$0xff]  ;;  %v1632_v59 = vld [vmem:[%s11010_s13 + $0x68] sm:$0xff] }
 0x76e   :  { %7529 = vmatpush3.msra.mxu1 %v1633_v58 }
 0x76f   :  { %v1415_v62 = vpop.f32.mrf.mxu1  ;;  %v1429_v0 = vsel %vm166_vm2, %v9118_v60, 0.0  ;;  %v1441_v2 = vmul.f32 %v9118_v60, %v9118_v60  ;;  %7530 = vmatprep.subr.mxu1 %v8558_v1 }
 0x770   :  { %v1416_v61 = vadd.f32 %v6692_v56, %v1415_v62  ;;  %1430 = vadd.xlane.f32.xlu0 %v1429_v0  ;;  %7531 = vmatpush3.msra.mxu1 %v1632_v59  ;;  %v1631_v62 = vld [vmem:[%s11010_s13 + $0x60] sm:$0xff]  ;;  %v1630_v0 = vld [vmem:[%s11010_s13 + $0x58] sm:$0xff] }
 0x771   :  { %v7505_v3 = vpop.f32.mrf.mxu1  ;;  %v1444_v4 = vsel %vm166_vm2, %v1441_v2, 0.0  ;;  %7532 = vmatprep.subr.mxu1 %v8558_v1  ;;  %v1629_v2 = vld [vmem:[%s11010_s13 + $0x50] sm:$0xff] }
 0x772   :  { %v9126_v5 = vadd.f32 %v1416_v61, %v8720_v18  ;;  %1445 = vadd.xlane.f32.xlu1 %v1444_v4  ;;  %7533 = vmatpush3.msra.mxu1 %v1631_v62  ;;  %v1628_v61 = vld [vmem:[%s11010_s13 + $0x48] sm:$0xff]  ;;  %v1627_v3 = vld [vmem:[%s11010_s13 + $0x40] sm:$0xff]  ;;  %v1626_v4 = vld [vmem:[%s11010_s13 + $0x38] sm:$0xff] }
 0x773   :  { %7534 = vmatprep.subr.mxu1 %v8558_v1 }
 0x774   :  { %v1432_v12 = vsel %vm166_vm2, %v9126_v5, 0.0  ;;  %v1442_v7 = vmul.f32 %v9126_v5, %v9126_v5  ;;  %7535 = vmatpush3.msra.mxu1 %v1630_v0 }
 0x775   :  { %1433 = vadd.xlane.f32.xlu0 %v1432_v12  ;;  %7536 = vmatprep.subr.mxu1 %v8558_v1  ;;  %v1625_v12 = vld [vmem:[%s11010_s13 + $0x30] sm:$0xff] }
 0x776   :  { %v1420_v8 = vpop.f32.mrf.mxu1  ;;  %v1447_v10 = vsel %vm166_vm2, %v1442_v7, 0.0  ;;  %7537 = vmatpush3.msra.mxu1 %v1629_v2  ;;  %v1624_v7 = vld [vmem:[%s11010_s13 + $0x28] sm:$0xff] }
 0x777   :  { %v1421_v6 = vadd.f32 %v6692_v56, %v1420_v8  ;;  %7538 = vmatprep.subr.mxu1 %v8558_v1  ;;  %v1623_v8 = vld [vmem:[%s11010_s13 + $0x20] sm:$0xff] }
 0x778   :  { %v7508_v9 = vpop.f32.mrf.mxu1  ;;  %7539 = vmatpush3.msra.mxu1 %v1628_v61 }
 0x779   :  { %v9134_v11 = vadd.f32 %v1421_v6, %v8730_v25  ;;  %1448 = vadd.xlane.f32.xlu0 %v1447_v10  ;;  %v1494_v25 = vld [vmem:[%s11008_s11 + $0x10] sm:$0xff]  ;;  %7540 = vmatprep.subr.mxu1 %v8558_v1  ;;  %v1622_v6 = vld [vmem:[%s11010_s13 + $0x18] sm:$0xff]  ;;  %v1620_v10 = vld [vmem:[%s11010_s13 + $0x8] sm:$0xff] }
 0x77a   :  { %7512 = vmatpush3.msra.mxu0 %v1494_v25  ;;  %7541 = vmatpush3.msra.mxu1 %v1627_v3  ;;  %v1621_v9 = vld [vmem:[%s11010_s13 + $0x10] sm:$0xff] }
 0x77b   :  { %v1435_v18 = vsel %vm173_vm3, %v9134_v11, 0.0  ;;  %v1443_v63 = vmul.f32 %v9134_v11, %v9134_v11  ;;  %7513 = vmatprep.subr.mxu0 %v8558_v1  ;;  %7542 = vmatprep.subr.mxu1 %v8558_v1 }
 0x77c   :  { %7514 = vmatpush3.msra.mxu0 %v1493_v16  ;;  %7543 = vmatpush3.msra.mxu1 %v1626_v4 }
 0x77d   :  { %1436 = vadd.xlane.f32.xlu0 %v1435_v18  ;;  %v1450_v14 = vsel %vm173_vm3, %v1443_v63, 0.0  ;;  %7515 = vmatprep.subr.mxu0 %v8558_v1  ;;  %v1619_v18 = vld [vmem:[%s11010_s13] sm:$0xff] }
 0x77e   :  { %1451 = vadd.xlane.f32.xlu1 %v1450_v14  ;;  %7516 = vmatpush3.msra.mxu0 %v1492_v17  ;;  %v6698_v63 = vld [vmem:[%s11009_s12] ss:$0 sm:$0xff] }
 0x77f   :  { %7567 = vmatprep.subr.mxu0 %v8558_v1  ;;  %7544 = vmatprep.subr.mxu1 %v8558_v1 }
 0x780   :  { %7545 = vmatpush3.msra.mxu1 %v1625_v12 }
 0x781   :  { %7546 = vmatprep.subr.mxu1 %v8558_v1 }
 0x782   :  { %7547 = vmatpush3.msra.mxu1 %v1624_v7 }
 0x783   :  { %7548 = vmatprep.subr.mxu1 %v8558_v1 }
 0x784   :  { %7549 = vmatpush3.msra.mxu1 %v1623_v8 }
 0x785   :  { %7550 = vmatprep.subr.mxu1 %v8558_v1 }
 0x786   :  { %7551 = vmatpush3.msra.mxu1 %v1622_v6 }
 0x787   :  { %7552 = vmatprep.subr.mxu1 %v8558_v1 }
 0x788   :  { %7553 = vmatpush3.msra.mxu1 %v1621_v9  ;;  %v6710_v9 = vld [vmem:[%s11002_s5 + $0x38] sm:$0xff] }
 0x789   :  { %7554 = vmatprep.subr.mxu1 %v8558_v1 }
 0x78a   :  { %7555 = vmatpush3.msra.mxu1 %v1620_v10  ;;  %v6708_v10 = vld [vmem:[%s11002_s5 + $0x28] sm:$0xff] }
 0x78b   :  { %7556 = vmatprep.subr.mxu1 %v8558_v1 }
 0x78c   :  { %7557 = vmatpush3.msra.mxu1 %v1619_v18  ;;  %v6707_v18 = vld [vmem:[%s11002_s5 + $0x20] sm:$0xff] }
 0x78d   :  { %7614 = vmatprep.subr.mxu1 %v8558_v1 }
 0x7f9   :  { %v1431_v19 = vpop.xlane.xlu0 %1430 }
 0x7fa   :  { %v1438_v20 = vmul.f32 0.03125, %v1431_v19 }
 0x7fb   :  { %v1446_v21 = vpop.xlane.xlu1 %1445 }
 0x7fc   :  { %v1456_v22 = vmul.f32 %v1438_v20, %v1438_v20  ;;  %v1453_v24 = vmul.f32 0.03125, %v1446_v21  ;;  %v1462_v40 = vsub.f32 %v9118_v60, %v1438_v20 }
 0x7fe   :  { %v1459_v26 = vsub.f32 %v1453_v24, %v1456_v22  ;;  %v1434_v32 = vpop.xlane.xlu0 %1433 }
 0x7ff   :  { %v1439_v33 = vmul.f32 0.03125, %v1434_v32 }
 0x800   :  { %v1465_v34 = vadd.f32 1e-06, %v1459_v26 }
 0x801   :  { %v1457_v36 = vmul.f32 %v1439_v33, %v1439_v33  ;;  %v1463_v50 = vsub.f32 %v9126_v5, %v1439_v33 }
 0x802   :  { %8312 = vrsqrt.f32 %v1465_v34  ;;  %v1449_v35 = vpop.xlane.xlu0 %1448 }
 0x803   :  { %v1454_v37 = vmul.f32 0.03125, %v1449_v35 }
 0x805   :  { %v1460_v38 = vsub.f32 %v1454_v37, %v1457_v36 }
 0x806   :  { %v1437_v28 = vpop.xlane.xlu0 %1436 }
 0x807   :  { %v1466_v23 = vadd.f32 1e-06, %v1460_v38  ;;  %v1440_v30 = vmul.f32 0.03125, %v1437_v28  ;;  %v1452_v13 = vpop.xlane.xlu1 %1451 }
 0x808   :  { %v1455_v39 = vmul.f32 0.03125, %v1452_v13 }
 0x809   :  { %8314 = vrsqrt.f32 %v1466_v23  ;;  %v1458_v41 = vmul.f32 %v1440_v30, %v1440_v30  ;;  %v1464_v53 = vsub.f32 %v9134_v11, %v1440_v30 }
 0x80b   :  { %v1461_v43 = vsub.f32 %v1455_v39, %v1458_v41 }
 0x80d   :  { %v1467_v44 = vadd.f32 1e-06, %v1461_v43 }
 0x80f   :  { %v8313_v45 = vpop.eup %8312  ;;  %8316 = vrsqrt.f32 %v1467_v44 }
 0x810   :  { %v1471_v47 = vmul.f32 %v8313_v45, %v1462_v40 }
 0x812   :  { %v1480_v49 = vmul.f32 %v6696_v46, %v1471_v47 }
 0x814   :  { %v1489_v42 = vadd.f32 %v6697_v48, %v1480_v49 }
 0x816   :  { %v8315_v51 = vpop.eup %8314  ;;  %7518 = vmatmul.mubr.msk.f32.vlgmr.msra.gmra.mxu0 %vm166_vm2, %v1489_v42 }
 0x817   :  { %7520 = vmatprep.mubr.msk.f32.mxu0 %vm8559_vm0, %v8558_v1  ;;  %v1472_v31 = vmul.f32 %v8315_v51, %v1463_v50  ;;  %7568 = vmatpush3.msra.mxu0 %v6710_v9 }
 0x818   :  { %7569 = vmatprep.subr.mxu0 %v8558_v1 }
 0x819   :  { %v1481_v52 = vmul.f32 %v6696_v46, %v1472_v31 }
 0x81b   :  { %v1490_v54 = vadd.f32 %v6697_v48, %v1481_v52  ;;  %v6702_v52 = vld [vmem:[%s11011_s14] ss:$0 sm:$0xff] }
 0x81c   :  { %v8317_v27 = vpop.eup %8316 }
 0x81d   :  { %7521 = vmatmul.mubr.msk.f32.gmra.mxu0 %vm166_vm2, %v1490_v54  ;;  %v1473_v55 = vmul.f32 %v8317_v27, %v1464_v53 }
 0x81e   :  { %7523 = vmatprep.mubr.msk.f32.mxu0 %vm8559_vm0, %v8558_v1 }
 0x81f   :  { %v1482_v29 = vmul.f32 %v6696_v46, %v1473_v55 }
 0x821   :  { %v1491_v56 = vadd.f32 %v6697_v48, %v1482_v29 }
 0x823   :  { %7524 = vmatmul.mubr.msk.f32.gmra.mxu0 %vm166_vm2, %v1491_v56 }
 0x824   :  { %7575 = vmatprep.mubr.msk.f32.mxu0 %vm8559_vm0, %v8558_v1 }
 0x8d6   :  { %v1578_v14 = vpop.f32.mrf.mxu0 }
 0x8d7   :  { %v1579_v15 = vadd.f32 %v6698_v63, %v1578_v14 }
 0x8d8   :  { %v7519_v25 = vpop.f32.mrf.mxu0 }
 0x8d9   :  { %v1595_v16 = vmul.f32 %v1579_v15, %v1579_v15  ;;  %v1592_v44 = vmul.f32 0.5, %v1579_v15 }
 0x8db   :  { %v1598_v17 = vmul.f32 %v1595_v16, %v1579_v15 }
 0x8dd   :  { %v1601_v19 = vmul.f32 0.044715, %v1598_v17  ;;  %v1583_v20 = vpop.f32.mrf.mxu0 }
 0x8de   :  { %v1584_v21 = vadd.f32 %v6698_v63, %v1583_v20 }
 0x8df   :  { %v1604_v22 = vadd.f32 %v1601_v19, %v1579_v15  ;;  %v7522_v24 = vpop.f32.mrf.mxu0 }
 0x8e0   :  { %v1596_v26 = vmul.f32 %v1584_v21, %v1584_v21  ;;  %v1593_v47 = vmul.f32 0.5, %v1584_v21 }
 0x8e1   :  { %v1607_v32 = vmul.f32 0.7978846, %v1604_v22 }
 0x8e2   :  { %v1599_v33 = vmul.f32 %v1596_v26, %v1584_v21 }
 0x8e3   :  { %8318 = vtanh.f32 %v1607_v32  ;;  %v1588_v34 = vpop.f32.mrf.mxu0 }
 0x8e4   :  { %v1602_v35 = vmul.f32 0.044715, %v1599_v33  ;;  %v1589_v36 = vadd.f32 %v6698_v63, %v1588_v34 }
 0x8e5   :  { %v7525_v37 = vpop.f32.mrf.mxu0 }
 0x8e6   :  { %v1605_v38 = vadd.f32 %v1602_v35, %v1584_v21  ;;  %v1597_v28 = vmul.f32 %v1589_v36, %v1589_v36  ;;  %v1594_v50 = vmul.f32 0.5, %v1589_v36 }
 0x8e8   :  { %v1608_v23 = vmul.f32 0.7978846, %v1605_v38  ;;  %v1600_v30 = vmul.f32 %v1597_v28, %v1589_v36 }
 0x8ea   :  { %v1603_v13 = vmul.f32 0.044715, %v1600_v30  ;;  %8320 = vtanh.f32 %v1608_v23 }
 0x8ec   :  { %v1606_v39 = vadd.f32 %v1603_v13, %v1589_v36 }
 0x8ee   :  { %v1609_v41 = vmul.f32 0.7978846, %v1606_v39  ;;  %v6705_v39 = vld [vmem:[%s11000_s3 + $0x1] ss:$0 sm:$0xff] }
 0x8f0   :  { %v8319_v43 = vpop.eup %8318  ;;  %8322 = vtanh.f32 %v1609_v41 }
 0x8f1   :  { %v1613_v40 = vadd.f32 1.0, %v8319_v43  ;;  %v6706_v43 = vld [vmem:[%s11001_s4 + $0x1] ss:$0 sm:$0xff] }
 0x8f3   :  { %v1616_v45 = vmul.f32 %v1613_v40, %v1592_v44 }
 0x8f5   :  { %7559 = vmatmul.mubr.f32.vlgmr.msra.gmra.mxu1 %v1616_v45 }
 0x8f6   :  { %7561 = vmatprep.mubr.msk.f32.mxu1 %vm8559_vm0, %v8558_v1 }
 0x8f7   :  { %v8321_v46 = vpop.eup %8320 }
 0x8f8   :  { %v1614_v48 = vadd.f32 1.0, %v8321_v46 }
 0x8fa   :  { %v1617_v49 = vmul.f32 %v1614_v48, %v1593_v47 }
 0x8fc   :  { %7562 = vmatmul.mubr.f32.gmra.mxu1 %v1617_v49 }
 0x8fd   :  { %v8323_v42 = vpop.eup %8322  ;;  %7564 = vmatprep.mubr.msk.f32.mxu1 %vm8559_vm0, %v8558_v1 }
 0x8fe   :  { %v1615_v51 = vadd.f32 1.0, %v8323_v42 }
 0x900   :  { %v1618_v31 = vmul.f32 %v1615_v51, %v1594_v50 }
 0x902   :  { %7565 = vmatmul.mubr.f32.gmra.mxu1 %v1618_v31 }
 0x903   :  { %7620 = vmatprep.mubr.msk.f32.mxu1 %vm8559_vm0, %v8558_v1 }
 0x9b5   :  { %v1708_v53 = vpop.f32.mrf.mxu1 }
 0x9b6   :  { %v1709_v54 = vadd.f32 %v6702_v52, %v1708_v53 }
 0x9b7   :  { %v7560_v27 = vpop.f32.mrf.mxu1 }
 0x9b8   :  { %v9252_v55 = vadd.f32 %v1709_v54, %v9118_v60  ;;  %v6712_v27 = vld [vmem:[%s11003_s6 + $0x1] ss:$0 sm:$0xff] }
 0x9ba   :  { %v1729_v29 = vsel %vm166_vm2, %v9252_v55, 0.0  ;;  %v1741_v56 = vmul.f32 %v9252_v55, %v9252_v55 }
 0x9bb   :  { %1730 = vadd.xlane.f32.xlu0 %v1729_v29 }
 0x9bc   :  { %v1713_v57 = vpop.f32.mrf.mxu1  ;;  %v1744_v58 = vsel %vm166_vm2, %v1741_v56, 0.0 }
 0x9bd   :  { %v1714_v59 = vadd.f32 %v6702_v52, %v1713_v57  ;;  %1745 = vadd.xlane.f32.xlu1 %v1744_v58 }
 0x9be   :  { %v7563_v62 = vpop.f32.mrf.mxu1 }
 0x9bf   :  { %v9260_v0 = vadd.f32 %v1714_v59, %v9126_v5 }
 0x9c1   :  { %v1732_v60 = vsel %vm166_vm2, %v9260_v0, 0.0  ;;  %v1742_v2 = vmul.f32 %v9260_v0, %v9260_v0 }
 0x9c2   :  { %1733 = vadd.xlane.f32.xlu0 %v1732_v60  ;;  %v1718_v61 = vpop.f32.mrf.mxu1 }
 0x9c3   :  { %v1719_v3 = vadd.f32 %v6702_v52, %v1718_v61  ;;  %v1747_v4 = vsel %vm166_vm2, %v1742_v2, 0.0 }
 0x9c4   :  { %1748 = vadd.xlane.f32.xlu1 %v1747_v4  ;;  %v7566_v12 = vpop.f32.mrf.mxu1 }
 0x9c5   :  { %v9268_v7 = vadd.f32 %v1719_v3, %v9134_v11  ;;  %v6709_v11 = vld [vmem:[%s11002_s5 + $0x30] sm:$0xff] }
 0x9c6   :  { %7570 = vmatpush3.msra.mxu0 %v6709_v11 }
 0x9c7   :  { %v1735_v5 = vsel %vm173_vm3, %v9268_v7, 0.0  ;;  %v1743_v8 = vmul.f32 %v9268_v7, %v9268_v7  ;;  %7571 = vmatprep.subr.mxu0 %v8558_v1 }
 0x9c8   :  { %1736 = vadd.xlane.f32.xlu0 %v1735_v5  ;;  %7572 = vmatpush3.msra.mxu0 %v6708_v10 }
 0x9c9   :  { %v1750_v6 = vsel %vm173_vm3, %v1743_v8, 0.0  ;;  %7573 = vmatprep.subr.mxu0 %v8558_v1 }
 0x9ca   :  { %1751 = vadd.xlane.f32.xlu1 %v1750_v6  ;;  %7574 = vmatpush3.msra.mxu0 %v6707_v18 }
 0x9cb   :  { %7584 = vmatprep.subr.mxu0 %v8558_v1 }
 0xa44   :  { %v1731_v63 = vpop.xlane.xlu0 %1730 }
 0xa45   :  { %v1738_v14 = vmul.f32 0.03125, %v1731_v63 }
 0xa46   :  { %v1746_v15 = vpop.xlane.xlu1 %1745 }
 0xa47   :  { %v1756_v25 = vmul.f32 %v1738_v14, %v1738_v14  ;;  %v1753_v16 = vmul.f32 0.03125, %v1746_v15  ;;  %v1762_v30 = vsub.f32 %v9252_v55, %v1738_v14 }
 0xa49   :  { %v1759_v17 = vsub.f32 %v1753_v16, %v1756_v25 }
 0xa4b   :  { %v1765_v19 = vadd.f32 1e-06, %v1759_v17  ;;  %v1734_v20 = vpop.xlane.xlu0 %1733 }
 0xa4c   :  { %v1739_v21 = vmul.f32 0.03125, %v1734_v20 }
 0xa4d   :  { %8324 = vrsqrt.f32 %v1765_v19  ;;  %v1749_v22 = vpop.xlane.xlu1 %1748 }
 0xa4e   :  { %v1757_v24 = vmul.f32 %v1739_v21, %v1739_v21  ;;  %v1754_v26 = vmul.f32 0.03125, %v1749_v22  ;;  %v1763_v45 = vsub.f32 %v9260_v0, %v1739_v21 }
 0xa50   :  { %v1760_v32 = vsub.f32 %v1754_v26, %v1757_v24 }
 0xa51   :  { %v1737_v33 = vpop.xlane.xlu0 %1736 }
 0xa52   :  { %v1766_v34 = vadd.f32 1e-06, %v1760_v32  ;;  %v1740_v35 = vmul.f32 0.03125, %v1737_v33 }
 0xa53   :  { %v1752_v36 = vpop.xlane.xlu1 %1751 }
 0xa54   :  { %8326 = vrsqrt.f32 %v1766_v34  ;;  %v1758_v37 = vmul.f32 %v1740_v35, %v1740_v35  ;;  %v1755_v38 = vmul.f32 0.03125, %v1752_v36  ;;  %v1764_v49 = vsub.f32 %v9268_v7, %v1740_v35 }
 0xa56   :  { %v1761_v28 = vsub.f32 %v1755_v38, %v1758_v37 }
 0xa58   :  { %v1767_v23 = vadd.f32 1e-06, %v1761_v28 }
 0xa5a   :  { %v8325_v13 = vpop.eup %8324  ;;  %8328 = vrsqrt.f32 %v1767_v23 }
 0xa5b   :  { %v1771_v41 = vmul.f32 %v8325_v13, %v1762_v30 }
 0xa5d   :  { %v1780_v44 = vmul.f32 %v6705_v39, %v1771_v41 }
 0xa5f   :  { %v1789_v40 = vadd.f32 %v6706_v43, %v1780_v44 }
 0xa61   :  { %v8327_v46 = vpop.eup %8326  ;;  %7576 = vmatmul.mubr.msk.f32.vlgmr.msra.gmra.mxu0 %vm166_vm2, %v1789_v40 }
 0xa62   :  { %7578 = vmatprep.mubr.msk.f32.mxu0 %vm8559_vm0, %v8558_v1  ;;  %v1772_v47 = vmul.f32 %v8327_v46, %v1763_v45 }
 0xa64   :  { %v1781_v48 = vmul.f32 %v6705_v39, %v1772_v47 }
 0xa66   :  { %v1790_v42 = vadd.f32 %v6706_v43, %v1781_v48 }
 0xa67   :  { %v8329_v50 = vpop.eup %8328 }
 0xa68   :  { %7579 = vmatmul.mubr.msk.f32.gmra.mxu0 %vm166_vm2, %v1790_v42  ;;  %v1773_v51 = vmul.f32 %v8329_v50, %v1764_v49 }
 0xa69   :  { %7581 = vmatprep.mubr.msk.f32.mxu0 %vm8559_vm0, %v8558_v1 }
 0xa6a   :  { %v1782_v31 = vmul.f32 %v6705_v39, %v1773_v51 }
 0xa6c   :  { %v1791_v52 = vadd.f32 %v6706_v43, %v1782_v31 }
 0xa6e   :  { %7582 = vmatmul.mubr.msk.f32.gmra.mxu0 %vm166_vm2, %v1791_v52 }
 0xa6f   :  { %7590 = vmatprep.mubr.msk.f32.mxu0 %vm8559_vm0, %v8558_v1 }
 0xb21   :  { %v1880_v53 = vpop.f32.mrf.mxu0 }
 0xb22   :  { %v9316_v58 = vadd.f32 %v6712_v27, %v1880_v53 }
 0xb23   :  { %v7577_v54 = vpop.f32.mrf.mxu0 }
 0xb28   :  { %v1885_v29 = vpop.f32.mrf.mxu0 }
 0xb29   :  { %v9312_v56 = vadd.f32 %v6712_v27, %v1885_v29 }
 0xb2a   :  { %v7580_v57 = vpop.f32.mrf.mxu0 }
 0xb2b   :  { %1899 = vrot.lane.b32.xlu1 %v9312_v56, %s8560_s22 }
 0xb2e   :  { %v1890_v59 = vpop.f32.mrf.mxu0 }
 0xb2f   :  { %v9318_v62 = vadd.f32 %v6712_v27, %v1890_v59  ;;  %1897 = vrot.lane.b32.xlu1 %v9316_v58, %s8560_s22 }
 0xb30   :  { %v7583_v60 = vpop.f32.mrf.mxu0 }
 0xb31   :  { %1901 = vrot.lane.b32.xlu0 %v9318_v62, %s8560_s22 }
 0xb33   :  { %1907 = vrot.lane.b32.xlu1 %v9318_v62, %s8561_s23 }
 0xb35   :  { %1913 = vrot.lane.b32.xlu0 %v9318_v62, %s11027_s25 }
 0xb37   :  { %1905 = vrot.lane.b32.xlu1 %v9312_v56, %s8561_s23 }
 0xb39   :  { %1911 = vrot.lane.b32.xlu0 %v9312_v56, %s11027_s25 }
 0xb3b   :  { %1903 = vrot.lane.b32.xlu1 %v9316_v58, %s8561_s23 }
 0xb3d   :  { %1909 = vrot.lane.b32.xlu0 %v9316_v58, %s11027_s25 }
 0xb3f   :  { %1919 = vrot.lane.b32.xlu1 %v9318_v62, %s11025_s27 }
 0xb41   :  { %1917 = vrot.lane.b32.xlu0 %v9312_v56, %s11025_s27 }
 0xb43   :  { %1915 = vrot.lane.b32.xlu1 %v9316_v58, %s11025_s27 }
 0xb9d   :  { %v9342_v2 = vpop.permute.xlu1 %1899 }
 0xb9e   :  { %2015 = vrot.lane.b32.xlu1 %v9342_v2, %s11025_s27 }
 0xba1   :  { %v9346_v61 = vpop.permute.xlu1 %1897 }
 0xba3   :  { %v9348_v3 = vpop.permute.xlu0 %1901 }
 0xba4   :  { %2017 = vrot.lane.b32.xlu0 %v9348_v3, %s11025_s27 }
 0xba5   :  { %v9352_v4 = vpop.permute.xlu1 %1907 }
 0xba6   :  { %2115 = vrot.lane.b32.xlu1 %v9352_v4, %s11025_s27 }
 0xba7   :  { %v9356_v12 = vpop.permute.xlu0 %1913 }
 0xba8   :  { %2013 = vrot.lane.b32.xlu0 %v9346_v61, %s11025_s27 }
 0xba9   :  { %v9360_v5 = vpop.permute.xlu1 %1905 }
 0xbaa   :  { %2113 = vrot.lane.b32.xlu1 %v9360_v5, %s11025_s27 }
 0xbab   :  { %v9364_v8 = vpop.permute.xlu0 %1911 }
 0xbac   :  { %2213 = vrot.lane.b32.xlu0 %v9356_v12, %s11025_s27 }
 0xbad   :  { %v9368_v6 = vpop.permute.xlu1 %1903 }
 0xbae   :  { %2111 = vrot.lane.b32.xlu1 %v9368_v6, %s11025_s27 }
 0xbaf   :  { %v9372_v9 = vpop.permute.xlu0 %1909 }
 0xbb0   :  { %2211 = vrot.lane.b32.xlu0 %v9364_v8, %s11025_s27 }
 0xbb1   :  { %v1920_v11 = vpop.permute.xlu1 %1919 }
 0xbb2   :  { %7585 = vmatpush3.xpose.msk.msra.mxu0 %vm359_vm4, %v1920_v11 }
 0xbb3   :  { %7586 = vmatprep.subr.mxu0 %v8558_v1  ;;  %v1918_v10 = vpop.permute.xlu0 %1917 }
 0xbb4   :  { %2209 = vrot.lane.b32.xlu0 %v9372_v9, %s11025_s27 }
 0xbb5   :  { %v1916_v18 = vpop.permute.xlu1 %1915 }
 0xbb6   :  { %7587 = vmatpush3.xpose.msk.msra.mxu0 %vm359_vm4, %v1918_v10 }
 0xbb7   :  { %7588 = vmatprep.subr.mxu0 %v8558_v1 }
 0xbba   :  { %7589 = vmatpush3.xpose.msk.msra.mxu0 %vm359_vm4, %v1916_v18 }
 0xbbb   :  { %7599 = vmatprep.subr.mxu0 %v8558_v1 }
 0xbbd   :  { %7591 = vmatmul.mubr.msk.f32.vlgmr.msra.gmra.mxu0 %vm359_vm4, %v9316_v58 }
 0xbbe   :  { %7593 = vmatprep.mubr.msk.f32.mxu0 %vm8559_vm0, %v8558_v1 }
 0xbc1   :  { %7594 = vmatmul.mubr.msk.f32.gmra.mxu0 %vm359_vm4, %v9312_v56 }
 0xbc2   :  { %7596 = vmatprep.mubr.msk.f32.mxu0 %vm8559_vm0, %v8558_v1 }
 0xbc5   :  { %7597 = vmatmul.mubr.msk.f32.gmra.mxu0 %vm359_vm4, %v9318_v62 }
 0xbc6   :  { %7605 = vmatprep.mubr.msk.f32.mxu0 %vm8559_vm0, %v8558_v1 }
 0xc10   :  { %v2016_v63 = vpop.permute.xlu1 %2015 }
 0xc16   :  { %v2018_v14 = vpop.permute.xlu0 %2017 }
 0xc17   :  { %7600 = vmatpush3.xpose.msk.msra.mxu0 %vm359_vm4, %v2018_v14 }
 0xc18   :  { %v2116_v15 = vpop.permute.xlu1 %2115  ;;  %7601 = vmatprep.subr.mxu0 %v8558_v1 }
 0xc19   :  { %7615 = vmatpush3.xpose.msk.msra.mxu1 %vm359_vm4, %v2116_v15 }
 0xc1a   :  { %v2014_v25 = vpop.permute.xlu0 %2013  ;;  %7616 = vmatprep.subr.mxu1 %v8558_v1 }
 0xc1b   :  { %7602 = vmatpush3.xpose.msk.msra.mxu0 %vm359_vm4, %v2016_v63 }
 0xc1c   :  { %v2114_v16 = vpop.permute.xlu1 %2113  ;;  %7603 = vmatprep.subr.mxu0 %v8558_v1 }
 0xc1d   :  { %7617 = vmatpush3.xpose.msk.msra.mxu1 %vm359_vm4, %v2114_v16 }
 0xc1e   :  { %v2214_v17 = vpop.permute.xlu0 %2213  ;;  %7618 = vmatprep.subr.mxu1 %v8558_v1 }
 0xc1f   :  { %7604 = vmatpush3.xpose.msk.msra.mxu0 %vm359_vm4, %v2014_v25 }
 0xc20   :  { %v2112_v19 = vpop.permute.xlu1 %2111  ;;  %7629 = vmatprep.subr.mxu0 %v8558_v1 }
 0xc21   :  { %7619 = vmatpush3.xpose.msk.msra.mxu1 %vm359_vm4, %v2112_v19 }
 0xc22   :  { %7606 = vmatmul.mubr.msk.f32.vlgmr.msra.gmra.mxu0 %vm359_vm4, %v9346_v61  ;;  %7644 = vmatprep.subr.mxu1 %v8558_v1  ;;  %v2212_v20 = vpop.permute.xlu0 %2211 }
 0xc23   :  { %7630 = vmatpush3.xpose.msk.msra.mxu0 %vm359_vm4, %v2214_v17  ;;  %7608 = vmatprep.mubr.msk.f32.mxu0 %vm8559_vm0, %v8558_v1 }
 0xc24   :  { %7621 = vmatmul.mubr.msk.f32.vlgmr.msra.gmra.mxu1 %vm359_vm4, %v9368_v6  ;;  %7631 = vmatprep.subr.mxu0 %v8558_v1 }
 0xc25   :  { %7623 = vmatprep.mubr.msk.f32.mxu1 %vm8559_vm0, %v8558_v1 }
 0xc26   :  { %7609 = vmatmul.mubr.msk.f32.gmra.mxu0 %vm359_vm4, %v9342_v2  ;;  %v2210_v21 = vpop.permute.xlu0 %2209 }
 0xc27   :  { %7632 = vmatpush3.xpose.msk.msra.mxu0 %vm359_vm4, %v2212_v20  ;;  %7611 = vmatprep.mubr.msk.f32.mxu0 %vm8559_vm0, %v8558_v1 }
 0xc28   :  { %7624 = vmatmul.mubr.msk.f32.gmra.mxu1 %vm359_vm4, %v9360_v5  ;;  %7633 = vmatprep.subr.mxu0 %v8558_v1 }
 0xc29   :  { %7626 = vmatprep.mubr.msk.f32.mxu1 %vm8559_vm0, %v8558_v1 }
 0xc2a   :  { %7612 = vmatmul.mubr.msk.f32.gmra.mxu0 %vm359_vm4, %v9348_v3 }
 0xc2b   :  { %7634 = vmatpush3.xpose.msk.msra.mxu0 %vm359_vm4, %v2210_v21  ;;  %7635 = vmatprep.mubr.msk.f32.mxu0 %vm8559_vm0, %v8558_v1 }
 0xc2c   :  { %7627 = vmatmul.mubr.msk.f32.gmra.mxu1 %vm359_vm4, %v9352_v4  ;;  %7659 = vmatprep.subr.mxu0 %v8558_v1 }
 0xc2d   :  { %7650 = vmatprep.mubr.msk.f32.mxu1 %vm8559_vm0, %v8558_v1 }
 0xc2e   :  { %7636 = vmatmul.mubr.msk.f32.vlgmr.msra.gmra.mxu0 %vm359_vm4, %v9372_v9 }
 0xc2f   :  { %7638 = vmatprep.mubr.msk.f32.mxu0 %vm8559_vm0, %v8558_v1 }
 0xc32   :  { %7639 = vmatmul.mubr.msk.f32.gmra.mxu0 %vm359_vm4, %v9364_v8 }
 0xc33   :  { %7641 = vmatprep.mubr.msk.f32.mxu0 %vm8559_vm0, %v8558_v1 }
 0xc36   :  { %7642 = vmatmul.mubr.msk.f32.gmra.mxu0 %vm359_vm4, %v9356_v12 }
 0xc37   :  { %7665 = vmatprep.mubr.msk.f32.mxu0 %vm8559_vm0, %v8558_v1 }
 0xc7d   :  { %v1999_v22 = vpop.f32.mrf.mxu0 }
 0xc7e   :  { %v2307_v24 = vsel %vm746_vm6, %v1999_v22, -inf }
 0xc7f   :  { %2308 = vmax.xlane.f32.xlu1 %v2307_v24  ;;  %v7592_v26 = vpop.f32.mrf.mxu0 }
 0xc81   :  { %v2004_v32 = vpop.f32.mrf.mxu0 }
 0xc82   :  { %v2310_v33 = vsel %vm746_vm6, %v2004_v32, -inf }
 0xc83   :  { %2311 = vmax.xlane.f32.xlu0 %v2310_v33  ;;  %v7595_v34 = vpop.f32.mrf.mxu0 }
 0xc85   :  { %v2009_v35 = vpop.f32.mrf.mxu0 }
 0xc86   :  { %v2313_v36 = vsel %vm753_vm7, %v2009_v35, -inf }
 0xc87   :  { %2314 = vmax.xlane.f32.xlu1 %v2313_v36  ;;  %v7598_v37 = vpop.f32.mrf.mxu0 }
 0xce2   :  { %v2097_v38 = vpop.f32.mrf.mxu0 }
 0xce3   :  { %v2316_v28 = vsel %vm746_vm6, %v2097_v38, -inf }
 0xce4   :  { %v9454_v23 = vpop.f32.mrf.mxu1  ;;  %2317 = vmax.xlane.f32.xlu0 %v2316_v28  ;;  %v7607_v30 = vpop.f32.mrf.mxu0 }
 0xce5   :  { %v2325_v13 = vsel %vm746_vm6, %v9454_v23, -inf }
 0xce6   :  { %v7622_v39 = vpop.f32.mrf.mxu1  ;;  %2326 = vmax.xlane.f32.xlu1 %v2325_v13  ;;  %v2102_v41 = vpop.f32.mrf.mxu0 }
 0xce7   :  { %v2319_v43 = vsel %vm746_vm6, %v2102_v41, -inf }
 0xce8   :  { %v9459_v44 = vpop.f32.mrf.mxu1  ;;  %2320 = vmax.xlane.f32.xlu0 %v2319_v43  ;;  %v7610_v40 = vpop.f32.mrf.mxu0 }
 0xcea   :  { %v9461_v45 = vpop.f32.mrf.mxu0  ;;  %v7625_v46 = vpop.f32.mrf.mxu1 }
 0xceb   :  { %v2322_v47 = vsel %vm753_vm7, %v9461_v45, -inf }
 0xcec   :  { %v9465_v48 = vpop.f32.mrf.mxu1  ;;  %2323 = vmax.xlane.f32.xlu0 %v2322_v47  ;;  %v7613_v49 = vpop.f32.mrf.mxu0 }
 0xcee   :  { %v7628_v42 = vpop.f32.mrf.mxu1  ;;  %v9467_v50 = vpop.f32.mrf.mxu0 }
 0xcef   :  { %v2334_v51 = vsel %vm746_vm6, %v9467_v50, -inf  ;;  %v2328_v42 = vsel %vm746_vm6, %v9459_v44, -inf }
 0xcf0   :  { %2335 = vmax.xlane.f32.xlu0 %v2334_v51  ;;  %v7637_v31 = vpop.f32.mrf.mxu0 }
 0xcf2   :  { %v9471_v52 = vpop.f32.mrf.mxu0 }
 0xcf4   :  { %v7640_v53 = vpop.f32.mrf.mxu0 }
 0xcf5   :  { %v2331_v53 = vsel %vm753_vm7, %v9465_v48, -inf }
 0xcf6   :  { %v9473_v54 = vpop.f32.mrf.mxu0 }
 0xcf7   :  { %2443 = vrot.lane.b32.xlu1 %v9318_v62, %s11023_s28 }
 0xcf8   :  { %v7643_v27 = vpop.f32.mrf.mxu0 }
 0xcfb   :  { %2441 = vrot.lane.b32.xlu1 %v9312_v56, %s11023_s28 }
 0xcff   :  { %2540 = vrot.lane.b32.xlu1 %v9342_v2, %s11023_s28 }
 0xd03   :  { %2439 = vrot.lane.b32.xlu1 %v9316_v58, %s11023_s28 }
 0xd06   :  { %2542 = vrot.lane.b32.xlu0 %v9348_v3, %s11023_s28 }
 0xd07   :  { %2641 = vrot.lane.b32.xlu1 %v9352_v4, %s11023_s28 }
 0xd08   :  { %v2309_v29 = vpop.xlane.xlu1 %2308 }
 0xd09   :  { %v2343_v56 = vsub.f32 %v1999_v22, %v2309_v29 }
 0xd0a   :  { %2538 = vrot.lane.b32.xlu0 %v9346_v61, %s11023_s28 }
 0xd0b   :  { %2639 = vrot.lane.b32.xlu1 %v9360_v5, %s11023_s28  ;;  %v2355_v58 = vmul.f32 1.442695, %v2343_v56 }
 0xd0c   :  { %v2312_v57 = vpop.xlane.xlu0 %2311 }
 0xd0d   :  { %v2344_v59 = vsub.f32 %v2004_v32, %v2312_v57  ;;  %8330 = vpow2.f32 %v2355_v58 }
 0xd0e   :  { %2740 = vrot.lane.b32.xlu0 %v9356_v12, %s11023_s28 }
 0xd0f   :  { %v2357_v60 = vmul.f32 1.442695, %v2344_v59 }
 0xd10   :  { %v2315_v62 = vpop.xlane.xlu1 %2314 }
 0xd11   :  { %v2345_v2 = vsub.f32 %v2009_v35, %v2315_v62  ;;  %8332 = vpow2.f32 %v2357_v60 }
 0xd12   :  { %2738 = vrot.lane.b32.xlu0 %v9364_v8, %s11023_s28 }
 0xd13   :  { %v2359_v61 = vmul.f32 1.442695, %v2345_v2 }
 0xd15   :  { %8334 = vpow2.f32 %v2359_v61 }
 0xd1a   :  { %v9495_v3 = vpop.eup %8330 }
 0xd1b   :  { %v2379_v4 = vsel %vm746_vm6, %v9495_v3, 0.0 }
 0xd1e   :  { %v9499_v12 = vpop.eup %8332 }
 0xd1f   :  { %v2382_v5 = vsel %vm746_vm6, %v9499_v12, 0.0 }
 0xd22   :  { %v9503_v8 = vpop.eup %8334 }
 0xd23   :  { %v2385_v11 = vsel %vm753_vm7, %v9503_v8, 0.0 }
 0xd2f   :  { %2380 = vadd.xlane.f32.xlu1 %v2379_v4 }
 0xd33   :  { %2383 = vadd.xlane.f32.xlu1 %v2382_v5 }
 0xd37   :  { %2386 = vadd.xlane.f32.xlu1 %v2385_v11 }
 0xd6d   :  { %v2318_v10 = vpop.xlane.xlu0 %2317 }
 0xd6e   :  { %v2346_v18 = vsub.f32 %v2097_v38, %v2318_v10 }
 0xd6f   :  { %v2327_v63 = vpop.xlane.xlu1 %2326 }
 0xd70   :  { %v2361_v14 = vmul.f32 1.442695, %v2346_v18  ;;  %v2349_v15 = vsub.f32 %v9454_v23, %v2327_v63 }
 0xd71   :  { %v2321_v25 = vpop.xlane.xlu0 %2320 }
 0xd72   :  { %8336 = vpow2.f32 %v2361_v14  ;;  %v2367_v16 = vmul.f32 1.442695, %v2349_v15  ;;  %v2347_v17 = vsub.f32 %v2102_v41, %v2321_v25 }
 0xd73   :  { %v2444_v19 = vpop.permute.xlu1 %2443 }
 0xd74   :  { %8338 = vpow2.f32 %v2367_v16  ;;  %v2363_v20 = vmul.f32 1.442695, %v2347_v17  ;;  %7645 = vmatpush3.msk.msra.mxu1 %vm897_vm5, %v2444_v19 }
 0xd75   :  { %v2324_v21 = vpop.xlane.xlu0 %2323  ;;  %7646 = vmatprep.subr.mxu1 %v8558_v1 }
 0xd76   :  { %8340 = vpow2.f32 %v2363_v20  ;;  %v2348_v22 = vsub.f32 %v9461_v45, %v2324_v21 }
 0xd77   :  { %v2442_v24 = vpop.permute.xlu1 %2441 }
 0xd78   :  { %v2365_v26 = vmul.f32 1.442695, %v2348_v22  ;;  %7647 = vmatpush3.msra.mxu1 %v2442_v24 }
 0xd79   :  { %v2336_v32 = vpop.xlane.xlu0 %2335  ;;  %7648 = vmatprep.subr.mxu1 %v8558_v1 }
 0xd7a   :  { %8342 = vpow2.f32 %v2365_v26  ;;  %v2352_v33 = vsub.f32 %v9467_v50, %v2336_v32 }
 0xd7b   :  { %v2541_v34 = vpop.permute.xlu1 %2540 }
 0xd7c   :  { %v2373_v35 = vmul.f32 1.442695, %v2352_v33 }
 0xd7d   :  { %v2543_v36 = vpop.permute.xlu0 %2542 }
 0xd7e   :  { %8344 = vpow2.f32 %v2373_v35  ;;  %7660 = vmatpush3.msk.msra.mxu0 %vm897_vm5, %v2543_v36 }
 0xd7f   :  { %v9514_v37 = vpop.eup %8336  ;;  %v2440_v38 = vpop.permute.xlu1 %2439  ;;  %7661 = vmatprep.subr.mxu0 %v8558_v1 }
 0xd80   :  { %7649 = vmatpush3.msra.mxu1 %v2440_v38  ;;  %7662 = vmatpush3.msra.mxu0 %v2541_v34  ;;  %v2388_v28 = vsel %vm746_vm6, %v9514_v37, 0.0 }
 0xd81   :  { %v9519_v23 = vpop.eup %8338  ;;  %2389 = vadd.xlane.f32.xlu0 %v2388_v28  ;;  %7663 = vmatprep.subr.mxu0 %v8558_v1  ;;  %v2539_v30 = vpop.permute.xlu0 %2538 }
 0xd82   :  { %7664 = vmatpush3.msra.mxu0 %v2539_v30  ;;  %v2397_v13 = vsel %vm746_vm6, %v9519_v23, 0.0  ;;  %7674 = vmatprep.subr.mxu1 %v8558_v1  ;;  %v6757_v30 = vld [vmem:[%s11004_s7 + $0x28] sm:$0xff] }
 0xd83   :  { %v9525_v39 = vpop.eup %8340  ;;  %2398 = vadd.xlane.f32.xlu1 %v2397_v13  ;;  %7689 = vmatprep.subr.mxu0 %v8558_v1  ;;  %v2642_v47 = vpop.permute.xlu1 %2641 }
 0xd84   :  { %v2391_v41 = vsel %vm746_vm6, %v9525_v39, 0.0 }
 0xd85   :  { %2392 = vadd.xlane.f32.xlu0 %v2391_v41  ;;  %v2741_v58 = vpop.permute.xlu0 %2740 }
 0xd87   :  { %v9530_v43 = vpop.eup %8342  ;;  %v2640_v49 = vpop.permute.xlu1 %2639 }
 0xd88   :  { %v2394_v40 = vsel %vm753_vm7, %v9530_v43, 0.0 }
 0xd89   :  { %2395 = vadd.xlane.f32.xlu0 %v2394_v40  ;;  %v2739_v59 = vpop.permute.xlu0 %2738 }
 0xd8b   :  { %v9534_v45 = vpop.eup %8344 }
 0xd8c   :  { %v2406_v46 = vsel %vm746_vm6, %v9534_v45, 0.0 }
 0xd8d   :  { %2407 = vadd.xlane.f32.xlu0 %v2406_v46 }
 0xd94   :  { %2637 = vrot.lane.b32.xlu1 %v9368_v6, %s11023_s28 }
 0xda3   :  { %2736 = vrot.lane.b32.xlu0 %v9372_v9, %s11023_s28  ;;  %s11038_s28 = smov 64  }
 0xdb8   :  { %2329 = vmax.xlane.f32.xlu1 %v2328_v42  ;;  %v2381_v50 = vpop.xlane.xlu1 %2380 }
 0xdb9   :  { %8346 = vrcp.f32 %v2381_v50 }
 0xdbc   :  { %v2384_v51 = vpop.xlane.xlu1 %2383 }
 0xdbd   :  { %8348 = vrcp.f32 %v2384_v51 }
 0xdc0   :  { %v2387_v31 = vpop.xlane.xlu1 %2386 }
 0xdc1   :  { %8350 = vrcp.f32 %v2387_v31 }
 0xdc2   :  { %2332 = vmax.xlane.f32.xlu0 %v2331_v53 }
 0xdc6   :  { %v8347_v6 = vpop.eup %8346 }
 0xdc7   :  { %v2427_v27 = vmul.f32 %v8347_v6, %v9495_v3 }
 0xdc9   :  { %7651 = vmatmul.mubr.msk.f32.vlgmr.msra.gmra.mxu1 %vm746_vm6, %v2427_v27 }
 0xdca   :  { %v8349_v9 = vpop.eup %8348  ;;  %7675 = vmatpush3.msk.msra.mxu1 %vm897_vm5, %v2642_v47  ;;  %7653 = vmatprep.mubr.msk.f32.mxu1 %vm8559_vm0, %v8558_v1 }
 0xdcb   :  { %7676 = vmatprep.subr.mxu1 %v8558_v1  ;;  %v2428_v29 = vmul.f32 %v8349_v9, %v9499_v12 }
 0xdcc   :  { %7677 = vmatpush3.msra.mxu1 %v2640_v49 }
 0xdcd   :  { %7654 = vmatmul.mubr.msk.f32.gmra.mxu1 %vm746_vm6, %v2428_v29  ;;  %7678 = vmatprep.subr.mxu1 %v8558_v1  ;;  %v2340_v29 = vsel %vm753_vm7, %v9473_v54, -inf }
 0xdce   :  { %v8351_v56 = vpop.eup %8350  ;;  %7656 = vmatprep.mubr.msk.f32.mxu1 %vm8559_vm0, %v8558_v1 }
 0xdcf   :  { %v2429_v57 = vmul.f32 %v8351_v56, %v9503_v8  ;;  %v2337_v56 = vsel %vm746_vm6, %v9471_v52, -inf }
 0xdd1   :  { %7657 = vmatmul.mubr.msk.f32.gmra.mxu1 %vm746_vm6, %v2429_v57 }
 0xdd2   :  { %7680 = vmatprep.mubr.msk.f32.mxu1 %vm8559_vm0, %v8558_v1 }
 0xe0a   :  { %v2390_v62 = vpop.xlane.xlu0 %2389 }
 0xe0b   :  { %8352 = vrcp.f32 %v2390_v62 }
 0xe0c   :  { %v2399_v60 = vpop.xlane.xlu1 %2398 }
 0xe0d   :  { %8354 = vrcp.f32 %v2399_v60 }
 0xe0e   :  { %v2393_v2 = vpop.xlane.xlu0 %2392 }
 0xe0f   :  { %8356 = vrcp.f32 %v2393_v2 }
 0xe10   :  { %v2638_v61 = vpop.permute.xlu1 %2637 }
 0xe11   :  { %7679 = vmatpush3.msra.mxu1 %v2638_v61 }
 0xe12   :  { %v2396_v3 = vpop.xlane.xlu0 %2395  ;;  %7704 = vmatprep.subr.mxu1 %v8558_v1 }
 0xe13   :  { %8358 = vrcp.f32 %v2396_v3 }
 0xe16   :  { %v2408_v4 = vpop.xlane.xlu0 %2407 }
 0xe17   :  { %8360 = vrcp.f32 %v2408_v4 }
 0xe18   :  { %v8353_v12 = vpop.eup %8352 }
 0xe19   :  { %v2430_v5 = vmul.f32 %v8353_v12, %v9514_v37 }
 0xe1a   :  { %v8355_v8 = vpop.eup %8354  ;;  %v2737_v63 = vpop.permute.xlu0 %2736 }
 0xe1b   :  { %v2433_v11 = vmul.f32 %v8355_v8, %v9519_v23  ;;  %7666 = vmatmul.mubr.msk.f32.vlgmr.msra.gmra.mxu0 %vm746_vm6, %v2430_v5  ;;  %v6758_v23 = vld [vmem:[%s11004_s7 + $0x30] sm:$0xff] }
 0xe1c   :  { %v8357_v10 = vpop.eup %8356  ;;  %7690 = vmatpush3.msk.msra.mxu0 %vm897_vm5, %v2741_v58  ;;  %7668 = vmatprep.mubr.msk.f32.mxu0 %vm8559_vm0, %v8558_v1 }
 0xe1d   :  { %7691 = vmatprep.subr.mxu0 %v8558_v1  ;;  %7681 = vmatmul.mubr.msk.f32.vlgmr.msra.gmra.mxu1 %vm746_vm6, %v2433_v11  ;;  %v2431_v18 = vmul.f32 %v8357_v10, %v9525_v39  ;;  %v6756_v39 = vld [vmem:[%s11004_s7 + $0x20] sm:$0xff] }
 0xe1e   :  { %7692 = vmatpush3.msra.mxu0 %v2739_v59  ;;  %7683 = vmatprep.mubr.msk.f32.mxu1 %vm8559_vm0, %v8558_v1 }
 0xe1f   :  { %7693 = vmatprep.subr.mxu0 %v8558_v1  ;;  %7669 = vmatmul.mubr.msk.f32.gmra.mxu0 %vm746_vm6, %v2431_v18 }
 0xe20   :  { %v8359_v14 = vpop.eup %8358  ;;  %7694 = vmatpush3.msra.mxu0 %v2737_v63  ;;  %7671 = vmatprep.mubr.msk.f32.mxu0 %vm8559_vm0, %v8558_v1 }
 0xe21   :  { %v2432_v15 = vmul.f32 %v8359_v14, %v9530_v43  ;;  %7721 = vmatprep.subr.mxu0 %v8558_v1 }
 0xe23   :  { %7672 = vmatmul.mubr.msk.f32.gmra.mxu0 %vm746_vm6, %v2432_v15 }
 0xe24   :  { %v8361_v25 = vpop.eup %8360  ;;  %7695 = vmatprep.mubr.msk.f32.mxu0 %vm8559_vm0, %v8558_v1 }
 0xe25   :  { %v2436_v16 = vmul.f32 %v8361_v25, %v9534_v45 }
 0xe27   :  { %7696 = vmatmul.mubr.msk.f32.vlgmr.msra.gmra.mxu0 %vm746_vm6, %v2436_v16 }
 0xe28   :  { %7698 = vmatprep.mubr.msk.f32.mxu0 %vm8559_vm0, %v8558_v1 }
 0xe41   :  { %v2330_v17 = vpop.xlane.xlu1 %2329 }
 0xe42   :  { %v2350_v19 = vsub.f32 %v9459_v44, %v2330_v17 }
 0xe44   :  { %v2369_v20 = vmul.f32 1.442695, %v2350_v19 }
 0xe46   :  { %8362 = vpow2.f32 %v2369_v20 }
 0xe4b   :  { %v2333_v21 = vpop.xlane.xlu0 %2332 }
 0xe4c   :  { %v2351_v22 = vsub.f32 %v9465_v48, %v2333_v21  ;;  %v6759_v48 = vld [vmem:[%s11004_s7 + $0x38] sm:$0xff] }
 0xe4d   :  { %7705 = vmatpush3.msra.mxu1 %v6759_v48  ;;  %v6769_v48 = vld [vmem:[%s11008_s11 + $0x20] sm:$0xff] }
 0xe4e   :  { %v2371_v24 = vmul.f32 1.442695, %v2351_v22  ;;  %7706 = vmatprep.subr.mxu1 %v8558_v1 }
 0xe4f   :  { %7707 = vmatpush3.msra.mxu1 %v6758_v23 }
 0xe50   :  { %8364 = vpow2.f32 %v2371_v24  ;;  %7708 = vmatprep.subr.mxu1 %v8558_v1 }
 0xe51   :  { %7709 = vmatpush3.msra.mxu1 %v6757_v30 }
 0xe52   :  { %7710 = vmatprep.subr.mxu1 %v8558_v1 }
 0xe53   :  { %v8363_v26 = vpop.eup %8362  ;;  %7711 = vmatpush3.msra.mxu1 %v6756_v39 }
 0xe54   :  { %v2400_v32 = vsel %vm746_vm6, %v8363_v26, 0.0  ;;  %7738 = vmatprep.subr.mxu1 %v8558_v1 }
 0xe55   :  { %2401 = vadd.xlane.f32.xlu0 %v2400_v32 }
 0xe5d   :  { %v8365_v33 = vpop.eup %8364 }
 0xe5e   :  { %v2403_v34 = vsel %vm753_vm7, %v8365_v33, 0.0 }
 0xe5f   :  { %2404 = vadd.xlane.f32.xlu0 %v2403_v34  ;;  %v6772_v34 = vld [vmem:[%s11008_s11 + $0x38] sm:$0xff] }
 0xe60   :  { %7722 = vmatpush3.msra.mxu0 %v6772_v34 }
 0xe61   :  { %7723 = vmatprep.subr.mxu0 %v8558_v1 }
 0xe89   :  { %v2524_v35 = vpop.f32.mrf.mxu1 }
 0xe8b   :  { %v7652_v36 = vpop.f32.mrf.mxu1 }
 0xe8c   :  { %v6771_v36 = vld [vmem:[%s11008_s11 + $0x30] sm:$0xff] }
 0xe8d   :  { %v9590_v37 = vpop.f32.mrf.mxu1  ;;  %7724 = vmatpush3.msra.mxu0 %v6771_v36 }
 0xe8e   :  { %7725 = vmatprep.subr.mxu0 %v8558_v1 }
 0xe8f   :  { %v7655_v44 = vpop.f32.mrf.mxu1 }
 0xe90   :  { %v6770_v44 = vld [vmem:[%s11008_s11 + $0x28] sm:$0xff] }
 0xe91   :  { %v9592_v38 = vpop.f32.mrf.mxu1  ;;  %7726 = vmatpush3.msra.mxu0 %v6770_v44 }
 0xe92   :  { %7727 = vmatprep.subr.mxu0 %v8558_v1 }
 0xe93   :  { %v7658_v28 = vpop.f32.mrf.mxu1  ;;  %7728 = vmatpush3.msra.mxu0 %v6769_v48 }
 0xe94   :  { %7779 = vmatprep.subr.mxu0 %v8558_v1 }
 0xedb   :  { %v2623_v13 = vpop.f32.mrf.mxu0 }
 0xedc   :  { %2838 = vrot.lane.b32.xlu1 %v2623_v13, %s11033_s19 }
 0xedd   :  { %v7667_v41 = vpop.f32.mrf.mxu0  ;;  %v2722_v43 = vpop.f32.mrf.mxu1 }
 0xede   :  { %2850 = vrot.lane.b32.xlu0 %v2722_v43, %s11034_s1  ;;  %v2402_v40 = vpop.xlane.xlu0 %2401 }
 0xedf   :  { %8366 = vrcp.f32 %v2402_v40  ;;  %v2628_v45 = vpop.f32.mrf.mxu0  ;;  %v7682_v46 = vpop.f32.mrf.mxu1 }
 0xee1   :  { %v7670_v47 = vpop.f32.mrf.mxu0 }
 0xee2   :  { %v9678_v47 = vld [vmem:[%s11006_s9 + $0x1] ss:$0 sm:$0xff] }
 0xee3   :  { %v9612_v49 = vpop.f32.mrf.mxu0 }
 0xee5   :  { %v7673_v42 = vpop.f32.mrf.mxu0 }
 0xee7   :  { %v2821_v50 = vpop.f32.mrf.mxu0 }
 0xee8   :  { %v2405_v51 = vpop.xlane.xlu0 %2404  ;;  %2862 = vrot.lane.b32.xlu1 %v2821_v50, %s11035_s29  ;;  %v9683_v50 = vld [vmem:[%s11007_s10 + $0x1] ss:$0 sm:$0xff] }
 0xee9   :  { %8368 = vrcp.f32 %v2405_v51  ;;  %v7697_v31 = vpop.f32.mrf.mxu0 }
 0xeec   :  { %v8367_v53 = vpop.eup %8366 }
 0xeed   :  { %v2434_v6 = vmul.f32 %v8367_v53, %v8363_v26 }
 0xeef   :  { %7684 = vmatmul.mubr.msk.f32.gmra.mxu1 %vm746_vm6, %v2434_v6 }
 0xef0   :  { %7686 = vmatprep.mubr.msk.f32.mxu1 %vm8559_vm0, %v8558_v1 }
 0xef6   :  { %v8369_v27 = vpop.eup %8368 }
 0xef7   :  { %v2435_v9 = vmul.f32 %v8369_v27, %v8365_v33 }
 0xef9   :  { %7687 = vmatmul.mubr.msk.f32.gmra.mxu1 %vm746_vm6, %v2435_v9  ;;  %v6793_v9 = vld [vmem:[%s11010_s13 + $0xf8] sm:$0xff] }
 0xefa   :  { %7712 = vmatprep.mubr.msk.f32.mxu1 %vm8559_vm0, %v8558_v1 }
 0xefd   :  { %2341 = vmax.xlane.f32.xlu0 %v2340_v29 }
 0xf0c   :  { %2338 = vmax.xlane.f32.xlu1 %v2337_v56  ;;  %v6792_v56 = vld [vmem:[%s11010_s13 + $0xf0] sm:$0xff] }
 0xf4e   :  { %v2839_v57 = vpop.permute.xlu1 %2838 }
 0xf4f   :  { %v2871_v58 = vsel %vm359_vm4, %v2524_v35, %v2839_v57  ;;  %v6790_v57 = vld [vmem:[%s11010_s13 + $0xe0] sm:$0xff] }
 0xf50   :  { %v2851_v59 = vpop.permute.xlu0 %2850 }
 0xf51   :  { %v2874_v62 = vsel %vm1316_vm8, %v2871_v58, %v2851_v59  ;;  %v6789_v58 = vld [vmem:[%s11010_s13 + $0xd8] sm:$0xff]  ;;  %v6788_v59 = vld [vmem:[%s11010_s13 + $0xd0] sm:$0xff] }
 0xf5a   :  { %v2863_v60 = vpop.permute.xlu1 %2862 }
 0xf5b   :  { %v2877_v2 = vsel %vm1320_vm9, %v2874_v62, %v2863_v60  ;;  %v6787_v62 = vld [vmem:[%s11010_s13 + $0xc8] sm:$0xff]  ;;  %v6786_v60 = vld [vmem:[%s11010_s13 + $0xc0] sm:$0xff] }
 0xf5c   :  { %7713 = vmatmul.mubr.msk.f32.vlgmr.msra.gmra.mxu1 %vm166_vm2, %v2877_v2  ;;  %v6785_v2 = vld [vmem:[%s11010_s13 + $0xb8] sm:$0xff] }
 0xf5d   :  { %7715 = vmatprep.mubr.msk.f32.mxu1 %vm8559_vm0, %v8558_v1  ;;  %7739 = vmatpush3.msra.mxu1 %v6793_v9  ;;  %v67_v9 = vld [vmem:[%s11012_s15 + $0x8] sm:$0xff] }
 0xf5e   :  { %7740 = vmatprep.subr.mxu1 %v8558_v1 }
 0xf5f   :  { %7741 = vmatpush3.msra.mxu1 %v6792_v56 }
 0xf60   :  { %7742 = vmatprep.subr.mxu1 %v8558_v1 }
 0xf86   :  { %v2342_v61 = vpop.xlane.xlu0 %2341 }
 0xf87   :  { %v2354_v3 = vsub.f32 %v9473_v54, %v2342_v61  ;;  %v9638_v54 = vld [vmem:[%s11005_s8 + $0x1] ss:$0 sm:$0xff]  ;;  %v6784_v61 = vld [vmem:[%s11010_s13 + $0xb0] sm:$0xff] }
 0xf89   :  { %v2377_v4 = vmul.f32 1.442695, %v2354_v3  ;;  %v6783_v3 = vld [vmem:[%s11010_s13 + $0xa8] sm:$0xff] }
 0xf8b   :  { %8370 = vpow2.f32 %v2377_v4  ;;  %v6782_v4 = vld [vmem:[%s11010_s13 + $0xa0] sm:$0xff] }
 0xf95   :  { %v2339_v12 = vpop.xlane.xlu1 %2338 }
 0xf96   :  { %v2353_v5 = vsub.f32 %v9471_v52, %v2339_v12  ;;  %v6781_v12 = vld [vmem:[%s11010_s13 + $0x98] sm:$0xff] }
 0xf98   :  { %v8371_v8 = vpop.eup %8370  ;;  %v2375_v11 = vmul.f32 1.442695, %v2353_v5  ;;  %v6780_v5 = vld [vmem:[%s11010_s13 + $0x90] sm:$0xff] }
 0xf99   :  { %v2412_v10 = vsel %vm753_vm7, %v8371_v8, 0.0 }
 0xf9a   :  { %8372 = vpow2.f32 %v2375_v11  ;;  %2413 = vadd.xlane.f32.xlu1 %v2412_v10  ;;  %v6778_v11 = vld [vmem:[%s11010_s13 + $0x80] sm:$0xff] }
 0xfa7   :  { %v8373_v18 = vpop.eup %8372 }
 0xfa8   :  { %v2409_v63 = vsel %vm746_vm6, %v8373_v18, 0.0 }
 0xfa9   :  { %2410 = vadd.xlane.f32.xlu0 %v2409_v63 }
 0xfaf   :  { %v2727_v14 = vpop.f32.mrf.mxu1 }
 0xfb1   :  { %v7685_v15 = vpop.f32.mrf.mxu1 }
 0xfb9   :  { %v2732_v25 = vpop.f32.mrf.mxu1 }
 0xfbb   :  { %v7688_v16 = vpop.f32.mrf.mxu1 }
0x101c   :  { %v2968_v52 = vpop.f32.mrf.mxu1 }
0x101d   :  { %v2969_v17 = vadd.f32 %v9638_v54, %v2968_v52 }
0x101e   :  { %v7714_v19 = vpop.f32.mrf.mxu1 }
0x101f   :  { %v9642_v20 = vadd.f32 %v2969_v17, %v9252_v55 }
0x1021   :  { %v2989_v21 = vsel %vm166_vm2, %v9642_v20, 0.0  ;;  %v3001_v22 = vmul.f32 %v9642_v20, %v9642_v20 }
0x1022   :  { %2990 = vadd.xlane.f32.xlu0 %v2989_v21 }
0x1023   :  { %v3004_v24 = vsel %vm166_vm2, %v3001_v22, 0.0  ;;  %v2414_v26 = vpop.xlane.xlu1 %2413  ;;  %v9775_v22 = vld [vmem:[%s11009_s12 + $0x1] ss:$0 sm:$0xff] }
0x1024   :  { %3005 = vadd.xlane.f32.xlu1 %v3004_v24 }
0x1032   :  { %v2411_v32 = vpop.xlane.xlu0 %2410 }
0x1033   :  { %8374 = vrcp.f32 %v2411_v32 }
0x1034   :  { %8376 = vrcp.f32 %v2414_v26 }
0x1035   :  { %2852 = vrot.lane.b32.xlu1 %v2727_v14, %s11034_s1 }
0x1038   :  { %2840 = vrot.lane.b32.xlu0 %v2628_v45, %s11033_s19 }
0x103c   :  { %2854 = vrot.lane.b32.xlu0 %v2732_v25, %s11034_s1 }
0x1040   :  { %v8375_v55 = vpop.eup %8374 }
0x1041   :  { %v2437_v33 = vmul.f32 %v8375_v55, %v8373_v18  ;;  %v8377_v35 = vpop.eup %8376 }
0x1042   :  { %v2438_v28 = vmul.f32 %v8377_v35, %v8371_v8  ;;  %v6779_v8 = vld [vmem:[%s11010_s13 + $0x88] sm:$0xff] }
0x1043   :  { %7699 = vmatmul.mubr.msk.f32.gmra.mxu0 %vm746_vm6, %v2437_v33 }
0x1044   :  { %7701 = vmatprep.mubr.msk.f32.mxu0 %vm8559_vm0, %v8558_v1 }
0x1047   :  { %7702 = vmatmul.mubr.msk.f32.gmra.mxu0 %vm746_vm6, %v2438_v28 }
0x1048   :  { %7729 = vmatprep.mubr.msk.f32.mxu0 %vm8559_vm0, %v8558_v1 }
0x10ab   :  { %v2991_v23 = vpop.xlane.xlu0 %2990 }
0x10ac   :  { %v2998_v30 = vmul.f32 0.03125, %v2991_v23 }
0x10ad   :  { %v3006_v13 = vpop.xlane.xlu1 %3005 }
0x10ae   :  { %v3016_v39 = vmul.f32 %v2998_v30, %v2998_v30  ;;  %v3013_v41 = vmul.f32 0.03125, %v3006_v13  ;;  %v3022_v45 = vsub.f32 %v9642_v20, %v2998_v30 }
0x10af   :  { %v2841_v10 = vpop.permute.xlu0 %2840 }
0x10b0   :  { %v3019_v43 = vsub.f32 %v3013_v41, %v3016_v39  ;;  %v2872_v63 = vsel %vm359_vm4, %v9590_v37, %v2841_v10 }
0x10b1   :  { %v2853_v18 = vpop.permute.xlu1 %2852 }
0x10b2   :  { %v3025_v40 = vadd.f32 1e-06, %v3019_v43  ;;  %v2875_v14 = vsel %vm1316_vm8, %v2872_v63, %v2853_v18 }
0x10b3   :  { %v2855_v17 = vpop.permute.xlu0 %2854 }
0x10b4   :  { %8378 = vrsqrt.f32 %v3025_v40 }
0x10c1   :  { %v8379_v46 = vpop.eup %8378 }
0x10c2   :  { %v3031_v42 = vmul.f32 %v8379_v46, %v3022_v45 }
0x10c4   :  { %v3040_v51 = vmul.f32 %v9678_v47, %v3031_v42 }
0x10c6   :  { %v3049_v31 = vadd.f32 %v9683_v50, %v3040_v51 }
0x10c8   :  { %7730 = vmatmul.mubr.msk.f32.vlgmr.msra.gmra.mxu0 %vm166_vm2, %v3049_v31 }
0x10c9   :  { %7732 = vmatprep.mubr.msk.f32.mxu0 %vm8559_vm0, %v8558_v1 }
0x1103   :  { %v2826_v53 = vpop.f32.mrf.mxu0 }
0x1104   :  { %2864 = vrot.lane.b32.xlu1 %v2826_v53, %s11035_s29 }
0x1105   :  { %v7700_v6 = vpop.f32.mrf.mxu0 }
0x1107   :  { %v2831_v27 = vpop.f32.mrf.mxu0 }
0x1108   :  { %2842 = vrot.lane.b32.xlu1 %v9612_v49, %s11033_s19  ;;  %v6791_v49 = vld [vmem:[%s11010_s13 + $0xe8] sm:$0xff] }
0x1109   :  { %v7703_v29 = vpop.f32.mrf.mxu0  ;;  %7743 = vmatpush3.msra.mxu1 %v6791_v49 }
0x110a   :  { %7744 = vmatprep.subr.mxu1 %v8558_v1  ;;  %v66_v29 = vld [vmem:[%s11012_s15] sm:$0xff] }
0x110b   :  { %7745 = vmatpush3.msra.mxu1 %v6790_v57 }
0x110c   :  { %2866 = vrot.lane.b32.xlu1 %v2831_v27, %s11035_s29  ;;  %7746 = vmatprep.subr.mxu1 %v8558_v1  ;;  %v68_v27 = vld [vmem:[%s11012_s15 + $0x10] sm:$0xff] }
0x110d   :  { %7747 = vmatpush3.msra.mxu1 %v6789_v58 }
0x110e   :  { %7748 = vmatprep.subr.mxu1 %v8558_v1 }
0x110f   :  { %7749 = vmatpush3.msra.mxu1 %v6788_v59 }
0x1110   :  { %7750 = vmatprep.subr.mxu1 %v8558_v1 }
0x1111   :  { %7751 = vmatpush3.msra.mxu1 %v6787_v62 }
0x1112   :  { %7752 = vmatprep.subr.mxu1 %v8558_v1 }
0x1113   :  { %7753 = vmatpush3.msra.mxu1 %v6786_v60 }
0x1114   :  { %7754 = vmatprep.subr.mxu1 %v8558_v1 }
0x1115   :  { %7755 = vmatpush3.msra.mxu1 %v6785_v2 }
0x1116   :  { %7756 = vmatprep.subr.mxu1 %v8558_v1 }
0x1117   :  { %7757 = vmatpush3.msra.mxu1 %v6784_v61 }
0x1118   :  { %7758 = vmatprep.subr.mxu1 %v8558_v1 }
0x1119   :  { %7759 = vmatpush3.msra.mxu1 %v6783_v3 }
0x111a   :  { %7760 = vmatprep.subr.mxu1 %v8558_v1 }
0x111b   :  { %7761 = vmatpush3.msra.mxu1 %v6782_v4 }
0x111c   :  { %7762 = vmatprep.subr.mxu1 %v8558_v1 }
0x111d   :  { %7763 = vmatpush3.msra.mxu1 %v6781_v12 }
0x111e   :  { %7764 = vmatprep.subr.mxu1 %v8558_v1 }
0x111f   :  { %7765 = vmatpush3.msra.mxu1 %v6780_v5 }
0x1120   :  { %7766 = vmatprep.subr.mxu1 %v8558_v1 }
0x1121   :  { %7767 = vmatpush3.msra.mxu1 %v6779_v8 }
0x1122   :  { %7768 = vmatprep.subr.mxu1 %v8558_v1 }
0x1123   :  { %7769 = vmatpush3.msra.mxu1 %v6778_v11 }
0x1124   :  { %7828 = vmatprep.subr.mxu1 %v8558_v1 }
0x1176   :  { %v2865_v15 = vpop.permute.xlu1 %2864 }
0x1177   :  { %v2878_v25 = vsel %vm1320_vm9, %v2875_v14, %v2865_v15 }
0x1178   :  { %7716 = vmatmul.mubr.msk.f32.gmra.mxu1 %vm166_vm2, %v2878_v25 }
0x1179   :  { %7718 = vmatprep.mubr.msk.f32.mxu1 %vm8559_vm0, %v8558_v1 }
0x117a   :  { %v2843_v16 = vpop.permute.xlu1 %2842 }
0x117b   :  { %v2873_v52 = vsel %vm359_vm4, %v9592_v38, %v2843_v16 }
0x117c   :  { %v2876_v19 = vsel %vm1316_vm8, %v2873_v52, %v2855_v17  ;;  %v6795_v52 = vld [vmem:[%s11011_s14 + $0x1] ss:$0 sm:$0xff] }
0x117e   :  { %v2867_v21 = vpop.permute.xlu1 %2866 }
0x117f   :  { %v2879_v37 = vsel %vm1320_vm9, %v2876_v19, %v2867_v21 }
0x1180   :  { %7719 = vmatmul.mubr.msk.f32.gmra.mxu1 %vm166_vm2, %v2879_v37 }
0x1181   :  { %7770 = vmatprep.mubr.msk.f32.mxu1 %vm8559_vm0, %v8558_v1 }
0x1188   :  { %v3140_v24 = vpop.f32.mrf.mxu0 }
0x1189   :  { %v3141_v26 = vadd.f32 %v9775_v22, %v3140_v24  ;;  %v8522_v24 = vld [vmem:[%s11031_s26 + $0x28] sm:$0xff] }
0x118a   :  { %v7731_v38 = vpop.f32.mrf.mxu0 }
0x118b   :  { %v3157_v32 = vmul.f32 %v3141_v26, %v3141_v26  ;;  %v3154_v44 = vmul.f32 0.5, %v3141_v26  ;;  %v6797_v38 = vld [vmem:[%s11032_s24 + $0x18] sm:$0xff] }
0x118d   :  { %v3160_v55 = vmul.f32 %v3157_v32, %v3141_v26  ;;  %v8527_v32 = vld [vmem:[%s11031_s26] sm:$0xff] }
0x118f   :  { %v3163_v33 = vmul.f32 0.044715, %v3160_v55  ;;  %v6798_v55 = vld [vmem:[%s11032_s24 + $0x20] sm:$0xff] }
0x1191   :  { %v3166_v34 = vadd.f32 %v3163_v33, %v3141_v26  ;;  %v8526_v26 = vld [vmem:[%s11031_s26 + $0x8] sm:$0xff] }
0x1192   :  { %v6799_v33 = vld [vmem:[%s11032_s24 + $0x28] sm:$0x1]  ;;  %s11037_s24 = smov 96  }
0x1193   :  { %v3169_v35 = vmul.f32 0.7978846, %v3166_v34 }
0x1195   :  { %8380 = vtanh.f32 %v3169_v35 }
0x11a2   :  { %v8381_v36 = vpop.eup %8380 }
0x11a3   :  { %v3175_v28 = vadd.f32 1.0, %v8381_v36 }
0x11a5   :  { %v3178_v48 = vmul.f32 %v3175_v28, %v3154_v44 }
0x11a7   :  { %7771 = vmatmul.mubr.f32.vlgmr.msra.gmra.mxu1 %v3178_v48 }
0x11a8   :  { %7773 = vmatprep.mubr.msk.f32.mxu1 %vm8559_vm0, %v8558_v1 }
0x1238   :  { %v2973_v23 = vpop.f32.mrf.mxu1 }
0x1239   :  { %v2974_v30 = vadd.f32 %v9638_v54, %v2973_v23 }
0x123a   :  { %v7717_v13 = vpop.f32.mrf.mxu1 }
0x123b   :  { %v2983_v39 = vadd.f32 %v2974_v30, %v9260_v0  ;;  %v69_v0 = vld [vmem:[%s11012_s15 + $0x18] sm:$0xff] }
0x123c   :  { %7780 = vmatpush3.msra.mxu0 %v69_v0 }
0x123d   :  { %v2992_v41 = vsel %vm166_vm2, %v2983_v39, 0.0  ;;  %v3002_v43 = vmul.f32 %v2983_v39, %v2983_v39  ;;  %7781 = vmatprep.subr.mxu0 %v8558_v1 }
0x123e   :  { %2993 = vadd.xlane.f32.xlu0 %v2992_v41  ;;  %7782 = vmatpush3.msra.mxu0 %v68_v27 }
0x123f   :  { %v3007_v40 = vsel %vm166_vm2, %v3002_v43, 0.0  ;;  %7783 = vmatprep.subr.mxu0 %v8558_v1  ;;  %v70_v43 = vld [vmem:[%s11013_s16] sm:$0x1] }
0x1240   :  { %3008 = vadd.xlane.f32.xlu1 %v3007_v40  ;;  %v2978_v45 = vpop.f32.mrf.mxu1  ;;  %7784 = vmatpush3.msra.mxu0 %v67_v9 }
0x1241   :  { %v2979_v46 = vadd.f32 %v9638_v54, %v2978_v45  ;;  %7785 = vmatprep.subr.mxu0 %v8558_v1 }
0x1242   :  { %v7720_v42 = vpop.f32.mrf.mxu1  ;;  %7786 = vmatpush3.msra.mxu0 %v66_v29 }
0x1243   :  { %v2984_v51 = vadd.f32 %v2979_v46, %v9268_v7  ;;  %7790 = vmatprep.subr.mxu0 %v8558_v1 }
0x1245   :  { %v2995_v31 = vsel %vm173_vm3, %v2984_v51, 0.0  ;;  %v3003_v53 = vmul.f32 %v2984_v51, %v2984_v51 }
0x1246   :  { %2996 = vadd.xlane.f32.xlu0 %v2995_v31 }
0x1247   :  { %v3010_v6 = vsel %vm173_vm3, %v3003_v53, 0.0 }
0x124a   :  { %3011 = vadd.xlane.f32.xlu0 %v3010_v6 }
0x1267   :  { %v3272_v54 = vpop.f32.mrf.mxu1 }
0x1268   :  { %v3273_v19 = vadd.f32 %v6795_v52, %v3272_v54  ;;  %v3520_v52 = vld [vmem:[%s11002_s5 + $0x18] sm:$0xff] }
0x1269   :  { %v7772_v7 = vpop.f32.mrf.mxu1 }
0x126a   :  { %v3284_v37 = vadd.f32 %v3273_v19, %v9642_v20  ;;  %v8524_v20 = vld [vmem:[%s11031_s26 + $0x18] sm:$0xff]  ;;  %v3518_v19 = vld [vmem:[%s11002_s5 + $0x8] sm:$0xff] }
0x12c7   :  { %v2994_v56 = vpop.xlane.xlu0 %2993 }
0x12c8   :  { %v2999_v49 = vmul.f32 0.03125, %v2994_v56 }
0x12c9   :  { %v3009_v57 = vpop.xlane.xlu1 %3008 }
0x12ca   :  { %v3017_v58 = vmul.f32 %v2999_v49, %v2999_v49  ;;  %v3014_v59 = vmul.f32 0.03125, %v3009_v57  ;;  %v3023_v11 = vsub.f32 %v2983_v39, %v2999_v49 }
0x12cc   :  { %v3020_v62 = vsub.f32 %v3014_v59, %v3017_v58  ;;  %v8529_v59 = vld [vmem:[%s10999_s2 + $0x8] sm:$0xff] }
0x12ce   :  { %v3026_v60 = vadd.f32 1e-06, %v3020_v62 }
0x12cf   :  { %v2997_v2 = vpop.xlane.xlu0 %2996 }
0x12d0   :  { %8382 = vrsqrt.f32 %v3026_v60  ;;  %v3000_v61 = vmul.f32 0.03125, %v2997_v2 }
0x12d2   :  { %v3018_v4 = vmul.f32 %v3000_v61, %v3000_v61  ;;  %v3024_v15 = vsub.f32 %v2984_v51, %v3000_v61 }
0x12d3   :  { %v3012_v3 = vpop.xlane.xlu0 %3011 }
0x12d4   :  { %v3015_v12 = vmul.f32 0.03125, %v3012_v3 }
0x12d6   :  { %v3021_v5 = vsub.f32 %v3015_v12, %v3018_v4  ;;  %v8530_v12 = vld [vmem:[%s10999_s2 + $0x10] sm:$0x1] }
0x12d8   :  { %v3027_v8 = vadd.f32 1e-06, %v3021_v5 }
0x12da   :  { %8384 = vrsqrt.f32 %v3027_v8 }
0x12dd   :  { %v8383_v10 = vpop.eup %8382 }
0x12de   :  { %v3032_v18 = vmul.f32 %v8383_v10, %v3023_v11 }
0x12e0   :  { %v3041_v63 = vmul.f32 %v9678_v47, %v3032_v18 }
0x12e2   :  { %v3050_v14 = vadd.f32 %v9683_v50, %v3041_v63 }
0x12e4   :  { %7733 = vmatmul.mubr.msk.f32.gmra.mxu0 %vm166_vm2, %v3050_v14 }
0x12e5   :  { %7735 = vmatprep.mubr.msk.f32.mxu0 %vm8559_vm0, %v8558_v1 }
0x12e7   :  { %v8385_v25 = vpop.eup %8384 }
0x12e8   :  { %v3033_v16 = vmul.f32 %v8385_v25, %v3024_v15 }
0x12ea   :  { %v3042_v17 = vmul.f32 %v9678_v47, %v3033_v16  ;;  %v8523_v47 = vld [vmem:[%s11031_s26 + $0x20] sm:$0xff] }
0x12ec   :  { %v3051_v21 = vadd.f32 %v9683_v50, %v3042_v17  ;;  %v8525_v50 = vld [vmem:[%s11031_s26 + $0x10] sm:$0xff]  ;;  %s11036_s26 = smov 104  }
0x12ed   :  { %v3519_v17 = vld [vmem:[%s11002_s5 + $0x10] sm:$0xff] }
0x12ee   :  { %7736 = vmatmul.mubr.msk.f32.gmra.mxu0 %vm166_vm2, %v3051_v21  ;;  %v3517_v21 = vld [vmem:[%s11002_s5] sm:$0xff] }
0x12ef   :  { %7787 = vmatprep.mubr.msk.f32.mxu0 %vm8559_vm0, %v8558_v1 }
0x12f2   :  { %7788 = vmatmul.mubr.msk.f32.vlgmr.msra.gmra.mxu0 %vm166_vm2, %v3284_v37 }
0x12f3   :  { %7791 = vmatpush3.msra.mxu0 %v8522_v24  ;;  %7802 = vmatprep.mubr.msk.f32.mxu0 %vm8559_vm0, %v8558_v1 }
0x12f4   :  { %7792 = vmatprep.subr.mxu0 %v8558_v1 }
0x12f5   :  { %7793 = vmatpush3.msra.mxu0 %v8523_v47 }
0x12f6   :  { %7794 = vmatprep.subr.mxu0 %v8558_v1 }
0x12f7   :  { %7795 = vmatpush3.msra.mxu0 %v8524_v20 }
0x12f8   :  { %7796 = vmatprep.subr.mxu0 %v8558_v1 }
0x12f9   :  { %7797 = vmatpush3.msra.mxu0 %v8525_v50 }
0x12fa   :  { %7798 = vmatprep.subr.mxu0 %v8558_v1 }
0x12fb   :  { %7799 = vmatpush3.msra.mxu0 %v8526_v26 }
0x12fc   :  { %7800 = vmatprep.subr.mxu0 %v8558_v1 }
0x12fd   :  { %7801 = vmatpush3.msra.mxu0 %v8527_v32 }
0x12fe   :  { %7803 = vmatmul.mubr.msk.f32.vlgmr.msra.gmra.mxu0 %vm74_vm1, %v6797_v38  ;;  %7811 = vmatprep.subr.mxu0 %v8558_v1 }
0x12ff   :  { %7805 = vmatprep.mubr.msk.f32.mxu0 %vm8559_vm0, %v8558_v1  ;;  %7812 = vmatpush3.msra.mxu0 %v3520_v52 }
0x1300   :  { %7813 = vmatprep.subr.mxu0 %v8558_v1 }
0x1301   :  { %7814 = vmatpush3.msra.mxu0 %v3519_v17 }
0x1302   :  { %7806 = vmatmul.mubr.msk.f32.gmra.mxu0 %vm74_vm1, %v6798_v55  ;;  %7815 = vmatprep.subr.mxu0 %v8558_v1 }
0x1303   :  { %7808 = vmatprep.mubr.msk.f32.mxu0 %vm8559_vm0, %v8558_v1  ;;  %7816 = vmatpush3.msra.mxu0 %v3518_v19 }
0x1304   :  { %7817 = vmatprep.subr.mxu0 %v8558_v1 }
0x1305   :  { %7818 = vmatpush3.msra.mxu0 %v3517_v21 }
0x1306   :  { %7809 = vmatmul.mubr.msk.f32.gmra.mxu0 %vm74_vm1, %v6799_v33  ;;  %7843 = vmatprep.subr.mxu0 %v8558_v1 }
0x1307   :  { %7819 = vmatprep.mubr.msk.f32.mxu0 %vm8559_vm0, %v8558_v1 }
0x13a4   :  { %v3145_v34 = vpop.f32.mrf.mxu0 }
0x13a5   :  { %v3146_v35 = vadd.f32 %v9775_v22, %v3145_v34 }
0x13a6   :  { %v7734_v36 = vpop.f32.mrf.mxu0 }
0x13a7   :  { %v3158_v44 = vmul.f32 %v3146_v35, %v3146_v35  ;;  %v3155_v7 = vmul.f32 0.5, %v3146_v35 }
0x13a9   :  { %v3161_v28 = vmul.f32 %v3158_v44, %v3146_v35 }
0x13ab   :  { %v3164_v48 = vmul.f32 0.044715, %v3161_v28 }
0x13ad   :  { %v3167_v23 = vadd.f32 %v3164_v48, %v3146_v35 }
0x13ae   :  { %v3150_v30 = vpop.f32.mrf.mxu0 }
0x13af   :  { %v3170_v13 = vmul.f32 0.7978846, %v3167_v23  ;;  %v3151_v39 = vadd.f32 %v9775_v22, %v3150_v30  ;;  %v8528_v22 = vld [vmem:[%s10999_s2] sm:$0xff] }
0x13b0   :  { %v7737_v41 = vpop.f32.mrf.mxu0 }
0x13b1   :  { %v3159_v40 = vmul.f32 %v3151_v39, %v3151_v39  ;;  %8386 = vtanh.f32 %v3170_v13  ;;  %v3156_v14 = vmul.f32 0.5, %v3151_v39 }
0x13b2   :  { %v3354_v45 = vpop.f32.mrf.mxu0 }
0x13b3   :  { %v3162_v46 = vmul.f32 %v3159_v40, %v3151_v39  ;;  %v3355_v42 = vadd.f32 %v3354_v45, %v70_v43  ;;  %v6803_v45 = vld [vmem:[%s11000_s3] ss:$0 sm:$0xff] }
0x13b4   :  { %v7789_v51 = vpop.f32.mrf.mxu0 }
0x13b5   :  { %v3165_v31 = vmul.f32 0.044715, %v3162_v46  ;;  %3358 = vst [vmem:[#allocation2] sm:$0x1] %v3355_v42  ;;  %v6804_v42 = vld [vmem:[%s11001_s4] ss:$0 sm:$0xff] }
0x13b7   :  { %v3168_v53 = vadd.f32 %v3165_v31, %v3151_v39 }
0x13b9   :  { %v3171_v6 = vmul.f32 0.7978846, %v3168_v53 }
0x13bb   :  { %8388 = vtanh.f32 %v3171_v6 }
0x13be   :  { %v8387_v0 = vpop.eup %8386  ;;  %v3438_v27 = vpop.f32.mrf.mxu0 }
0x13bf   :  { %v9871_v54 = vadd.f32 %v8528_v22, %v3438_v27  ;;  %v3176_v9 = vadd.f32 1.0, %v8387_v0 }
0x13c0   :  { %v7804_v29 = vpop.f32.mrf.mxu0 }
0x13c1   :  { %v3454_v56 = vsel %vm166_vm2, %v9871_v54, 0.0  ;;  %v3179_v49 = vmul.f32 %v3176_v9, %v3155_v7  ;;  %v3466_v57 = vmul.f32 %v9871_v54, %v9871_v54 }
0x13c2   :  { %3455 = vadd.xlane.f32.xlu0 %v3454_v56  ;;  %v3443_v58 = vpop.f32.mrf.mxu0 }
0x13c3   :  { %v9880_v62 = vadd.f32 %v8529_v59, %v3443_v58  ;;  %7774 = vmatmul.mubr.f32.gmra.mxu1 %v3179_v49  ;;  %v3469_v60 = vsel %vm166_vm2, %v3466_v57, 0.0 }
0x13c4   :  { %3470 = vadd.xlane.f32.xlu1 %v3469_v60  ;;  %v7807_v2 = vpop.f32.mrf.mxu0  ;;  %7776 = vmatprep.mubr.msk.f32.mxu1 %vm8559_vm0, %v8558_v1 }
0x13c5   :  { %v3457_v61 = vsel %vm166_vm2, %v9880_v62, 0.0  ;;  %v3467_v3 = vmul.f32 %v9880_v62, %v9880_v62 }
0x13c6   :  { %3458 = vadd.xlane.f32.xlu0 %v3457_v61  ;;  %v3448_v4 = vpop.f32.mrf.mxu0 }
0x13c7   :  { %v9892_v5 = vadd.f32 %v8530_v12, %v3448_v4  ;;  %v3472_v8 = vsel %vm166_vm2, %v3467_v3, 0.0  ;;  %v6805_v3 = vld [vmem:[%s11003_s6] ss:$0 sm:$0xff] }
0x13c8   :  { %v8389_v11 = vpop.eup %8388  ;;  %3473 = vadd.xlane.f32.xlu1 %v3472_v8  ;;  %v7810_v10 = vpop.f32.mrf.mxu0 }
0x13c9   :  { %v3460_v18 = vsel %vm173_vm3, %v9892_v5, 0.0  ;;  %v3468_v63 = vmul.f32 %v9892_v5, %v9892_v5  ;;  %v3177_v15 = vadd.f32 1.0, %v8389_v11 }
0x13ca   :  { %3461 = vadd.xlane.f32.xlu0 %v3460_v18 }
0x13cb   :  { %v3475_v25 = vsel %vm173_vm3, %v3468_v63, 0.0  ;;  %v3180_v16 = vmul.f32 %v3177_v15, %v3156_v14 }
0x13cc   :  { %3476 = vadd.xlane.f32.xlu1 %v3475_v25 }
0x13cd   :  { %7777 = vmatmul.mubr.f32.gmra.mxu1 %v3180_v16 }
0x13ce   :  { %7834 = vmatprep.mubr.msk.f32.mxu1 %vm8559_vm0, %v8558_v1 }
0x144b   :  { %v3456_v37 = vpop.xlane.xlu0 %3455 }
0x144c   :  { %v3463_v24 = vmul.f32 0.03125, %v3456_v37 }
0x144d   :  { %v3471_v47 = vpop.xlane.xlu1 %3470 }
0x144e   :  { %v3481_v20 = vmul.f32 %v3463_v24, %v3463_v24  ;;  %v3478_v50 = vmul.f32 0.03125, %v3471_v47  ;;  %v3487_v43 = vsub.f32 %v9871_v54, %v3463_v24 }
0x144f   :  { %v3459_v26 = vpop.xlane.xlu0 %3458 }
0x1450   :  { %v3484_v38 = vsub.f32 %v3478_v50, %v3481_v20  ;;  %v3464_v32 = vmul.f32 0.03125, %v3459_v26 }
0x1451   :  { %v3474_v55 = vpop.xlane.xlu1 %3473 }
0x1452   :  { %v3490_v33 = vadd.f32 1e-06, %v3484_v38  ;;  %v3482_v34 = vmul.f32 %v3464_v32, %v3464_v32  ;;  %v3479_v35 = vmul.f32 0.03125, %v3474_v55  ;;  %v3488_v51 = vsub.f32 %v9880_v62, %v3464_v32 }
0x1453   :  { %v3462_v36 = vpop.xlane.xlu0 %3461 }
0x1454   :  { %8390 = vrsqrt.f32 %v3490_v33  ;;  %v3485_v44 = vsub.f32 %v3479_v35, %v3482_v34  ;;  %v3465_v28 = vmul.f32 0.03125, %v3462_v36 }
0x1455   :  { %v3477_v48 = vpop.xlane.xlu1 %3476 }
0x1456   :  { %v3491_v23 = vadd.f32 1e-06, %v3485_v44  ;;  %v3483_v30 = vmul.f32 %v3465_v28, %v3465_v28  ;;  %v3480_v13 = vmul.f32 0.03125, %v3477_v48  ;;  %v3489_v27 = vsub.f32 %v9892_v5, %v3465_v28 }
0x1458   :  { %8392 = vrsqrt.f32 %v3491_v23  ;;  %v3486_v39 = vsub.f32 %v3480_v13, %v3483_v30 }
0x145a   :  { %v3492_v41 = vadd.f32 1e-06, %v3486_v39 }
0x145c   :  { %8394 = vrsqrt.f32 %v3492_v41 }
0x1461   :  { %v8391_v40 = vpop.eup %8390 }
0x1462   :  { %v3496_v46 = vmul.f32 %v8391_v40, %v3487_v43 }
0x1464   :  { %v3505_v31 = vmul.f32 %v6803_v45, %v3496_v46 }
0x1465   :  { %v8393_v53 = vpop.eup %8392 }
0x1466   :  { %v3514_v6 = vadd.f32 %v6804_v42, %v3505_v31  ;;  %v3497_v0 = vmul.f32 %v8393_v53, %v3488_v51 }
0x1468   :  { %7820 = vmatmul.mubr.msk.f32.vlgmr.msra.gmra.mxu0 %vm166_vm2, %v3514_v6  ;;  %v3506_v22 = vmul.f32 %v6803_v45, %v3497_v0 }
0x1469   :  { %v8395_v7 = vpop.eup %8394  ;;  %7822 = vmatprep.mubr.msk.f32.mxu0 %vm8559_vm0, %v8558_v1 }
0x146a   :  { %v3515_v9 = vadd.f32 %v6804_v42, %v3506_v22  ;;  %v3498_v29 = vmul.f32 %v8395_v7, %v3489_v27 }
0x146c   :  { %7823 = vmatmul.mubr.msk.f32.gmra.mxu0 %vm166_vm2, %v3515_v9  ;;  %v3507_v56 = vmul.f32 %v6803_v45, %v3498_v29 }
0x146d   :  { %7825 = vmatprep.mubr.msk.f32.mxu0 %vm8559_vm0, %v8558_v1 }
0x146e   :  { %v3516_v49 = vadd.f32 %v6804_v42, %v3507_v56 }
0x1470   :  { %7826 = vmatmul.mubr.msk.f32.gmra.mxu0 %vm166_vm2, %v3516_v49 }
0x1471   :  { %7849 = vmatprep.mubr.msk.f32.mxu0 %vm8559_vm0, %v8558_v1 }
0x1483   :  { %v3277_v57 = vpop.f32.mrf.mxu1 }
0x1485   :  { %v7775_v58 = vpop.f32.mrf.mxu1 }
0x148d   :  { %v3281_v59 = vpop.f32.mrf.mxu1 }
0x148f   :  { %v7778_v60 = vpop.f32.mrf.mxu1 }
0x1528   :  { %v3603_v2 = vpop.f32.mrf.mxu0 }
0x1529   :  { %v3604_v10 = vadd.f32 %v6805_v3, %v3603_v2 }
0x152a   :  { %v7821_v61 = vpop.f32.mrf.mxu0 }
0x152c   :  { %v3608_v4 = vpop.f32.mrf.mxu0 }
0x152d   :  { %v3609_v12 = vadd.f32 %v6805_v3, %v3608_v4 }
0x152e   :  { %v7824_v8 = vpop.f32.mrf.mxu0 }
0x152f   :  { %3622 = vrot.lane.b32.xlu1 %v3609_v12, %s8560_s22 }
0x1530   :  { %v3613_v11 = vpop.f32.mrf.mxu0 }
0x1531   :  { %v3614_v18 = vadd.f32 %v6805_v3, %v3613_v11 }
0x1532   :  { %v7827_v63 = vpop.f32.mrf.mxu0 }
0x1533   :  { %3620 = vrot.lane.b32.xlu1 %v3604_v10, %s8560_s22  ;;  %3624 = vrot.lane.b32.xlu0 %v3614_v18, %s8560_s22 }
0x1537   :  { %3630 = vrot.lane.b32.xlu1 %v3614_v18, %s8561_s23  ;;  %3636 = vrot.lane.b32.xlu0 %v3614_v18, %s11036_s26 }
0x153b   :  { %3628 = vrot.lane.b32.xlu1 %v3609_v12, %s8561_s23  ;;  %3634 = vrot.lane.b32.xlu0 %v3609_v12, %s11036_s26 }
0x153f   :  { %3626 = vrot.lane.b32.xlu1 %v3604_v10, %s8561_s23  ;;  %3632 = vrot.lane.b32.xlu0 %v3604_v10, %s11036_s26 }
0x1543   :  { %3642 = vrot.lane.b32.xlu1 %v3614_v18, %s11037_s24 }
0x1547   :  { %3640 = vrot.lane.b32.xlu1 %v3609_v12, %s11037_s24 }
0x154b   :  { %3638 = vrot.lane.b32.xlu1 %v3604_v10, %s11037_s24 }
0x15a1   :  { %v9951_v14 = vpop.permute.xlu1 %3622 }
0x15a5   :  { %v3621_v15 = vpop.permute.xlu1 %3620  ;;  %v9953_v25 = vpop.permute.xlu0 %3624 }
0x15a6   :  { %3740 = vrot.lane.b32.xlu0 %v9953_v25, %s11037_s24 }
0x15a9   :  { %v9957_v16 = vpop.permute.xlu1 %3630  ;;  %v9965_v17 = vpop.permute.xlu0 %3636 }
0x15aa   :  { %3838 = vrot.lane.b32.xlu1 %v9957_v16, %s11037_s24  ;;  %3738 = vrot.lane.b32.xlu0 %v9951_v14, %s11037_s24 }
0x15ad   :  { %v9963_v52 = vpop.permute.xlu1 %3628  ;;  %v9976_v21 = vpop.permute.xlu0 %3634 }
0x15ae   :  { %3836 = vrot.lane.b32.xlu1 %v9963_v52, %s11037_s24  ;;  %3736 = vrot.lane.b32.xlu0 %v3621_v15, %s11037_s24 }
0x15b1   :  { %v9970_v19 = vpop.permute.xlu1 %3626  ;;  %v9983_v47 = vpop.permute.xlu0 %3632 }
0x15b2   :  { %3834 = vrot.lane.b32.xlu1 %v9970_v19, %s11037_s24  ;;  %3936 = vrot.lane.b32.xlu0 %v9965_v17, %s11037_s24 }
0x15b5   :  { %v3643_v37 = vpop.permute.xlu1 %3642 }
0x15b6   :  { %4166 = vrot.lane.b32.xlu1 %v3614_v18, %s11038_s28  ;;  %7829 = vmatpush3.xpose.msk.msra.mxu1 %vm359_vm4, %v3643_v37 }
0x15b7   :  { %3934 = vrot.lane.b32.xlu0 %v9976_v21, %s11037_s24  ;;  %7830 = vmatprep.subr.mxu1 %v8558_v1 }
0x15b9   :  { %v3641_v24 = vpop.permute.xlu1 %3640 }
0x15ba   :  { %4164 = vrot.lane.b32.xlu1 %v3609_v12, %s11038_s28  ;;  %7831 = vmatpush3.xpose.msk.msra.mxu1 %vm359_vm4, %v3641_v24 }
0x15bb   :  { %3932 = vrot.lane.b32.xlu0 %v9983_v47, %s11037_s24  ;;  %7832 = vmatprep.subr.mxu1 %v8558_v1 }
0x15bd   :  { %v3639_v20 = vpop.permute.xlu1 %3638 }
0x15be   :  { %4263 = vrot.lane.b32.xlu1 %v9951_v14, %s11038_s28  ;;  %7833 = vmatpush3.xpose.msk.msra.mxu1 %vm359_vm4, %v3639_v20 }
0x15bf   :  { %4261 = vrot.lane.b32.xlu0 %v3621_v15, %s11038_s28  ;;  %7858 = vmatprep.subr.mxu1 %v8558_v1 }
0x15c1   :  { %7835 = vmatmul.mubr.msk.f32.vlgmr.msra.gmra.mxu1 %vm359_vm4, %v3604_v10 }
0x15c2   :  { %4162 = vrot.lane.b32.xlu1 %v3604_v10, %s11038_s28  ;;  %7837 = vmatprep.mubr.msk.f32.mxu1 %vm8559_vm0, %v8558_v1 }
0x15c3   :  { %4265 = vrot.lane.b32.xlu0 %v9953_v25, %s11038_s28 }
0x15c5   :  { %7838 = vmatmul.mubr.msk.f32.gmra.mxu1 %vm359_vm4, %v3609_v12 }
0x15c6   :  { %7840 = vmatprep.mubr.msk.f32.mxu1 %vm8559_vm0, %v8558_v1 }
0x15c9   :  { %7841 = vmatmul.mubr.msk.f32.gmra.mxu1 %vm359_vm4, %v3614_v18 }
0x15ca   :  { %7864 = vmatprep.mubr.msk.f32.mxu1 %vm8559_vm0, %v8558_v1 }
0x1618   :  { %v3741_v50 = vpop.permute.xlu0 %3740 }
0x1619   :  { %7844 = vmatpush3.xpose.msk.msra.mxu0 %vm359_vm4, %v3741_v50 }
0x161a   :  { %7845 = vmatprep.subr.mxu0 %v8558_v1 }
0x161c   :  { %v3839_v26 = vpop.permute.xlu1 %3838  ;;  %v3739_v38 = vpop.permute.xlu0 %3738 }
0x161d   :  { %7846 = vmatpush3.xpose.msk.msra.mxu0 %vm359_vm4, %v3739_v38  ;;  %7859 = vmatpush3.xpose.msk.msra.mxu1 %vm359_vm4, %v3839_v26 }
0x161e   :  { %7860 = vmatprep.subr.mxu1 %v8558_v1  ;;  %7847 = vmatprep.subr.mxu0 %v8558_v1 }
0x1620   :  { %v3837_v32 = vpop.permute.xlu1 %3836  ;;  %v3737_v55 = vpop.permute.xlu0 %3736 }
0x1621   :  { %7848 = vmatpush3.xpose.msk.msra.mxu0 %vm359_vm4, %v3737_v55  ;;  %7861 = vmatpush3.xpose.msk.msra.mxu1 %vm359_vm4, %v3837_v32 }
0x1622   :  { %7862 = vmatprep.subr.mxu1 %v8558_v1  ;;  %7873 = vmatprep.subr.mxu0 %v8558_v1 }
0x1624   :  { %v3835_v33 = vpop.permute.xlu1 %3834  ;;  %7850 = vmatmul.mubr.msk.f32.vlgmr.msra.gmra.mxu0 %vm359_vm4, %v3621_v15  ;;  %v3937_v34 = vpop.permute.xlu0 %3936 }
0x1625   :  { %7863 = vmatpush3.xpose.msk.msra.mxu1 %vm359_vm4, %v3835_v33  ;;  %7874 = vmatpush3.xpose.msk.msra.mxu0 %vm359_vm4, %v3937_v34 }
0x1626   :  { %7852 = vmatprep.mubr.msk.f32.mxu0 %vm8559_vm0, %v8558_v1  ;;  %7888 = vmatprep.subr.mxu1 %v8558_v1 }
0x1627   :  { %7875 = vmatprep.subr.mxu0 %v8558_v1 }
0x1628   :  { %7865 = vmatmul.mubr.msk.f32.vlgmr.msra.gmra.mxu1 %vm359_vm4, %v9970_v19  ;;  %v4167_v35 = vpop.permute.xlu1 %4166  ;;  %7853 = vmatmul.mubr.msk.f32.gmra.mxu0 %vm359_vm4, %v9951_v14 }
0x1629   :  { %v3935_v36 = vpop.permute.xlu0 %3934  ;;  %7889 = vmatpush3.msk.msra.mxu1 %vm897_vm5, %v4167_v35  ;;  %7855 = vmatprep.mubr.msk.f32.mxu0 %vm8559_vm0, %v8558_v1 }
0x162a   :  { %7876 = vmatpush3.xpose.msk.msra.mxu0 %vm359_vm4, %v3935_v36  ;;  %7867 = vmatprep.mubr.msk.f32.mxu1 %vm8559_vm0, %v8558_v1 }
0x162b   :  { %7890 = vmatprep.subr.mxu1 %v8558_v1  ;;  %7877 = vmatprep.subr.mxu0 %v8558_v1 }
0x162c   :  { %7868 = vmatmul.mubr.msk.f32.gmra.mxu1 %vm359_vm4, %v9963_v52  ;;  %v4165_v44 = vpop.permute.xlu1 %4164  ;;  %7856 = vmatmul.mubr.msk.f32.gmra.mxu0 %vm359_vm4, %v9953_v25 }
0x162d   :  { %v3933_v28 = vpop.permute.xlu0 %3932  ;;  %7891 = vmatpush3.msra.mxu1 %v4165_v44  ;;  %7870 = vmatprep.mubr.msk.f32.mxu1 %vm8559_vm0, %v8558_v1 }
0x162e   :  { %7878 = vmatpush3.xpose.msk.msra.mxu0 %vm359_vm4, %v3933_v28  ;;  %7879 = vmatprep.mubr.msk.f32.mxu0 %vm8559_vm0, %v8558_v1 }
0x162f   :  { %7892 = vmatprep.subr.mxu1 %v8558_v1  ;;  %7903 = vmatprep.subr.mxu0 %v8558_v1 }
0x1630   :  { %7871 = vmatmul.mubr.msk.f32.gmra.mxu1 %vm359_vm4, %v9957_v16  ;;  %v4264_v48 = vpop.permute.xlu1 %4263 }
0x1631   :  { %7880 = vmatmul.mubr.msk.f32.vlgmr.msra.gmra.mxu0 %vm359_vm4, %v9983_v47  ;;  %v4262_v23 = vpop.permute.xlu0 %4261  ;;  %7894 = vmatprep.mubr.msk.f32.mxu1 %vm8559_vm0, %v8558_v1 }
0x1632   :  { %7882 = vmatprep.mubr.msk.f32.mxu0 %vm8559_vm0, %v8558_v1 }
0x1634   :  { %v4163_v30 = vpop.permute.xlu1 %4162 }
0x1635   :  { %7883 = vmatmul.mubr.msk.f32.gmra.mxu0 %vm359_vm4, %v9976_v21  ;;  %v4266_v13 = vpop.permute.xlu0 %4265  ;;  %7893 = vmatpush3.msra.mxu1 %v4163_v30 }
0x1636   :  { %7904 = vmatpush3.msk.msra.mxu0 %vm897_vm5, %v4266_v13  ;;  %7885 = vmatprep.mubr.msk.f32.mxu0 %vm8559_vm0, %v8558_v1 }
0x1637   :  { %7905 = vmatprep.subr.mxu0 %v8558_v1  ;;  %7918 = vmatprep.subr.mxu1 %v8558_v1 }
0x1638   :  { %7906 = vmatpush3.msra.mxu0 %v4264_v48 }
0x1639   :  { %7886 = vmatmul.mubr.msk.f32.gmra.mxu0 %vm359_vm4, %v9965_v17  ;;  %7907 = vmatprep.subr.mxu0 %v8558_v1 }
0x163a   :  { %7908 = vmatpush3.msra.mxu0 %v4262_v23  ;;  %7909 = vmatprep.mubr.msk.f32.mxu0 %vm8559_vm0, %v8558_v1 }
0x163b   :  { %7933 = vmatprep.subr.mxu0 %v8558_v1 }
0x1681   :  { %v3722_v39 = vpop.f32.mrf.mxu1 }
0x1682   :  { %v4030_v41 = vsel %vm746_vm6, %v3722_v39, -inf }
0x1683   :  { %4031 = vmax.xlane.f32.xlu1 %v4030_v41  ;;  %v7836_v43 = vpop.f32.mrf.mxu1 }
0x1685   :  { %v3727_v40 = vpop.f32.mrf.mxu1 }
0x1686   :  { %v4033_v45 = vsel %vm746_vm6, %v3727_v40, -inf }
0x1687   :  { %v7839_v46 = vpop.f32.mrf.mxu1  ;;  %4034 = vmax.xlane.f32.xlu0 %v4033_v45 }
0x1689   :  { %v3732_v42 = vpop.f32.mrf.mxu1 }
0x168a   :  { %v4036_v31 = vsel %vm753_vm7, %v3732_v42, -inf }
0x168b   :  { %v7842_v51 = vpop.f32.mrf.mxu1 }
0x1694   :  { %4364 = vrot.lane.b32.xlu1 %v9957_v16, %s11038_s28 }
0x16b8   :  { %4037 = vmax.xlane.f32.xlu1 %v4036_v31 }
0x16e4   :  { %v10073_v53 = vpop.f32.mrf.mxu0 }
0x16e5   :  { %v4039_v6 = vsel %vm746_vm6, %v10073_v53, -inf }
0x16e6   :  { %4040 = vmax.xlane.f32.xlu0 %v4039_v6  ;;  %v7851_v0 = vpop.f32.mrf.mxu0 }
0x16e8   :  { %v10077_v27 = vpop.f32.mrf.mxu0  ;;  %v10079_v22 = vpop.f32.mrf.mxu1 }
0x16e9   :  { %v4048_v7 = vsel %vm746_vm6, %v10079_v22, -inf  ;;  %v4042_v9 = vsel %vm746_vm6, %v10077_v27, -inf }
0x16ea   :  { %4049 = vmax.xlane.f32.xlu1 %v4048_v7  ;;  %v7866_v29 = vpop.f32.mrf.mxu1  ;;  %4043 = vmax.xlane.f32.xlu0 %v4042_v9  ;;  %v7854_v56 = vpop.f32.mrf.mxu0 }
0x16ec   :  { %v10085_v49 = vpop.f32.mrf.mxu0  ;;  %v10087_v57 = vpop.f32.mrf.mxu1 }
0x16ed   :  { %v4051_v58 = vsel %vm746_vm6, %v10087_v57, -inf  ;;  %v4045_v59 = vsel %vm753_vm7, %v10085_v49, -inf }
0x16ee   :  { %4052 = vmax.xlane.f32.xlu1 %v4051_v58  ;;  %v7869_v60 = vpop.f32.mrf.mxu1  ;;  %4046 = vmax.xlane.f32.xlu0 %v4045_v59  ;;  %v7857_v2 = vpop.f32.mrf.mxu0 }
0x16f0   :  { %v10093_v61 = vpop.f32.mrf.mxu1 }
0x16f1   :  { %v10095_v3 = vpop.f32.mrf.mxu0  ;;  %v4054_v4 = vsel %vm753_vm7, %v10093_v61, -inf }
0x16f2   :  { %4055 = vmax.xlane.f32.xlu1 %v4054_v4  ;;  %v7872_v12 = vpop.f32.mrf.mxu1  ;;  %v4057_v8 = vsel %vm746_vm6, %v10095_v3, -inf }
0x16f3   :  { %4058 = vmax.xlane.f32.xlu0 %v4057_v8  ;;  %v7881_v11 = vpop.f32.mrf.mxu0 }
0x16f5   :  { %v10101_v10 = vpop.f32.mrf.mxu0 }
0x16f6   :  { %v4060_v18 = vsel %vm746_vm6, %v10101_v10, -inf }
0x16f7   :  { %4061 = vmax.xlane.f32.xlu0 %v4060_v18  ;;  %v7884_v63 = vpop.f32.mrf.mxu0 }
0x16f9   :  { %v10105_v14 = vpop.f32.mrf.mxu0 }
0x16fa   :  { %v4063_v15 = vsel %vm753_vm7, %v10105_v14, -inf }
0x16fb   :  { %4064 = vmax.xlane.f32.xlu0 %v4063_v15  ;;  %v7887_v25 = vpop.f32.mrf.mxu0 }
0x1703   :  { %4362 = vrot.lane.b32.xlu1 %v9963_v52, %s11038_s28 }
0x170c   :  { %v4032_v16 = vpop.xlane.xlu1 %4031 }
0x170d   :  { %v4066_v37 = vsub.f32 %v3722_v39, %v4032_v16 }
0x170f   :  { %v4078_v20 = vmul.f32 1.442695, %v4066_v37 }
0x1710   :  { %v4035_v24 = vpop.xlane.xlu0 %4034 }
0x1711   :  { %4463 = vrot.lane.b32.xlu0 %v9965_v17, %s11038_s28  ;;  %v4067_v50 = vsub.f32 %v3727_v40, %v4035_v24  ;;  %8396 = vpow2.f32 %v4078_v20  ;;  %v10123_v17 = vpop.permute.xlu1 %4364 }
0x1713   :  { %v4080_v26 = vmul.f32 1.442695, %v4067_v50 }
0x1715   :  { %4461 = vrot.lane.b32.xlu0 %v9976_v21, %s11038_s28  ;;  %8398 = vpow2.f32 %v4080_v26 }
0x171e   :  { %v10115_v38 = vpop.eup %8396 }
0x171f   :  { %v4102_v32 = vsel %vm746_vm6, %v10115_v38, 0.0 }
0x1722   :  { %v10119_v52 = vpop.eup %8398 }
0x1723   :  { %v4105_v55 = vsel %vm746_vm6, %v10119_v52, 0.0 }
0x1727   :  { %4103 = vadd.xlane.f32.xlu1 %v4102_v32 }
0x172b   :  { %4106 = vadd.xlane.f32.xlu1 %v4105_v55 }
0x1741   :  { %v4038_v33 = vpop.xlane.xlu1 %4037 }
0x1742   :  { %v4068_v34 = vsub.f32 %v3732_v42, %v4038_v33 }
0x1744   :  { %v4082_v21 = vmul.f32 1.442695, %v4068_v34 }
0x1746   :  { %8400 = vpow2.f32 %v4082_v21 }
0x1753   :  { %v10125_v35 = vpop.eup %8400 }
0x1754   :  { %v4108_v36 = vsel %vm753_vm7, %v10125_v35, 0.0 }
0x1755   :  { %4109 = vadd.xlane.f32.xlu1 %v4108_v36 }
0x176f   :  { %v4041_v44 = vpop.xlane.xlu0 %4040 }
0x1770   :  { %v4069_v28 = vsub.f32 %v10073_v53, %v4041_v44 }
0x1772   :  { %v4084_v48 = vmul.f32 1.442695, %v4069_v28 }
0x1773   :  { %v4050_v23 = vpop.xlane.xlu1 %4049  ;;  %v4044_v30 = vpop.xlane.xlu0 %4043 }
0x1774   :  { %8402 = vpow2.f32 %v4084_v48  ;;  %v4072_v13 = vsub.f32 %v10079_v22, %v4050_v23  ;;  %v4070_v39 = vsub.f32 %v10077_v27, %v4044_v30 }
0x1776   :  { %v4090_v41 = vmul.f32 1.442695, %v4072_v13  ;;  %v4086_v43 = vmul.f32 1.442695, %v4070_v39 }
0x1777   :  { %v4053_v40 = vpop.xlane.xlu1 %4052  ;;  %v4047_v45 = vpop.xlane.xlu0 %4046 }
0x1778   :  { %8404 = vpow2.f32 %v4090_v41  ;;  %v4073_v46 = vsub.f32 %v10087_v57, %v4053_v40  ;;  %v4071_v42 = vsub.f32 %v10085_v49, %v4047_v45 }
0x1779   :  { %8406 = vpow2.f32 %v4086_v43 }
0x177a   :  { %v4092_v51 = vmul.f32 1.442695, %v4073_v46  ;;  %v4088_v31 = vmul.f32 1.442695, %v4071_v42 }
0x177b   :  { %v4056_v53 = vpop.xlane.xlu1 %4055 }
0x177c   :  { %8408 = vpow2.f32 %v4092_v51  ;;  %v4074_v6 = vsub.f32 %v10093_v61, %v4056_v53  ;;  %v4059_v0 = vpop.xlane.xlu0 %4058 }
0x177d   :  { %8410 = vpow2.f32 %v4088_v31  ;;  %v4075_v27 = vsub.f32 %v10095_v3, %v4059_v0 }
0x177e   :  { %v4094_v22 = vmul.f32 1.442695, %v4074_v6 }
0x177f   :  { %v4096_v7 = vmul.f32 1.442695, %v4075_v27  ;;  %v4363_v20 = vpop.permute.xlu1 %4362 }
0x1780   :  { %8412 = vpow2.f32 %v4094_v22  ;;  %v4062_v9 = vpop.xlane.xlu0 %4061 }
0x1781   :  { %v10136_v29 = vpop.eup %8402  ;;  %8414 = vpow2.f32 %v4096_v7  ;;  %v4076_v56 = vsub.f32 %v10101_v10, %v4062_v9 }
0x1782   :  { %v4111_v49 = vsel %vm746_vm6, %v10136_v29, 0.0 }
0x1783   :  { %v4098_v57 = vmul.f32 1.442695, %v4076_v56  ;;  %4112 = vadd.xlane.f32.xlu0 %v4111_v49 }
0x1784   :  { %v4065_v58 = vpop.xlane.xlu0 %4064 }
0x1785   :  { %v10141_v59 = vpop.eup %8404  ;;  %8416 = vpow2.f32 %v4098_v57  ;;  %v4077_v60 = vsub.f32 %v10105_v14, %v4065_v58 }
0x1786   :  { %v10144_v2 = vpop.eup %8406  ;;  %v4120_v61 = vsel %vm746_vm6, %v10141_v59, 0.0 }
0x1787   :  { %v4100_v3 = vmul.f32 1.442695, %v4077_v60  ;;  %4121 = vadd.xlane.f32.xlu1 %v4120_v61  ;;  %v4114_v4 = vsel %vm746_vm6, %v10144_v2, 0.0 }
0x1788   :  { %4115 = vadd.xlane.f32.xlu0 %v4114_v4  ;;  %v4464_v34 = vpop.permute.xlu0 %4463  ;;  %v4606_v4 = vld [vmem:[%s11004_s7 + $0x18] sm:$0xff] }
0x1789   :  { %v10150_v12 = vpop.eup %8408  ;;  %8418 = vpow2.f32 %v4100_v3 }
0x178a   :  { %v10152_v8 = vpop.eup %8410  ;;  %v4123_v11 = vsel %vm746_vm6, %v10150_v12, 0.0 }
0x178b   :  { %4124 = vadd.xlane.f32.xlu1 %v4123_v11  ;;  %v4117_v10 = vsel %vm753_vm7, %v10152_v8, 0.0 }
0x178c   :  { %4118 = vadd.xlane.f32.xlu0 %v4117_v10  ;;  %v4603_v10 = vld [vmem:[%s11004_s7] sm:$0xff] }
0x178d   :  { %v10158_v18 = vpop.eup %8412 }
0x178e   :  { %v10160_v63 = vpop.eup %8414  ;;  %v4126_v14 = vsel %vm753_vm7, %v10158_v18, 0.0 }
0x178f   :  { %4127 = vadd.xlane.f32.xlu1 %v4126_v14  ;;  %v4129_v15 = vsel %vm746_vm6, %v10160_v63, 0.0 }
0x1790   :  { %4130 = vadd.xlane.f32.xlu0 %v4129_v15 }
0x1792   :  { %v10166_v25 = vpop.eup %8416 }
0x1793   :  { %v4132_v16 = vsel %vm746_vm6, %v10166_v25, 0.0 }
0x1794   :  { %4133 = vadd.xlane.f32.xlu0 %v4132_v16 }
0x1796   :  { %v10170_v37 = vpop.eup %8418 }
0x1797   :  { %v4135_v24 = vsel %vm753_vm7, %v10170_v37, 0.0 }
0x1798   :  { %4136 = vadd.xlane.f32.xlu0 %v4135_v24 }
0x17a0   :  { %4360 = vrot.lane.b32.xlu1 %v9970_v19, %s11038_s28 }
0x17ae   :  { %4459 = vrot.lane.b32.xlu0 %v9983_v47, %s11038_s28 }
0x17b0   :  { %v4104_v50 = vpop.xlane.xlu1 %4103 }
0x17b1   :  { %8420 = vrcp.f32 %v4104_v50 }
0x17b4   :  { %v4107_v26 = vpop.xlane.xlu1 %4106 }
0x17b5   :  { %8422 = vrcp.f32 %v4107_v26 }
0x17be   :  { %v8421_v32 = vpop.eup %8420 }
0x17bf   :  { %v4150_v55 = vmul.f32 %v8421_v32, %v10115_v38 }
0x17c1   :  { %7895 = vmatmul.mubr.msk.f32.vlgmr.msra.gmra.mxu1 %vm746_vm6, %v4150_v55 }
0x17c2   :  { %v8423_v33 = vpop.eup %8422  ;;  %7919 = vmatpush3.msk.msra.mxu1 %vm897_vm5, %v10123_v17  ;;  %7897 = vmatprep.mubr.msk.f32.mxu1 %vm8559_vm0, %v8558_v1 }
0x17c3   :  { %7920 = vmatprep.subr.mxu1 %v8558_v1  ;;  %v4151_v19 = vmul.f32 %v8423_v33, %v10119_v52  ;;  %v4462_v52 = vpop.permute.xlu0 %4461 }
0x17c4   :  { %7921 = vmatpush3.msra.mxu1 %v4363_v20 }
0x17c5   :  { %7898 = vmatmul.mubr.msk.f32.gmra.mxu1 %vm746_vm6, %v4151_v19  ;;  %7922 = vmatprep.subr.mxu1 %v8558_v1 }
0x17c6   :  { %7900 = vmatprep.mubr.msk.f32.mxu1 %vm8559_vm0, %v8558_v1 }
0x17de   :  { %v4110_v47 = vpop.xlane.xlu1 %4109 }
0x17df   :  { %8424 = vrcp.f32 %v4110_v47 }
0x17ec   :  { %v8425_v38 = vpop.eup %8424 }
0x17ed   :  { %v4152_v17 = vmul.f32 %v8425_v38, %v10125_v35 }
0x17ef   :  { %7901 = vmatmul.mubr.msk.f32.gmra.mxu1 %vm746_vm6, %v4152_v17 }
0x17f0   :  { %7924 = vmatprep.mubr.msk.f32.mxu1 %vm8559_vm0, %v8558_v1 }
0x180c   :  { %v4113_v21 = vpop.xlane.xlu0 %4112 }
0x180d   :  { %8426 = vrcp.f32 %v4113_v21 }
0x1810   :  { %v4122_v36 = vpop.xlane.xlu1 %4121 }
0x1811   :  { %8428 = vrcp.f32 %v4122_v36  ;;  %v4116_v44 = vpop.xlane.xlu0 %4115 }
0x1812   :  { %8430 = vrcp.f32 %v4116_v44 }
0x1814   :  { %v4125_v28 = vpop.xlane.xlu1 %4124 }
0x1815   :  { %8432 = vrcp.f32 %v4125_v28  ;;  %v4119_v48 = vpop.xlane.xlu0 %4118 }
0x1816   :  { %8434 = vrcp.f32 %v4119_v48 }
0x1818   :  { %v4128_v23 = vpop.xlane.xlu1 %4127 }
0x1819   :  { %8436 = vrcp.f32 %v4128_v23  ;;  %v4131_v35 = vpop.xlane.xlu0 %4130 }
0x181a   :  { %v8427_v30 = vpop.eup %8426  ;;  %8438 = vrcp.f32 %v4131_v35 }
0x181b   :  { %v4153_v13 = vmul.f32 %v8427_v30, %v10136_v29 }
0x181c   :  { %v4361_v39 = vpop.permute.xlu1 %4360 }
0x181d   :  { %v4134_v41 = vpop.xlane.xlu0 %4133  ;;  %7910 = vmatmul.mubr.msk.f32.vlgmr.msra.gmra.mxu0 %vm746_vm6, %v4153_v13  ;;  %7923 = vmatpush3.msra.mxu1 %v4361_v39 }
0x181e   :  { %v8429_v43 = vpop.eup %8428  ;;  %8440 = vrcp.f32 %v4134_v41  ;;  %7934 = vmatpush3.msk.msra.mxu0 %vm897_vm5, %v4464_v34  ;;  %7912 = vmatprep.mubr.msk.f32.mxu0 %vm8559_vm0, %v8558_v1 }
0x181f   :  { %v8431_v40 = vpop.eup %8430  ;;  %v4156_v45 = vmul.f32 %v8429_v43, %v10141_v59  ;;  %7935 = vmatprep.subr.mxu0 %v8558_v1  ;;  %7948 = vmatprep.subr.mxu1 %v8558_v1 }
0x1820   :  { %7936 = vmatpush3.msra.mxu0 %v4462_v52  ;;  %v4154_v46 = vmul.f32 %v8431_v40, %v10144_v2 }
0x1821   :  { %v4137_v42 = vpop.xlane.xlu0 %4136  ;;  %7925 = vmatmul.mubr.msk.f32.vlgmr.msra.gmra.mxu1 %vm746_vm6, %v4156_v45  ;;  %7937 = vmatprep.subr.mxu0 %v8558_v1 }
0x1822   :  { %v8433_v51 = vpop.eup %8432  ;;  %8442 = vrcp.f32 %v4137_v42  ;;  %7913 = vmatmul.mubr.msk.f32.gmra.mxu0 %vm746_vm6, %v4154_v46  ;;  %7927 = vmatprep.mubr.msk.f32.mxu1 %vm8559_vm0, %v8558_v1  ;;  %v6849_v42 = vld [vmem:[%s11005_s8] ss:$0 sm:$0xff] }
0x1823   :  { %v8435_v31 = vpop.eup %8434  ;;  %7915 = vmatprep.mubr.msk.f32.mxu0 %vm8559_vm0, %v8558_v1  ;;  %v4157_v53 = vmul.f32 %v8433_v51, %v10150_v12  ;;  %v4605_v12 = vld [vmem:[%s11004_s7 + $0x10] sm:$0xff]  ;;  %7949 = vmatpush3.msra.mxu1 %v4606_v4  ;;  %v4774_v4 = vld [vmem:[%s11008_s11 + $0x18] sm:$0xff] }
0x1824   :  { %v4155_v6 = vmul.f32 %v8435_v31, %v10152_v8  ;;  %7950 = vmatprep.subr.mxu1 %v8558_v1  ;;  %v4604_v8 = vld [vmem:[%s11004_s7 + $0x8] sm:$0xff] }
0x1825   :  { %v4460_v0 = vpop.permute.xlu0 %4459  ;;  %7928 = vmatmul.mubr.msk.f32.gmra.mxu1 %vm746_vm6, %v4157_v53 }
0x1826   :  { %v8437_v27 = vpop.eup %8436  ;;  %7916 = vmatmul.mubr.msk.f32.gmra.mxu0 %vm746_vm6, %v4155_v6  ;;  %7930 = vmatprep.mubr.msk.f32.mxu1 %vm8559_vm0, %v8558_v1 }
0x1827   :  { %v8439_v22 = vpop.eup %8438  ;;  %7938 = vmatpush3.msra.mxu0 %v4460_v0  ;;  %7939 = vmatprep.mubr.msk.f32.mxu0 %vm8559_vm0, %v8558_v1  ;;  %v4158_v7 = vmul.f32 %v8437_v27, %v10158_v18 }
0x1828   :  { %v4159_v9 = vmul.f32 %v8439_v22, %v10160_v63  ;;  %7965 = vmatprep.subr.mxu0 %v8558_v1  ;;  %7951 = vmatpush3.msra.mxu1 %v4605_v12  ;;  %v4772_v12 = vld [vmem:[%s11008_s11 + $0x8] sm:$0xff] }
0x1829   :  { %7931 = vmatmul.mubr.msk.f32.gmra.mxu1 %vm746_vm6, %v4158_v7  ;;  %7952 = vmatprep.subr.mxu1 %v8558_v1 }
0x182a   :  { %7940 = vmatmul.mubr.msk.f32.vlgmr.msra.gmra.mxu0 %vm746_vm6, %v4159_v9  ;;  %7956 = vmatprep.mubr.msk.f32.mxu1 %vm8559_vm0, %v8558_v1 }
0x182b   :  { %v8441_v29 = vpop.eup %8440  ;;  %7942 = vmatprep.mubr.msk.f32.mxu0 %vm8559_vm0, %v8558_v1  ;;  %7953 = vmatpush3.msra.mxu1 %v4604_v8  ;;  %v4771_v8 = vld [vmem:[%s11008_s11] sm:$0xff] }
0x182c   :  { %v4160_v56 = vmul.f32 %v8441_v29, %v10166_v25  ;;  %7954 = vmatprep.subr.mxu1 %v8558_v1  ;;  %7966 = vmatpush3.msra.mxu0 %v4774_v4 }
0x182d   :  { %7955 = vmatpush3.msra.mxu1 %v4603_v10  ;;  %7967 = vmatprep.subr.mxu0 %v8558_v1 }
0x182e   :  { %7943 = vmatmul.mubr.msk.f32.gmra.mxu0 %vm746_vm6, %v4160_v56  ;;  %7982 = vmatprep.subr.mxu1 %v8558_v1 }
0x182f   :  { %v8443_v49 = vpop.eup %8442  ;;  %7945 = vmatprep.mubr.msk.f32.mxu0 %vm8559_vm0, %v8558_v1 }
0x1830   :  { %v4161_v57 = vmul.f32 %v8443_v49, %v10170_v37 }
0x1832   :  { %7946 = vmatmul.mubr.msk.f32.gmra.mxu0 %vm746_vm6, %v4161_v57 }
0x1833   :  { %7973 = vmatprep.mubr.msk.f32.mxu0 %vm8559_vm0, %v8558_v1 }
0x1881   :  { %v4247_v58 = vpop.f32.mrf.mxu1 }
0x1883   :  { %v7896_v59 = vpop.f32.mrf.mxu1 }
0x1885   :  { %v4252_v60 = vpop.f32.mrf.mxu1 }
0x1887   :  { %v7899_v2 = vpop.f32.mrf.mxu1 }
0x18af   :  { %v4257_v61 = vpop.f32.mrf.mxu1 }
0x18b1   :  { %v7902_v3 = vpop.f32.mrf.mxu1 }
0x18dd   :  { %v4346_v11 = vpop.f32.mrf.mxu0 }
0x18de   :  { %4561 = vrot.lane.b32.xlu1 %v4346_v11, %s11033_s19 }
0x18df   :  { %v7911_v18 = vpop.f32.mrf.mxu0 }
0x18e1   :  { %v4445_v63 = vpop.f32.mrf.mxu1 }
0x18e2   :  { %v4351_v14 = vpop.f32.mrf.mxu0  ;;  %4573 = vrot.lane.b32.xlu0 %v4445_v63, %s11034_s1 }
0x18e3   :  { %v7926_v15 = vpop.f32.mrf.mxu1 }
0x18e4   :  { %v7914_v25 = vpop.f32.mrf.mxu0 }
0x18e5   :  { %v4450_v16 = vpop.f32.mrf.mxu1 }
0x18e6   :  { %v4356_v37 = vpop.f32.mrf.mxu0  ;;  %4575 = vrot.lane.b32.xlu1 %v4450_v16, %s11034_s1  ;;  %4563 = vrot.lane.b32.xlu0 %v4351_v14, %s11033_s19 }
0x18e7   :  { %v7929_v24 = vpop.f32.mrf.mxu1 }
0x18e8   :  { %v7917_v20 = vpop.f32.mrf.mxu0 }
0x18e9   :  { %v4455_v50 = vpop.f32.mrf.mxu1 }
0x18ea   :  { %v4544_v26 = vpop.f32.mrf.mxu0 }
0x18eb   :  { %4585 = vrot.lane.b32.xlu1 %v4544_v26, %s11035_s29  ;;  %v7932_v32 = vpop.f32.mrf.mxu1 }
0x18ec   :  { %v7941_v55 = vpop.f32.mrf.mxu0 }
0x18ee   :  { %v4549_v33 = vpop.f32.mrf.mxu0 }
0x18ef   :  { %4565 = vrot.lane.b32.xlu1 %v4356_v37, %s11033_s19  ;;  %4587 = vrot.lane.b32.xlu0 %v4549_v33, %s11035_s29 }
0x18f0   :  { %v7944_v19 = vpop.f32.mrf.mxu0 }
0x18f2   :  { %v4554_v47 = vpop.f32.mrf.mxu0 }
0x18f3   :  { %4577 = vrot.lane.b32.xlu0 %v4455_v50, %s11034_s1  ;;  %4589 = vrot.lane.b32.xlu1 %v4554_v47, %s11035_s29 }
0x18f4   :  { %v7947_v38 = vpop.f32.mrf.mxu0 }
0x1950   :  { %v4562_v17 = vpop.permute.xlu1 %4561 }
0x1951   :  { %v4594_v36 = vsel %vm359_vm4, %v4247_v58, %v4562_v17 }
0x1954   :  { %v4574_v34 = vpop.permute.xlu0 %4573 }
0x1955   :  { %v4597_v44 = vsel %vm1316_vm8, %v4594_v36, %v4574_v34  ;;  %v6853_v36 = vld [vmem:[%s11006_s9] ss:$0 sm:$0xff] }
0x1958   :  { %v4576_v52 = vpop.permute.xlu1 %4575  ;;  %v4564_v21 = vpop.permute.xlu0 %4563 }
0x1959   :  { %v4595_v48 = vsel %vm359_vm4, %v4252_v60, %v4564_v21 }
0x195a   :  { %v4598_v30 = vsel %vm1316_vm8, %v4595_v48, %v4576_v52 }
0x195d   :  { %v4586_v28 = vpop.permute.xlu1 %4585 }
0x195e   :  { %v4600_v23 = vsel %vm1320_vm9, %v4597_v44, %v4586_v28  ;;  %v6854_v28 = vld [vmem:[%s11007_s10] ss:$0 sm:$0xff] }
0x195f   :  { %7957 = vmatmul.mubr.msk.f32.vlgmr.msra.gmra.mxu1 %vm166_vm2, %v4600_v23 }
0x1960   :  { %7959 = vmatprep.mubr.msk.f32.mxu1 %vm8559_vm0, %v8558_v1 }
0x1961   :  { %v4566_v35 = vpop.permute.xlu1 %4565  ;;  %v4588_v13 = vpop.permute.xlu0 %4587 }
0x1962   :  { %v4601_v39 = vsel %vm1320_vm9, %v4598_v30, %v4588_v13  ;;  %v4596_v41 = vsel %vm359_vm4, %v4257_v61, %v4566_v35 }
0x1963   :  { %7960 = vmatmul.mubr.msk.f32.gmra.mxu1 %vm166_vm2, %v4601_v39 }
0x1964   :  { %7962 = vmatprep.mubr.msk.f32.mxu1 %vm8559_vm0, %v8558_v1 }
0x1965   :  { %v4578_v43 = vpop.permute.xlu0 %4577  ;;  %v4590_v40 = vpop.permute.xlu1 %4589 }
0x1966   :  { %v4599_v45 = vsel %vm1316_vm8, %v4596_v41, %v4578_v43 }
0x1967   :  { %v4602_v46 = vsel %vm1320_vm9, %v4599_v45, %v4590_v40 }
0x1968   :  { %7963 = vmatmul.mubr.msk.f32.gmra.mxu1 %vm166_vm2, %v4602_v46 }
0x1969   :  { %8014 = vmatprep.mubr.msk.f32.mxu1 %vm8559_vm0, %v8558_v1 }
0x1a1f   :  { %v4689_v51 = vpop.f32.mrf.mxu1 }
0x1a20   :  { %v4690_v31 = vadd.f32 %v6849_v42, %v4689_v51  ;;  %v4913_v51 = vld [vmem:[%s11010_s13 + $0x78] sm:$0xff] }
0x1a21   :  { %v7958_v53 = vpop.f32.mrf.mxu1  ;;  %7983 = vmatpush3.msra.mxu1 %v4913_v51 }
0x1a22   :  { %v10282_v6 = vadd.f32 %v4690_v31, %v9871_v54  ;;  %7984 = vmatprep.subr.mxu1 %v8558_v1  ;;  %v4912_v31 = vld [vmem:[%s11010_s13 + $0x70] sm:$0xff]  ;;  %v4911_v53 = vld [vmem:[%s11010_s13 + $0x68] sm:$0xff] }
0x1a23   :  { %v4694_v0 = vpop.f32.mrf.mxu1  ;;  %7985 = vmatpush3.msra.mxu1 %v4912_v31 }
0x1a24   :  { %v4695_v27 = vadd.f32 %v6849_v42, %v4694_v0  ;;  %v4708_v22 = vsel %vm166_vm2, %v10282_v6, 0.0  ;;  %v4720_v7 = vmul.f32 %v10282_v6, %v10282_v6  ;;  %7986 = vmatprep.subr.mxu1 %v8558_v1  ;;  %v4910_v0 = vld [vmem:[%s11010_s13 + $0x60] sm:$0xff] }
0x1a25   :  { %4709 = vadd.xlane.f32.xlu0 %v4708_v22  ;;  %v7961_v9 = vpop.f32.mrf.mxu1  ;;  %7987 = vmatpush3.msra.mxu1 %v4911_v53  ;;  %v4908_v22 = vld [vmem:[%s11010_s13 + $0x50] sm:$0xff] }
0x1a26   :  { %v10289_v29 = vadd.f32 %v4695_v27, %v9880_v62  ;;  %v4723_v56 = vsel %vm166_vm2, %v4720_v7, 0.0  ;;  %7988 = vmatprep.subr.mxu1 %v8558_v1  ;;  %v4909_v27 = vld [vmem:[%s11010_s13 + $0x58] sm:$0xff]  ;;  %v4907_v7 = vld [vmem:[%s11010_s13 + $0x48] sm:$0xff]  ;;  %v4906_v9 = vld [vmem:[%s11010_s13 + $0x40] sm:$0xff] }
0x1a27   :  { %4724 = vadd.xlane.f32.xlu1 %v4723_v56  ;;  %7989 = vmatpush3.msra.mxu1 %v4910_v0  ;;  %v4905_v56 = vld [vmem:[%s11010_s13 + $0x38] sm:$0xff] }
0x1a28   :  { %v4699_v49 = vpop.f32.mrf.mxu1  ;;  %v4711_v54 = vsel %vm166_vm2, %v10289_v29, 0.0  ;;  %v4721_v57 = vmul.f32 %v10289_v29, %v10289_v29  ;;  %7990 = vmatprep.subr.mxu1 %v8558_v1 }
0x1a29   :  { %v4700_v58 = vadd.f32 %v6849_v42, %v4699_v49  ;;  %4712 = vadd.xlane.f32.xlu0 %v4711_v54  ;;  %7991 = vmatpush3.msra.mxu1 %v4909_v27  ;;  %v4904_v49 = vld [vmem:[%s11010_s13 + $0x30] sm:$0xff]  ;;  %v4903_v54 = vld [vmem:[%s11010_s13 + $0x28] sm:$0xff] }
0x1a2a   :  { %v7964_v59 = vpop.f32.mrf.mxu1  ;;  %v4726_v2 = vsel %vm166_vm2, %v4721_v57, 0.0  ;;  %7992 = vmatprep.subr.mxu1 %v8558_v1  ;;  %v4902_v57 = vld [vmem:[%s11010_s13 + $0x20] sm:$0xff] }
0x1a2b   :  { %v10297_v60 = vadd.f32 %v4700_v58, %v9892_v5  ;;  %v4773_v5 = vld [vmem:[%s11008_s11 + $0x10] sm:$0xff]  ;;  %7993 = vmatpush3.msra.mxu1 %v4908_v22  ;;  %v4901_v58 = vld [vmem:[%s11010_s13 + $0x18] sm:$0xff] }
0x1a2c   :  { %7968 = vmatpush3.msra.mxu0 %v4773_v5  ;;  %7994 = vmatprep.subr.mxu1 %v8558_v1  ;;  %v4900_v59 = vld [vmem:[%s11010_s13 + $0x10] sm:$0xff] }
0x1a2d   :  { %4727 = vadd.xlane.f32.xlu0 %v4726_v2  ;;  %v4722_v62 = vmul.f32 %v10297_v60, %v10297_v60  ;;  %v4714_v3 = vsel %vm173_vm3, %v10297_v60, 0.0  ;;  %7969 = vmatprep.subr.mxu0 %v8558_v1  ;;  %v4899_v2 = vld [vmem:[%s11010_s13 + $0x8] sm:$0xff] }
0x1a2e   :  { %7970 = vmatpush3.msra.mxu0 %v4772_v12  ;;  %7995 = vmatpush3.msra.mxu1 %v4907_v7 }
0x1a2f   :  { %v4729_v61 = vsel %vm173_vm3, %v4722_v62, 0.0  ;;  %7971 = vmatprep.subr.mxu0 %v8558_v1  ;;  %7996 = vmatprep.subr.mxu1 %v8558_v1  ;;  %v4898_v62 = vld [vmem:[%s11010_s13] sm:$0xff] }
0x1a30   :  { %4730 = vadd.xlane.f32.xlu1 %v4729_v61  ;;  %7972 = vmatpush3.msra.mxu0 %v4771_v8  ;;  %v6855_v61 = vld [vmem:[%s11009_s12] ss:$0 sm:$0xff] }
0x1a31   :  { %4715 = vadd.xlane.f32.xlu0 %v4714_v3  ;;  %8023 = vmatprep.subr.mxu0 %v8558_v1 }
0x1a32   :  { %7997 = vmatpush3.msra.mxu1 %v4906_v9 }
0x1a33   :  { %7998 = vmatprep.subr.mxu1 %v8558_v1 }
0x1a34   :  { %7999 = vmatpush3.msra.mxu1 %v4905_v56 }
0x1a35   :  { %8000 = vmatprep.subr.mxu1 %v8558_v1 }
0x1a36   :  { %8001 = vmatpush3.msra.mxu1 %v4904_v49 }
0x1a37   :  { %8002 = vmatprep.subr.mxu1 %v8558_v1 }
0x1a38   :  { %8003 = vmatpush3.msra.mxu1 %v4903_v54 }
0x1a39   :  { %8004 = vmatprep.subr.mxu1 %v8558_v1 }
0x1a3a   :  { %8005 = vmatpush3.msra.mxu1 %v4902_v57 }
0x1a3b   :  { %8006 = vmatprep.subr.mxu1 %v8558_v1 }
0x1a3c   :  { %8007 = vmatpush3.msra.mxu1 %v4901_v58 }
0x1a3d   :  { %8008 = vmatprep.subr.mxu1 %v8558_v1 }
0x1a3e   :  { %8009 = vmatpush3.msra.mxu1 %v4900_v59  ;;  %v6867_v59 = vld [vmem:[%s11002_s5 + $0x38] sm:$0xff] }
0x1a3f   :  { %8010 = vmatprep.subr.mxu1 %v8558_v1 }
0x1a40   :  { %8011 = vmatpush3.msra.mxu1 %v4899_v2  ;;  %v6865_v2 = vld [vmem:[%s11002_s5 + $0x28] sm:$0xff] }
0x1a41   :  { %8012 = vmatprep.subr.mxu1 %v8558_v1 }
0x1a42   :  { %8013 = vmatpush3.msra.mxu1 %v4898_v62  ;;  %v6864_v62 = vld [vmem:[%s11002_s5 + $0x20] sm:$0xff] }
0x1a43   :  { %8055 = vmatprep.subr.mxu1 %v8558_v1 }
0x1aae   :  { %v4710_v11 = vpop.xlane.xlu0 %4709 }
0x1aaf   :  { %v4717_v10 = vmul.f32 0.03125, %v4710_v11 }
0x1ab0   :  { %v4725_v18 = vpop.xlane.xlu1 %4724 }
0x1ab1   :  { %v4735_v63 = vmul.f32 %v4717_v10, %v4717_v10  ;;  %v4732_v14 = vmul.f32 0.03125, %v4725_v18  ;;  %v4741_v52 = vsub.f32 %v10282_v6, %v4717_v10 }
0x1ab2   :  { %v4713_v15 = vpop.xlane.xlu0 %4712 }
0x1ab3   :  { %v4738_v25 = vsub.f32 %v4732_v14, %v4735_v63  ;;  %v4718_v16 = vmul.f32 0.03125, %v4713_v15 }
0x1ab5   :  { %v4744_v37 = vadd.f32 1e-06, %v4738_v25  ;;  %v4736_v20 = vmul.f32 %v4718_v16, %v4718_v16  ;;  %v4742_v23 = vsub.f32 %v10289_v29, %v4718_v16 }
0x1ab6   :  { %v4728_v24 = vpop.xlane.xlu0 %4727 }
0x1ab7   :  { %8444 = vrsqrt.f32 %v4744_v37  ;;  %v4733_v50 = vmul.f32 0.03125, %v4728_v24 }
0x1ab9   :  { %v4739_v26 = vsub.f32 %v4733_v50, %v4736_v20  ;;  %v4731_v32 = vpop.xlane.xlu1 %4730 }
0x1aba   :  { %v4716_v55 = vpop.xlane.xlu0 %4715  ;;  %v4734_v47 = vmul.f32 0.03125, %v4731_v32 }
0x1abb   :  { %v4745_v33 = vadd.f32 1e-06, %v4739_v26  ;;  %v4719_v19 = vmul.f32 0.03125, %v4716_v55 }
0x1abd   :  { %8446 = vrsqrt.f32 %v4745_v33  ;;  %v4737_v38 = vmul.f32 %v4719_v19, %v4719_v19  ;;  %v4743_v41 = vsub.f32 %v10297_v60, %v4719_v19 }
0x1abf   :  { %v4740_v17 = vsub.f32 %v4734_v47, %v4737_v38 }
0x1ac1   :  { %v4746_v34 = vadd.f32 1e-06, %v4740_v17 }
0x1ac3   :  { %8448 = vrsqrt.f32 %v4746_v34 }
0x1ac4   :  { %v8445_v21 = vpop.eup %8444 }
0x1ac5   :  { %v4750_v44 = vmul.f32 %v8445_v21, %v4741_v52 }
0x1ac7   :  { %v4759_v48 = vmul.f32 %v6853_v36, %v4750_v44 }
0x1ac9   :  { %v4768_v35 = vadd.f32 %v6854_v28, %v4759_v48 }
0x1aca   :  { %v8447_v30 = vpop.eup %8446 }
0x1acb   :  { %v4751_v13 = vmul.f32 %v8447_v30, %v4742_v23  ;;  %7974 = vmatmul.mubr.msk.f32.vlgmr.msra.gmra.mxu0 %vm166_vm2, %v4768_v35 }
0x1acc   :  { %7976 = vmatprep.mubr.msk.f32.mxu0 %vm8559_vm0, %v8558_v1  ;;  %8024 = vmatpush3.msra.mxu0 %v6867_v59 }
0x1acd   :  { %v4760_v39 = vmul.f32 %v6853_v36, %v4751_v13  ;;  %8025 = vmatprep.subr.mxu0 %v8558_v1 }
0x1acf   :  { %v4769_v43 = vadd.f32 %v6854_v28, %v4760_v39  ;;  %v6859_v39 = vld [vmem:[%s11011_s14] ss:$0 sm:$0xff] }
0x1ad0   :  { %v8449_v40 = vpop.eup %8448 }
0x1ad1   :  { %v4752_v45 = vmul.f32 %v8449_v40, %v4743_v41  ;;  %7977 = vmatmul.mubr.msk.f32.gmra.mxu0 %vm166_vm2, %v4769_v43 }
0x1ad2   :  { %7979 = vmatprep.mubr.msk.f32.mxu0 %vm8559_vm0, %v8558_v1 }
0x1ad3   :  { %v4761_v46 = vmul.f32 %v6853_v36, %v4752_v45 }
0x1ad5   :  { %v4770_v42 = vadd.f32 %v6854_v28, %v4761_v46 }
0x1ad7   :  { %7980 = vmatmul.mubr.msk.f32.gmra.mxu0 %vm166_vm2, %v4770_v42 }
0x1ad8   :  { %8031 = vmatprep.mubr.msk.f32.mxu0 %vm8559_vm0, %v8558_v1 }
0x1b8b   :  { %v4857_v3 = vpop.f32.mrf.mxu0 }
0x1b8c   :  { %v4858_v4 = vadd.f32 %v6855_v61, %v4857_v3 }
0x1b8d   :  { %v7975_v5 = vpop.f32.mrf.mxu0 }
0x1b8e   :  { %v4874_v12 = vmul.f32 %v4858_v4, %v4858_v4  ;;  %v4871_v34 = vmul.f32 0.5, %v4858_v4 }
0x1b90   :  { %v4877_v8 = vmul.f32 %v4874_v12, %v4858_v4 }
0x1b91   :  { %v4862_v11 = vpop.f32.mrf.mxu0 }
0x1b92   :  { %v4880_v10 = vmul.f32 0.044715, %v4877_v8  ;;  %v4863_v18 = vadd.f32 %v6855_v61, %v4862_v11 }
0x1b93   :  { %v7978_v63 = vpop.f32.mrf.mxu0 }
0x1b94   :  { %v4883_v14 = vadd.f32 %v4880_v10, %v4858_v4  ;;  %v4875_v15 = vmul.f32 %v4863_v18, %v4863_v18  ;;  %v4872_v44 = vmul.f32 0.5, %v4863_v18 }
0x1b96   :  { %v4886_v25 = vmul.f32 0.7978846, %v4883_v14  ;;  %v4878_v16 = vmul.f32 %v4875_v15, %v4863_v18 }
0x1b97   :  { %v4867_v37 = vpop.f32.mrf.mxu0 }
0x1b98   :  { %8450 = vtanh.f32 %v4886_v25  ;;  %v4881_v24 = vmul.f32 0.044715, %v4878_v16  ;;  %v4868_v20 = vadd.f32 %v6855_v61, %v4867_v37 }
0x1b99   :  { %v7981_v50 = vpop.f32.mrf.mxu0 }
0x1b9a   :  { %v4884_v26 = vadd.f32 %v4881_v24, %v4863_v18  ;;  %v4876_v32 = vmul.f32 %v4868_v20, %v4868_v20  ;;  %v4873_v35 = vmul.f32 0.5, %v4868_v20 }
0x1b9c   :  { %v4887_v55 = vmul.f32 0.7978846, %v4884_v26  ;;  %v4879_v33 = vmul.f32 %v4876_v32, %v4868_v20 }
0x1b9e   :  { %v4882_v19 = vmul.f32 0.044715, %v4879_v33  ;;  %8452 = vtanh.f32 %v4887_v55 }
0x1ba0   :  { %v4885_v47 = vadd.f32 %v4882_v19, %v4868_v20 }
0x1ba2   :  { %v4888_v38 = vmul.f32 0.7978846, %v4885_v47  ;;  %v6862_v47 = vld [vmem:[%s11000_s3 + $0x1] ss:$0 sm:$0xff] }
0x1ba4   :  { %8454 = vtanh.f32 %v4888_v38 }
0x1ba5   :  { %v8451_v17 = vpop.eup %8450 }
0x1ba6   :  { %v4892_v52 = vadd.f32 1.0, %v8451_v17  ;;  %v6863_v17 = vld [vmem:[%s11001_s4 + $0x1] ss:$0 sm:$0xff] }
0x1ba8   :  { %v4895_v21 = vmul.f32 %v4892_v52, %v4871_v34 }
0x1baa   :  { %8015 = vmatmul.mubr.f32.vlgmr.msra.gmra.mxu1 %v4895_v21 }
0x1bab   :  { %v8453_v36 = vpop.eup %8452  ;;  %8017 = vmatprep.mubr.msk.f32.mxu1 %vm8559_vm0, %v8558_v1 }
0x1bac   :  { %v4893_v28 = vadd.f32 1.0, %v8453_v36 }
0x1bae   :  { %v4896_v48 = vmul.f32 %v4893_v28, %v4872_v44 }
0x1bb0   :  { %8018 = vmatmul.mubr.f32.gmra.mxu1 %v4896_v48 }
0x1bb1   :  { %v8455_v23 = vpop.eup %8454  ;;  %8020 = vmatprep.mubr.msk.f32.mxu1 %vm8559_vm0, %v8558_v1 }
0x1bb2   :  { %v4894_v30 = vadd.f32 1.0, %v8455_v23 }
0x1bb4   :  { %v4897_v13 = vmul.f32 %v4894_v30, %v4873_v35 }
0x1bb6   :  { %8021 = vmatmul.mubr.f32.gmra.mxu1 %v4897_v13 }
0x1bb7   :  { %8061 = vmatprep.mubr.msk.f32.mxu1 %vm8559_vm0, %v8558_v1 }
0x1c6a   :  { %v4987_v41 = vpop.f32.mrf.mxu1 }
0x1c6b   :  { %v4988_v43 = vadd.f32 %v6859_v39, %v4987_v41 }
0x1c6c   :  { %v8016_v40 = vpop.f32.mrf.mxu1 }
0x1c6d   :  { %v10416_v45 = vadd.f32 %v4988_v43, %v10282_v6  ;;  %v6869_v40 = vld [vmem:[%s11003_s6 + $0x1] ss:$0 sm:$0xff] }
0x1c6f   :  { %v5006_v46 = vsel %vm166_vm2, %v10416_v45, 0.0  ;;  %v5018_v42 = vmul.f32 %v10416_v45, %v10416_v45 }
0x1c70   :  { %5007 = vadd.xlane.f32.xlu0 %v5006_v46  ;;  %v4992_v51 = vpop.f32.mrf.mxu1 }
0x1c71   :  { %v4993_v31 = vadd.f32 %v6859_v39, %v4992_v51  ;;  %v5021_v53 = vsel %vm166_vm2, %v5018_v42, 0.0 }
0x1c72   :  { %5022 = vadd.xlane.f32.xlu1 %v5021_v53  ;;  %v8019_v0 = vpop.f32.mrf.mxu1 }
0x1c73   :  { %v10424_v27 = vadd.f32 %v4993_v31, %v10289_v29 }
0x1c75   :  { %v5009_v6 = vsel %vm166_vm2, %v10424_v27, 0.0  ;;  %v5019_v22 = vmul.f32 %v10424_v27, %v10424_v27 }
0x1c76   :  { %5010 = vadd.xlane.f32.xlu0 %v5009_v6  ;;  %v4997_v7 = vpop.f32.mrf.mxu1 }
0x1c77   :  { %v4998_v9 = vadd.f32 %v6859_v39, %v4997_v7  ;;  %v5024_v56 = vsel %vm166_vm2, %v5019_v22, 0.0 }
0x1c78   :  { %5025 = vadd.xlane.f32.xlu1 %v5024_v56  ;;  %v8022_v49 = vpop.f32.mrf.mxu1 }
0x1c79   :  { %v10432_v54 = vadd.f32 %v4998_v9, %v10297_v60  ;;  %v6866_v60 = vld [vmem:[%s11002_s5 + $0x30] sm:$0xff] }
0x1c7a   :  { %8026 = vmatpush3.msra.mxu0 %v6866_v60 }
0x1c7b   :  { %v5012_v29 = vsel %vm173_vm3, %v10432_v54, 0.0  ;;  %v5020_v57 = vmul.f32 %v10432_v54, %v10432_v54  ;;  %8027 = vmatprep.subr.mxu0 %v8558_v1 }
0x1c7c   :  { %5013 = vadd.xlane.f32.xlu0 %v5012_v29  ;;  %8028 = vmatpush3.msra.mxu0 %v6865_v2 }
0x1c7d   :  { %v5027_v58 = vsel %vm173_vm3, %v5020_v57, 0.0  ;;  %8029 = vmatprep.subr.mxu0 %v8558_v1 }
0x1c7e   :  { %5028 = vadd.xlane.f32.xlu1 %v5027_v58  ;;  %8030 = vmatpush3.msra.mxu0 %v6864_v62 }
0x1c7f   :  { %8040 = vmatprep.subr.mxu0 %v8558_v1 }
0x1cf9   :  { %v5008_v61 = vpop.xlane.xlu0 %5007 }
0x1cfa   :  { %v5015_v3 = vmul.f32 0.03125, %v5008_v61 }
0x1cfb   :  { %v5023_v4 = vpop.xlane.xlu1 %5022 }
0x1cfc   :  { %v5033_v5 = vmul.f32 %v5015_v3, %v5015_v3  ;;  %v5030_v12 = vmul.f32 0.03125, %v5023_v4  ;;  %v5039_v33 = vsub.f32 %v10416_v45, %v5015_v3 }
0x1cfe   :  { %v5036_v8 = vsub.f32 %v5030_v12, %v5033_v5 }
0x1cff   :  { %v5011_v11 = vpop.xlane.xlu0 %5010 }
0x1d00   :  { %v5042_v10 = vadd.f32 1e-06, %v5036_v8  ;;  %v5016_v18 = vmul.f32 0.03125, %v5011_v11 }
0x1d01   :  { %v5026_v63 = vpop.xlane.xlu1 %5025 }
0x1d02   :  { %8456 = vrsqrt.f32 %v5042_v10  ;;  %v5034_v14 = vmul.f32 %v5016_v18, %v5016_v18  ;;  %v5031_v15 = vmul.f32 0.03125, %v5026_v63  ;;  %v5040_v21 = vsub.f32 %v10424_v27, %v5016_v18 }
0x1d04   :  { %v5037_v25 = vsub.f32 %v5031_v15, %v5034_v14 }
0x1d05   :  { %v5014_v16 = vpop.xlane.xlu0 %5013 }
0x1d06   :  { %v5043_v37 = vadd.f32 1e-06, %v5037_v25  ;;  %v5017_v24 = vmul.f32 0.03125, %v5014_v16 }
0x1d07   :  { %v5029_v20 = vpop.xlane.xlu1 %5028 }
0x1d08   :  { %8458 = vrsqrt.f32 %v5043_v37  ;;  %v5035_v50 = vmul.f32 %v5017_v24, %v5017_v24  ;;  %v5032_v26 = vmul.f32 0.03125, %v5029_v20  ;;  %v5041_v48 = vsub.f32 %v10432_v54, %v5017_v24 }
0x1d0a   :  { %v5038_v32 = vsub.f32 %v5032_v26, %v5035_v50 }
0x1d0c   :  { %v5044_v55 = vadd.f32 1e-06, %v5038_v32 }
0x1d0e   :  { %8460 = vrsqrt.f32 %v5044_v55 }
0x1d0f   :  { %v8457_v19 = vpop.eup %8456 }
0x1d10   :  { %v5048_v38 = vmul.f32 %v8457_v19, %v5039_v33 }
0x1d12   :  { %v5057_v34 = vmul.f32 %v6862_v47, %v5048_v38 }
0x1d14   :  { %v5066_v52 = vadd.f32 %v6863_v17, %v5057_v34 }
0x1d15   :  { %v8459_v36 = vpop.eup %8458 }
0x1d16   :  { %8032 = vmatmul.mubr.msk.f32.vlgmr.msra.gmra.mxu0 %vm166_vm2, %v5066_v52  ;;  %v5049_v44 = vmul.f32 %v8459_v36, %v5040_v21 }
0x1d17   :  { %8034 = vmatprep.mubr.msk.f32.mxu0 %vm8559_vm0, %v8558_v1 }
0x1d18   :  { %v5058_v28 = vmul.f32 %v6862_v47, %v5049_v44 }
0x1d1a   :  { %v5067_v23 = vadd.f32 %v6863_v17, %v5058_v28 }
0x1d1b   :  { %v8461_v35 = vpop.eup %8460 }
0x1d1c   :  { %8035 = vmatmul.mubr.msk.f32.gmra.mxu0 %vm166_vm2, %v5067_v23  ;;  %v5050_v30 = vmul.f32 %v8461_v35, %v5041_v48 }
0x1d1d   :  { %8037 = vmatprep.mubr.msk.f32.mxu0 %vm8559_vm0, %v8558_v1 }
0x1d1e   :  { %v5059_v13 = vmul.f32 %v6862_v47, %v5050_v30 }
0x1d20   :  { %v5068_v39 = vadd.f32 %v6863_v17, %v5059_v13 }
0x1d22   :  { %8038 = vmatmul.mubr.msk.f32.gmra.mxu0 %vm166_vm2, %v5068_v39 }
0x1d23   :  { %8046 = vmatprep.mubr.msk.f32.mxu0 %vm8559_vm0, %v8558_v1 }
0x1dd6   :  { %v5155_v41 = vpop.f32.mrf.mxu0 }
0x1dd7   :  { %v10480_v31 = vadd.f32 %v6869_v40, %v5155_v41 }
0x1dd8   :  { %v8033_v43 = vpop.f32.mrf.mxu0 }
0x1ddc   :  { %v5160_v46 = vpop.f32.mrf.mxu0 }
0x1ddd   :  { %v10476_v42 = vadd.f32 %v6869_v40, %v5160_v46 }
0x1dde   :  { %v8036_v51 = vpop.f32.mrf.mxu0 }
0x1ddf   :  { %5174 = vrot.lane.b32.xlu1 %v10476_v42, %s8560_s22 }
0x1de2   :  { %v5165_v53 = vpop.f32.mrf.mxu0 }
0x1de3   :  { %v10482_v0 = vadd.f32 %v6869_v40, %v5165_v53  ;;  %5172 = vrot.lane.b32.xlu1 %v10480_v31, %s8560_s22 }
0x1de4   :  { %v8039_v6 = vpop.f32.mrf.mxu0 }
0x1de5   :  { %5176 = vrot.lane.b32.xlu0 %v10482_v0, %s8560_s22 }
0x1de7   :  { %5182 = vrot.lane.b32.xlu1 %v10482_v0, %s8561_s23 }
0x1de9   :  { %5188 = vrot.lane.b32.xlu0 %v10482_v0, %s11036_s26 }
0x1deb   :  { %5180 = vrot.lane.b32.xlu1 %v10476_v42, %s8561_s23 }
0x1ded   :  { %5186 = vrot.lane.b32.xlu0 %v10476_v42, %s11036_s26 }
0x1def   :  { %5178 = vrot.lane.b32.xlu1 %v10480_v31, %s8561_s23 }
0x1df1   :  { %5184 = vrot.lane.b32.xlu0 %v10480_v31, %s11036_s26 }
0x1df3   :  { %5194 = vrot.lane.b32.xlu1 %v10482_v0, %s11037_s24 }
0x1df7   :  { %5192 = vrot.lane.b32.xlu1 %v10476_v42, %s11037_s24 }
0x1dfb   :  { %5190 = vrot.lane.b32.xlu1 %v10480_v31, %s11037_s24 }
0x1e51   :  { %v10506_v22 = vpop.permute.xlu1 %5174 }
0x1e55   :  { %v10508_v7 = vpop.permute.xlu1 %5172 }
0x1e57   :  { %v10510_v9 = vpop.permute.xlu0 %5176 }
0x1e58   :  { %5292 = vrot.lane.b32.xlu0 %v10510_v9, %s11037_s24 }
0x1e59   :  { %v10514_v56 = vpop.permute.xlu1 %5182 }
0x1e5a   :  { %5390 = vrot.lane.b32.xlu1 %v10514_v56, %s11037_s24 }
0x1e5b   :  { %v10524_v29 = vpop.permute.xlu0 %5188 }
0x1e5c   :  { %5290 = vrot.lane.b32.xlu0 %v10506_v22, %s11037_s24 }
0x1e5d   :  { %v10520_v49 = vpop.permute.xlu1 %5180 }
0x1e5e   :  { %5388 = vrot.lane.b32.xlu1 %v10520_v49, %s11037_s24 }
0x1e5f   :  { %v10534_v58 = vpop.permute.xlu0 %5186 }
0x1e60   :  { %5288 = vrot.lane.b32.xlu0 %v10508_v7, %s11037_s24 }
0x1e61   :  { %v10528_v57 = vpop.permute.xlu1 %5178 }
0x1e62   :  { %5386 = vrot.lane.b32.xlu1 %v10528_v57, %s11037_s24 }
0x1e63   :  { %v10541_v2 = vpop.permute.xlu0 %5184 }
0x1e64   :  { %5488 = vrot.lane.b32.xlu0 %v10524_v29, %s11037_s24 }
0x1e65   :  { %v5195_v59 = vpop.permute.xlu1 %5194 }
0x1e66   :  { %8041 = vmatpush3.xpose.msk.msra.mxu0 %vm359_vm4, %v5195_v59 }
0x1e67   :  { %8042 = vmatprep.subr.mxu0 %v8558_v1 }
0x1e68   :  { %5486 = vrot.lane.b32.xlu0 %v10534_v58, %s11037_s24 }
0x1e69   :  { %v5193_v60 = vpop.permute.xlu1 %5192 }
0x1e6a   :  { %8043 = vmatpush3.xpose.msk.msra.mxu0 %vm359_vm4, %v5193_v60 }
0x1e6b   :  { %8044 = vmatprep.subr.mxu0 %v8558_v1 }
0x1e6c   :  { %5484 = vrot.lane.b32.xlu0 %v10541_v2, %s11037_s24 }
0x1e6d   :  { %v5191_v62 = vpop.permute.xlu1 %5190 }
0x1e6e   :  { %8045 = vmatpush3.xpose.msk.msra.mxu0 %vm359_vm4, %v5191_v62 }
0x1e6f   :  { %8070 = vmatprep.subr.mxu0 %v8558_v1 }
0x1e71   :  { %8047 = vmatmul.mubr.msk.f32.vlgmr.msra.gmra.mxu0 %vm359_vm4, %v10480_v31 }
0x1e72   :  { %8049 = vmatprep.mubr.msk.f32.mxu0 %vm8559_vm0, %v8558_v1 }
0x1e75   :  { %8050 = vmatmul.mubr.msk.f32.gmra.mxu0 %vm359_vm4, %v10476_v42 }
0x1e76   :  { %8052 = vmatprep.mubr.msk.f32.mxu0 %vm8559_vm0, %v8558_v1 }
0x1e79   :  { %8053 = vmatmul.mubr.msk.f32.gmra.mxu0 %vm359_vm4, %v10482_v0 }
0x1e7a   :  { %8076 = vmatprep.mubr.msk.f32.mxu0 %vm8559_vm0, %v8558_v1 }
0x1eca   :  { %v5293_v61 = vpop.permute.xlu0 %5292 }
0x1ecb   :  { %8056 = vmatpush3.xpose.msk.msra.mxu1 %vm359_vm4, %v5293_v61 }
0x1ecc   :  { %v5391_v3 = vpop.permute.xlu1 %5390  ;;  %8057 = vmatprep.subr.mxu1 %v8558_v1 }
0x1ecd   :  { %8071 = vmatpush3.xpose.msk.msra.mxu0 %vm359_vm4, %v5391_v3 }
0x1ece   :  { %v5291_v4 = vpop.permute.xlu0 %5290  ;;  %8072 = vmatprep.subr.mxu0 %v8558_v1 }
0x1ecf   :  { %8058 = vmatpush3.xpose.msk.msra.mxu1 %vm359_vm4, %v5291_v4 }
0x1ed0   :  { %v5389_v5 = vpop.permute.xlu1 %5388  ;;  %8059 = vmatprep.subr.mxu1 %v8558_v1 }
0x1ed1   :  { %8073 = vmatpush3.xpose.msk.msra.mxu0 %vm359_vm4, %v5389_v5 }
0x1ed2   :  { %v5289_v12 = vpop.permute.xlu0 %5288  ;;  %8074 = vmatprep.subr.mxu0 %v8558_v1 }
0x1ed3   :  { %8060 = vmatpush3.xpose.msk.msra.mxu1 %vm359_vm4, %v5289_v12 }
0x1ed4   :  { %v5387_v8 = vpop.permute.xlu1 %5386  ;;  %8085 = vmatprep.subr.mxu1 %v8558_v1 }
0x1ed5   :  { %8075 = vmatpush3.xpose.msk.msra.mxu0 %vm359_vm4, %v5387_v8 }
0x1ed6   :  { %8062 = vmatmul.mubr.msk.f32.vlgmr.msra.gmra.mxu1 %vm359_vm4, %v10508_v7  ;;  %v5489_v11 = vpop.permute.xlu0 %5488  ;;  %8100 = vmatprep.subr.mxu0 %v8558_v1 }
0x1ed7   :  { %8086 = vmatpush3.xpose.msk.msra.mxu1 %vm359_vm4, %v5489_v11  ;;  %8064 = vmatprep.mubr.msk.f32.mxu1 %vm8559_vm0, %v8558_v1 }
0x1ed8   :  { %8077 = vmatmul.mubr.msk.f32.vlgmr.msra.gmra.mxu0 %vm359_vm4, %v10528_v57  ;;  %8087 = vmatprep.subr.mxu1 %v8558_v1 }
0x1ed9   :  { %8079 = vmatprep.mubr.msk.f32.mxu0 %vm8559_vm0, %v8558_v1 }
0x1eda   :  { %8065 = vmatmul.mubr.msk.f32.gmra.mxu1 %vm359_vm4, %v10506_v22  ;;  %v5487_v10 = vpop.permute.xlu0 %5486 }
0x1edb   :  { %8088 = vmatpush3.xpose.msk.msra.mxu1 %vm359_vm4, %v5487_v10  ;;  %8067 = vmatprep.mubr.msk.f32.mxu1 %vm8559_vm0, %v8558_v1 }
0x1edc   :  { %8080 = vmatmul.mubr.msk.f32.gmra.mxu0 %vm359_vm4, %v10520_v49  ;;  %8089 = vmatprep.subr.mxu1 %v8558_v1 }
0x1edd   :  { %8082 = vmatprep.mubr.msk.f32.mxu0 %vm8559_vm0, %v8558_v1 }
0x1ede   :  { %8068 = vmatmul.mubr.msk.f32.gmra.mxu1 %vm359_vm4, %v10510_v9  ;;  %v5485_v18 = vpop.permute.xlu0 %5484 }
0x1edf   :  { %8090 = vmatpush3.xpose.msk.msra.mxu1 %vm359_vm4, %v5485_v18  ;;  %8091 = vmatprep.mubr.msk.f32.mxu1 %vm8559_vm0, %v8558_v1 }
0x1ee0   :  { %8083 = vmatmul.mubr.msk.f32.gmra.mxu0 %vm359_vm4, %v10514_v56  ;;  %8115 = vmatprep.subr.mxu1 %v8558_v1 }
0x1ee1   :  { %8106 = vmatprep.mubr.msk.f32.mxu0 %vm8559_vm0, %v8558_v1 }
0x1ee2   :  { %8092 = vmatmul.mubr.msk.f32.vlgmr.msra.gmra.mxu1 %vm359_vm4, %v10541_v2 }
0x1ee3   :  { %8094 = vmatprep.mubr.msk.f32.mxu1 %vm8559_vm0, %v8558_v1 }
0x1ee6   :  { %8095 = vmatmul.mubr.msk.f32.gmra.mxu1 %vm359_vm4, %v10534_v58 }
0x1ee7   :  { %8097 = vmatprep.mubr.msk.f32.mxu1 %vm8559_vm0, %v8558_v1 }
0x1eea   :  { %8098 = vmatmul.mubr.msk.f32.gmra.mxu1 %vm359_vm4, %v10524_v29 }
0x1eeb   :  { %8121 = vmatprep.mubr.msk.f32.mxu1 %vm8559_vm0, %v8558_v1 }
0x1f31   :  { %v5274_v63 = vpop.f32.mrf.mxu0 }
0x1f32   :  { %v5582_v14 = vsel %vm746_vm6, %v5274_v63, -inf }
0x1f33   :  { %5583 = vmax.xlane.f32.xlu1 %v5582_v14  ;;  %v8048_v15 = vpop.f32.mrf.mxu0 }
0x1f35   :  { %v5279_v25 = vpop.f32.mrf.mxu0 }
0x1f36   :  { %v5585_v16 = vsel %vm746_vm6, %v5279_v25, -inf }
0x1f37   :  { %5586 = vmax.xlane.f32.xlu0 %v5585_v16  ;;  %v8051_v37 = vpop.f32.mrf.mxu0 }
0x1f39   :  { %v5284_v24 = vpop.f32.mrf.mxu0 }
0x1f3a   :  { %v5588_v20 = vsel %vm753_vm7, %v5284_v24, -inf }
0x1f3b   :  { %5589 = vmax.xlane.f32.xlu1 %v5588_v20  ;;  %v8054_v50 = vpop.f32.mrf.mxu0 }
0x1f96   :  { %v5372_v26 = vpop.f32.mrf.mxu1 }
0x1f97   :  { %v5591_v32 = vsel %vm746_vm6, %v5372_v26, -inf }
0x1f98   :  { %v8063_v55 = vpop.f32.mrf.mxu1  ;;  %5592 = vmax.xlane.f32.xlu0 %v5591_v32  ;;  %v5470_v33 = vpop.f32.mrf.mxu0 }
0x1f99   :  { %v5600_v19 = vsel %vm746_vm6, %v5470_v33, -inf }
0x1f9a   :  { %v10619_v47 = vpop.f32.mrf.mxu1  ;;  %5601 = vmax.xlane.f32.xlu1 %v5600_v19  ;;  %v8078_v38 = vpop.f32.mrf.mxu0 }
0x1f9b   :  { %v5594_v17 = vsel %vm746_vm6, %v10619_v47, -inf }
0x1f9c   :  { %v8066_v34 = vpop.f32.mrf.mxu1  ;;  %5595 = vmax.xlane.f32.xlu0 %v5594_v17  ;;  %v10623_v52 = vpop.f32.mrf.mxu0 }
0x1f9e   :  { %v10625_v21 = vpop.f32.mrf.mxu1  ;;  %v8081_v36 = vpop.f32.mrf.mxu0 }
0x1f9f   :  { %v5597_v44 = vsel %vm753_vm7, %v10625_v21, -inf }
0x1fa0   :  { %v8069_v28 = vpop.f32.mrf.mxu1  ;;  %5598 = vmax.xlane.f32.xlu0 %v5597_v44  ;;  %v10629_v48 = vpop.f32.mrf.mxu0 }
0x1fa2   :  { %v8084_v23 = vpop.f32.mrf.mxu0  ;;  %v10631_v35 = vpop.f32.mrf.mxu1 }
0x1fa3   :  { %v5609_v30 = vsel %vm746_vm6, %v10631_v35, -inf  ;;  %v5603_v23 = vsel %vm746_vm6, %v10623_v52, -inf }
0x1fa4   :  { %v8093_v13 = vpop.f32.mrf.mxu1  ;;  %5610 = vmax.xlane.f32.xlu0 %v5609_v30 }
0x1fa6   :  { %v10635_v39 = vpop.f32.mrf.mxu1 }
0x1fa8   :  { %v8096_v41 = vpop.f32.mrf.mxu1 }
0x1fa9   :  { %v5612_v41 = vsel %vm746_vm6, %v10635_v39, -inf }
0x1faa   :  { %v10637_v43 = vpop.f32.mrf.mxu1 }
0x1fab   :  { %5718 = vrot.lane.b32.xlu1 %v10482_v0, %s11038_s28 }
0x1fac   :  { %v8099_v40 = vpop.f32.mrf.mxu1 }
0x1faf   :  { %5716 = vrot.lane.b32.xlu1 %v10476_v42, %s11038_s28 }
0x1fb3   :  { %5815 = vrot.lane.b32.xlu1 %v10506_v22, %s11038_s28 }
0x1fb7   :  { %5714 = vrot.lane.b32.xlu1 %v10480_v31, %s11038_s28 }
0x1fba   :  { %5817 = vrot.lane.b32.xlu0 %v10510_v9, %s11038_s28 }
0x1fbb   :  { %5916 = vrot.lane.b32.xlu1 %v10514_v56, %s11038_s28 }
0x1fbc   :  { %v5584_v46 = vpop.xlane.xlu1 %5583 }
0x1fbd   :  { %v5618_v42 = vsub.f32 %v5274_v63, %v5584_v46  ;;  %v5615_v46 = vsel %vm753_vm7, %v10637_v43, -inf }
0x1fbe   :  { %5813 = vrot.lane.b32.xlu0 %v10508_v7, %s11038_s28 }
0x1fbf   :  { %5914 = vrot.lane.b32.xlu1 %v10520_v49, %s11038_s28  ;;  %v5630_v31 = vmul.f32 1.442695, %v5618_v42 }
0x1fc0   :  { %v5587_v51 = vpop.xlane.xlu0 %5586 }
0x1fc1   :  { %v5619_v53 = vsub.f32 %v5279_v25, %v5587_v51  ;;  %8462 = vpow2.f32 %v5630_v31 }
0x1fc2   :  { %6015 = vrot.lane.b32.xlu0 %v10524_v29, %s11038_s28 }
0x1fc3   :  { %v5632_v6 = vmul.f32 1.442695, %v5619_v53 }
0x1fc4   :  { %v5590_v0 = vpop.xlane.xlu1 %5589 }
0x1fc5   :  { %v5620_v22 = vsub.f32 %v5284_v24, %v5590_v0  ;;  %8464 = vpow2.f32 %v5632_v6 }
0x1fc6   :  { %6013 = vrot.lane.b32.xlu0 %v10534_v58, %s11038_s28 }
0x1fc7   :  { %v5634_v7 = vmul.f32 1.442695, %v5620_v22 }
0x1fc9   :  { %8466 = vpow2.f32 %v5634_v7 }
0x1fce   :  { %v10659_v9 = vpop.eup %8462 }
0x1fcf   :  { %v5654_v56 = vsel %vm746_vm6, %v10659_v9, 0.0 }
0x1fd2   :  { %v10663_v49 = vpop.eup %8464 }
0x1fd3   :  { %v5657_v29 = vsel %vm746_vm6, %v10663_v49, 0.0 }
0x1fd6   :  { %v10667_v58 = vpop.eup %8466 }
0x1fd7   :  { %v5660_v59 = vsel %vm753_vm7, %v10667_v58, 0.0 }
0x1fe3   :  { %5655 = vadd.xlane.f32.xlu1 %v5654_v56 }
0x1fe7   :  { %5658 = vadd.xlane.f32.xlu1 %v5657_v29 }
0x1feb   :  { %5661 = vadd.xlane.f32.xlu1 %v5660_v59 }
0x2021   :  { %v5593_v60 = vpop.xlane.xlu0 %5592 }
0x2022   :  { %v5621_v62 = vsub.f32 %v5372_v26, %v5593_v60 }
0x2023   :  { %v5602_v61 = vpop.xlane.xlu1 %5601 }
0x2024   :  { %v5636_v3 = vmul.f32 1.442695, %v5621_v62  ;;  %v5624_v4 = vsub.f32 %v5470_v33, %v5602_v61 }
0x2025   :  { %v5596_v5 = vpop.xlane.xlu0 %5595 }
0x2026   :  { %8468 = vpow2.f32 %v5636_v3  ;;  %v5642_v12 = vmul.f32 1.442695, %v5624_v4  ;;  %v5622_v8 = vsub.f32 %v10619_v47, %v5596_v5 }
0x2027   :  { %v5719_v11 = vpop.permute.xlu1 %5718 }
0x2028   :  { %8470 = vpow2.f32 %v5642_v12  ;;  %v5638_v10 = vmul.f32 1.442695, %v5622_v8  ;;  %8101 = vmatpush3.msk.msra.mxu0 %vm897_vm5, %v5719_v11 }
0x2029   :  { %v5599_v18 = vpop.xlane.xlu0 %5598  ;;  %8102 = vmatprep.subr.mxu0 %v8558_v1 }
0x202a   :  { %8472 = vpow2.f32 %v5638_v10  ;;  %v5623_v63 = vsub.f32 %v10625_v21, %v5599_v18 }
0x202b   :  { %v5717_v14 = vpop.permute.xlu1 %5716 }
0x202c   :  { %v5640_v15 = vmul.f32 1.442695, %v5623_v63  ;;  %8103 = vmatpush3.msra.mxu0 %v5717_v14 }
0x202d   :  { %v5611_v25 = vpop.xlane.xlu0 %5610  ;;  %8104 = vmatprep.subr.mxu0 %v8558_v1 }
0x202e   :  { %8474 = vpow2.f32 %v5640_v15  ;;  %v5627_v16 = vsub.f32 %v10631_v35, %v5611_v25 }
0x202f   :  { %v5816_v37 = vpop.permute.xlu1 %5815 }
0x2030   :  { %v5648_v24 = vmul.f32 1.442695, %v5627_v16 }
0x2031   :  { %v5818_v20 = vpop.permute.xlu0 %5817 }
0x2032   :  { %8476 = vpow2.f32 %v5648_v24  ;;  %8116 = vmatpush3.msk.msra.mxu1 %vm897_vm5, %v5818_v20 }
0x2033   :  { %v10678_v50 = vpop.eup %8468  ;;  %8117 = vmatprep.subr.mxu1 %v8558_v1  ;;  %v5715_v26 = vpop.permute.xlu1 %5714 }
0x2034   :  { %8105 = vmatpush3.msra.mxu0 %v5715_v26  ;;  %8118 = vmatpush3.msra.mxu1 %v5816_v37  ;;  %v5663_v32 = vsel %vm746_vm6, %v10678_v50, 0.0 }
0x2035   :  { %v10683_v55 = vpop.eup %8470  ;;  %5664 = vadd.xlane.f32.xlu0 %v5663_v32  ;;  %v5814_v33 = vpop.permute.xlu0 %5813  ;;  %8119 = vmatprep.subr.mxu1 %v8558_v1 }
0x2036   :  { %8120 = vmatpush3.msra.mxu1 %v5814_v33  ;;  %v5672_v19 = vsel %vm746_vm6, %v10683_v55, 0.0  ;;  %8130 = vmatprep.subr.mxu0 %v8558_v1 }
0x2037   :  { %v10689_v47 = vpop.eup %8472  ;;  %5673 = vadd.xlane.f32.xlu1 %v5672_v19  ;;  %8145 = vmatprep.subr.mxu1 %v8558_v1  ;;  %v5917_v44 = vpop.permute.xlu1 %5916 }
0x2038   :  { %v5666_v38 = vsel %vm746_vm6, %v10689_v47, 0.0 }
0x2039   :  { %5667 = vadd.xlane.f32.xlu0 %v5666_v38  ;;  %v6016_v0 = vpop.permute.xlu0 %6015 }
0x203b   :  { %v10694_v17 = vpop.eup %8474  ;;  %v5915_v28 = vpop.permute.xlu1 %5914 }
0x203c   :  { %v5669_v34 = vsel %vm753_vm7, %v10694_v17, 0.0 }
0x203d   :  { %5670 = vadd.xlane.f32.xlu0 %v5669_v34  ;;  %v6014_v6 = vpop.permute.xlu0 %6013 }
0x203f   :  { %v10698_v21 = vpop.eup %8476 }
0x2040   :  { %v5681_v36 = vsel %vm746_vm6, %v10698_v21, 0.0 }
0x2041   :  { %5682 = vadd.xlane.f32.xlu0 %v5681_v36 }
0x2048   :  { %5912 = vrot.lane.b32.xlu1 %v10528_v57, %s11038_s28  ;;  %v5606_v57 = vsel %vm753_vm7, %v10629_v48, -inf }
0x2057   :  { %6011 = vrot.lane.b32.xlu0 %v10541_v2, %s11038_s28 }
0x206c   :  { %v5656_v35 = vpop.xlane.xlu1 %5655  ;;  %5604 = vmax.xlane.f32.xlu1 %v5603_v23  ;;  %v6914_v23 = vld [vmem:[%s11004_s7 + $0x28] sm:$0xff] }
0x206d   :  { %8478 = vrcp.f32 %v5656_v35 }
0x2070   :  { %v5659_v30 = vpop.xlane.xlu1 %5658 }
0x2071   :  { %8480 = vrcp.f32 %v5659_v30  ;;  %v6913_v30 = vld [vmem:[%s11004_s7 + $0x20] sm:$0xff] }
0x2074   :  { %v5662_v13 = vpop.xlane.xlu1 %5661 }
0x2075   :  { %8482 = vrcp.f32 %v5662_v13 }
0x2076   :  { %5613 = vmax.xlane.f32.xlu0 %v5612_v41 }
0x207a   :  { %v8479_v2 = vpop.eup %8478  ;;  %5607 = vmax.xlane.f32.xlu0 %v5606_v57 }
0x207b   :  { %v5702_v40 = vmul.f32 %v8479_v2, %v10659_v9 }
0x207d   :  { %8107 = vmatmul.mubr.msk.f32.vlgmr.msra.gmra.mxu0 %vm746_vm6, %v5702_v40 }
0x207e   :  { %v8481_v42 = vpop.eup %8480  ;;  %8131 = vmatpush3.msk.msra.mxu0 %vm897_vm5, %v5917_v44  ;;  %5616 = vmax.xlane.f32.xlu0 %v5615_v46  ;;  %v6916_v44 = vld [vmem:[%s11004_s7 + $0x38] sm:$0xff] }
0x207f   :  { %8132 = vmatprep.subr.mxu0 %v8558_v1  ;;  %8109 = vmatprep.mubr.msk.f32.mxu0 %vm8559_vm0, %v8558_v1  ;;  %v5703_v51 = vmul.f32 %v8481_v42, %v10663_v49 }
0x2080   :  { %8133 = vmatpush3.msra.mxu0 %v5915_v28  ;;  %v6915_v28 = vld [vmem:[%s11004_s7 + $0x30] sm:$0xff] }
0x2081   :  { %8110 = vmatmul.mubr.msk.f32.gmra.mxu0 %vm746_vm6, %v5703_v51  ;;  %8134 = vmatprep.subr.mxu0 %v8558_v1 }
0x2082   :  { %v8483_v31 = vpop.eup %8482  ;;  %8112 = vmatprep.mubr.msk.f32.mxu0 %vm8559_vm0, %v8558_v1 }
0x2083   :  { %v5704_v53 = vmul.f32 %v8483_v31, %v10667_v58 }
0x2085   :  { %8113 = vmatmul.mubr.msk.f32.gmra.mxu0 %vm746_vm6, %v5704_v53 }
0x2086   :  { %8136 = vmatprep.mubr.msk.f32.mxu0 %vm8559_vm0, %v8558_v1 }
0x20be   :  { %v5665_v22 = vpop.xlane.xlu0 %5664 }
0x20bf   :  { %8484 = vrcp.f32 %v5665_v22 }
0x20c0   :  { %v5674_v7 = vpop.xlane.xlu1 %5673 }
0x20c1   :  { %8486 = vrcp.f32 %v5674_v7 }
0x20c2   :  { %v5668_v9 = vpop.xlane.xlu0 %5667 }
0x20c3   :  { %8488 = vrcp.f32 %v5668_v9 }
0x20c4   :  { %v5913_v56 = vpop.permute.xlu1 %5912 }
0x20c5   :  { %8135 = vmatpush3.msra.mxu0 %v5913_v56 }
0x20c6   :  { %v5671_v49 = vpop.xlane.xlu0 %5670  ;;  %8160 = vmatprep.subr.mxu0 %v8558_v1 }
0x20c7   :  { %8490 = vrcp.f32 %v5671_v49 }
0x20ca   :  { %v5683_v29 = vpop.xlane.xlu0 %5682 }
0x20cb   :  { %8492 = vrcp.f32 %v5683_v29 }
0x20cc   :  { %v8485_v58 = vpop.eup %8484 }
0x20cd   :  { %v5705_v59 = vmul.f32 %v8485_v58, %v10678_v50 }
0x20ce   :  { %v8487_v60 = vpop.eup %8486  ;;  %v6012_v4 = vpop.permute.xlu0 %6011 }
0x20cf   :  { %v5708_v62 = vmul.f32 %v8487_v60, %v10683_v55  ;;  %8122 = vmatmul.mubr.msk.f32.vlgmr.msra.gmra.mxu1 %vm746_vm6, %v5705_v59 }
0x20d0   :  { %v8489_v61 = vpop.eup %8488  ;;  %8146 = vmatpush3.msk.msra.mxu1 %vm897_vm5, %v6016_v0  ;;  %8124 = vmatprep.mubr.msk.f32.mxu1 %vm8559_vm0, %v8558_v1 }
0x20d1   :  { %8147 = vmatprep.subr.mxu1 %v8558_v1  ;;  %8137 = vmatmul.mubr.msk.f32.vlgmr.msra.gmra.mxu0 %vm746_vm6, %v5708_v62  ;;  %v5706_v3 = vmul.f32 %v8489_v61, %v10689_v47 }
0x20d2   :  { %8148 = vmatpush3.msra.mxu1 %v6014_v6  ;;  %8139 = vmatprep.mubr.msk.f32.mxu0 %vm8559_vm0, %v8558_v1 }
0x20d3   :  { %8149 = vmatprep.subr.mxu1 %v8558_v1  ;;  %8125 = vmatmul.mubr.msk.f32.gmra.mxu1 %vm746_vm6, %v5706_v3 }
0x20d4   :  { %v8491_v5 = vpop.eup %8490  ;;  %8150 = vmatpush3.msra.mxu1 %v6012_v4  ;;  %8127 = vmatprep.mubr.msk.f32.mxu1 %vm8559_vm0, %v8558_v1 }
0x20d5   :  { %v5707_v12 = vmul.f32 %v8491_v5, %v10694_v17  ;;  %8177 = vmatprep.subr.mxu1 %v8558_v1  ;;  %8161 = vmatpush3.msra.mxu0 %v6916_v44  ;;  %v6929_v44 = vld [vmem:[%s11008_s11 + $0x38] sm:$0xff] }
0x20d6   :  { %8162 = vmatprep.subr.mxu0 %v8558_v1 }
0x20d7   :  { %8128 = vmatmul.mubr.msk.f32.gmra.mxu1 %vm746_vm6, %v5707_v12  ;;  %8163 = vmatpush3.msra.mxu0 %v6915_v28  ;;  %v6927_v28 = vld [vmem:[%s11008_s11 + $0x28] sm:$0xff] }
0x20d8   :  { %v8493_v8 = vpop.eup %8492  ;;  %8151 = vmatprep.mubr.msk.f32.mxu1 %vm8559_vm0, %v8558_v1  ;;  %8164 = vmatprep.subr.mxu0 %v8558_v1 }
0x20d9   :  { %v5711_v11 = vmul.f32 %v8493_v8, %v10698_v21  ;;  %8165 = vmatpush3.msra.mxu0 %v6914_v23  ;;  %v6926_v23 = vld [vmem:[%s11008_s11 + $0x20] sm:$0xff] }
0x20da   :  { %8166 = vmatprep.subr.mxu0 %v8558_v1 }
0x20db   :  { %8152 = vmatmul.mubr.msk.f32.vlgmr.msra.gmra.mxu1 %vm746_vm6, %v5711_v11  ;;  %8167 = vmatpush3.msra.mxu0 %v6913_v30 }
0x20dc   :  { %8154 = vmatprep.mubr.msk.f32.mxu1 %vm8559_vm0, %v8558_v1  ;;  %8194 = vmatprep.subr.mxu0 %v8558_v1 }
0x20dd   :  { %8178 = vmatpush3.msra.mxu1 %v6929_v44 }
0x20de   :  { %8179 = vmatprep.subr.mxu1 %v8558_v1 }
0x20f5   :  { %v5605_v10 = vpop.xlane.xlu1 %5604 }
0x20f6   :  { %v5625_v18 = vsub.f32 %v10623_v52, %v5605_v10 }
0x20f8   :  { %v5644_v63 = vmul.f32 1.442695, %v5625_v18 }
0x20fa   :  { %8494 = vpow2.f32 %v5644_v63 }
0x20ff   :  { %v5614_v14 = vpop.xlane.xlu0 %5613 }
0x2100   :  { %v5628_v15 = vsub.f32 %v10635_v39, %v5614_v14 }
0x2102   :  { %v5650_v25 = vmul.f32 1.442695, %v5628_v15 }
0x2103   :  { %v5608_v16 = vpop.xlane.xlu0 %5607 }
0x2104   :  { %8496 = vpow2.f32 %v5650_v25  ;;  %v5626_v37 = vsub.f32 %v10629_v48, %v5608_v16  ;;  %v10812_v16 = vld [vmem:[%s11005_s8 + $0x1] ss:$0 sm:$0xff] }
0x2106   :  { %v5646_v24 = vmul.f32 1.442695, %v5626_v37 }
0x2107   :  { %v8495_v20 = vpop.eup %8494  ;;  %v5617_v50 = vpop.xlane.xlu0 %5616 }
0x2108   :  { %8498 = vpow2.f32 %v5646_v24  ;;  %v5629_v26 = vsub.f32 %v10637_v43, %v5617_v50  ;;  %v5675_v32 = vsel %vm746_vm6, %v8495_v20, 0.0 }
0x2109   :  { %5676 = vadd.xlane.f32.xlu1 %v5675_v32 }
0x210a   :  { %v5652_v52 = vmul.f32 1.442695, %v5629_v26 }
0x210c   :  { %8500 = vpow2.f32 %v5652_v52 }
0x2111   :  { %v8497_v55 = vpop.eup %8496 }
0x2112   :  { %v5684_v33 = vsel %vm746_vm6, %v8497_v55, 0.0 }
0x2113   :  { %5685 = vadd.xlane.f32.xlu0 %v5684_v33 }
0x2115   :  { %v8499_v39 = vpop.eup %8498 }
0x2116   :  { %v5678_v19 = vsel %vm753_vm7, %v8499_v39, 0.0 }
0x2117   :  { %5679 = vadd.xlane.f32.xlu1 %v5678_v19 }
0x2119   :  { %v8501_v48 = vpop.eup %8500 }
0x211a   :  { %v5687_v47 = vsel %vm753_vm7, %v8501_v48, 0.0 }
0x211b   :  { %5688 = vadd.xlane.f32.xlu0 %v5687_v47 }
0x213d   :  { %v5799_v38 = vpop.f32.mrf.mxu0 }
0x213f   :  { %v8108_v17 = vpop.f32.mrf.mxu0 }
0x2141   :  { %v10762_v43 = vpop.f32.mrf.mxu0 }
0x2143   :  { %v8111_v34 = vpop.f32.mrf.mxu0 }
0x2145   :  { %v10764_v21 = vpop.f32.mrf.mxu0 }
0x2147   :  { %v8114_v36 = vpop.f32.mrf.mxu0 }
0x218f   :  { %v5898_v35 = vpop.f32.mrf.mxu1 }
0x2190   :  { %6113 = vrot.lane.b32.xlu1 %v5898_v35, %s11033_s19 }
0x2191   :  { %v8123_v13 = vpop.f32.mrf.mxu1  ;;  %v5997_v41 = vpop.f32.mrf.mxu0 }
0x2192   :  { %v5677_v57 = vpop.xlane.xlu1 %5676  ;;  %6125 = vrot.lane.b32.xlu0 %v5997_v41, %s11034_s1 }
0x2193   :  { %8502 = vrcp.f32 %v5677_v57  ;;  %v5903_v2 = vpop.f32.mrf.mxu1  ;;  %v8138_v40 = vpop.f32.mrf.mxu0 }
0x2195   :  { %v8126_v46 = vpop.f32.mrf.mxu1 }
0x2197   :  { %v5908_v42 = vpop.f32.mrf.mxu1 }
0x2199   :  { %v8129_v51 = vpop.f32.mrf.mxu1 }
0x219a   :  { %v10857_v51 = vld [vmem:[%s11006_s9 + $0x1] ss:$0 sm:$0xff] }
0x219b   :  { %v6096_v31 = vpop.f32.mrf.mxu1 }
0x219c   :  { %6137 = vrot.lane.b32.xlu1 %v6096_v31, %s11035_s29  ;;  %v5686_v53 = vpop.xlane.xlu0 %5685 }
0x219d   :  { %8504 = vrcp.f32 %v5686_v53  ;;  %v8153_v0 = vpop.f32.mrf.mxu1  ;;  %v10862_v53 = vld [vmem:[%s11007_s10 + $0x1] ss:$0 sm:$0xff] }
0x21a0   :  { %v8503_v6 = vpop.eup %8502  ;;  %6115 = vrot.lane.b32.xlu1 %v5903_v2, %s11033_s19  ;;  %v5680_v22 = vpop.xlane.xlu1 %5679 }
0x21a1   :  { %8506 = vrcp.f32 %v5680_v22  ;;  %v5709_v7 = vmul.f32 %v8503_v6, %v8495_v20  ;;  %v8531_v22 = vld [vmem:[%s11012_s15 + $0x18] sm:$0xff] }
0x21a3   :  { %8140 = vmatmul.mubr.msk.f32.gmra.mxu0 %vm746_vm6, %v5709_v7  ;;  %v8532_v7 = vld [vmem:[%s11012_s15 + $0x10] sm:$0xff] }
0x21a4   :  { %v5689_v9 = vpop.xlane.xlu0 %5688  ;;  %8142 = vmatprep.mubr.msk.f32.mxu0 %vm8559_vm0, %v8558_v1 }
0x21a5   :  { %8508 = vrcp.f32 %v5689_v9  ;;  %v8533_v9 = vld [vmem:[%s11012_s15 + $0x8] sm:$0xff] }
0x21aa   :  { %v8505_v56 = vpop.eup %8504 }
0x21ab   :  { %v5712_v49 = vmul.f32 %v8505_v56, %v8497_v55  ;;  %v8534_v56 = vld [vmem:[%s11012_s15] sm:$0xff] }
0x21ad   :  { %8155 = vmatmul.mubr.msk.f32.gmra.mxu1 %vm746_vm6, %v5712_v49 }
0x21ae   :  { %v8507_v29 = vpop.eup %8506  ;;  %8157 = vmatprep.mubr.msk.f32.mxu1 %vm8559_vm0, %v8558_v1 }
0x21af   :  { %v5710_v58 = vmul.f32 %v8507_v29, %v8499_v39 }
0x21b1   :  { %8143 = vmatmul.mubr.msk.f32.gmra.mxu0 %vm746_vm6, %v5710_v58 }
0x21b2   :  { %v8509_v59 = vpop.eup %8508  ;;  %8168 = vmatprep.mubr.msk.f32.mxu0 %vm8559_vm0, %v8558_v1 }
0x21b3   :  { %v5713_v60 = vmul.f32 %v8509_v59, %v8501_v48 }
0x21b5   :  { %8158 = vmatmul.mubr.msk.f32.gmra.mxu1 %vm746_vm6, %v5713_v60 }
0x21b6   :  { %8185 = vmatprep.mubr.msk.f32.mxu1 %vm8559_vm0, %v8558_v1 }
0x2202   :  { %v6114_v62 = vpop.permute.xlu1 %6113 }
0x2203   :  { %v6146_v61 = vsel %vm359_vm4, %v5799_v38, %v6114_v62 }
0x2204   :  { %v6126_v3 = vpop.permute.xlu0 %6125 }
0x2205   :  { %v6149_v4 = vsel %vm1316_vm8, %v6146_v61, %v6126_v3 }
0x220e   :  { %v6138_v5 = vpop.permute.xlu1 %6137 }
0x220f   :  { %v6152_v12 = vsel %vm1320_vm9, %v6149_v4, %v6138_v5 }
0x2210   :  { %8169 = vmatmul.mubr.msk.f32.vlgmr.msra.gmra.mxu0 %vm166_vm2, %v6152_v12 }
0x2211   :  { %8171 = vmatprep.mubr.msk.f32.mxu0 %vm8559_vm0, %v8558_v1 }
0x2212   :  { %v6116_v55 = vpop.permute.xlu1 %6115 }
0x2213   :  { %v6147_v39 = vsel %vm359_vm4, %v10762_v43, %v6116_v55  ;;  %v6936_v55 = vld [vmem:[%s11010_s13 + $0x88] sm:$0xff] }
0x2263   :  { %v6002_v8 = vpop.f32.mrf.mxu0 }
0x2264   :  { %6127 = vrot.lane.b32.xlu1 %v6002_v8, %s11034_s1 }
0x2265   :  { %v8141_v11 = vpop.f32.mrf.mxu0 }
0x2268   :  { %6117 = vrot.lane.b32.xlu1 %v5908_v42, %s11033_s19 }
0x226d   :  { %v6101_v10 = vpop.f32.mrf.mxu1 }
0x226e   :  { %6139 = vrot.lane.b32.xlu0 %v6101_v10, %s11035_s29  ;;  %v6950_v10 = vld [vmem:[%s11010_s13 + $0xf8] sm:$0xff] }
0x226f   :  { %v8156_v18 = vpop.f32.mrf.mxu1  ;;  %8195 = vmatpush3.msra.mxu0 %v6950_v10 }
0x2270   :  { %8196 = vmatprep.subr.mxu0 %v8558_v1  ;;  %v6948_v18 = vld [vmem:[%s11010_s13 + $0xe8] sm:$0xff] }
0x2271   :  { %v6007_v63 = vpop.f32.mrf.mxu0 }
0x2272   :  { %6129 = vrot.lane.b32.xlu0 %v6007_v63, %s11034_s1  ;;  %v6947_v63 = vld [vmem:[%s11010_s13 + $0xe0] sm:$0xff] }
0x2273   :  { %v8144_v14 = vpop.f32.mrf.mxu0 }
0x2274   :  { %v6946_v14 = vld [vmem:[%s11010_s13 + $0xd8] sm:$0xff] }
0x2275   :  { %v6106_v15 = vpop.f32.mrf.mxu1 }
0x2276   :  { %6141 = vrot.lane.b32.xlu1 %v6106_v15, %s11035_s29  ;;  %v6945_v15 = vld [vmem:[%s11010_s13 + $0xd0] sm:$0xff] }
0x2277   :  { %v8159_v25 = vpop.f32.mrf.mxu1 }
0x2278   :  { %v6944_v25 = vld [vmem:[%s11010_s13 + $0xc8] sm:$0xff] }
0x22d0   :  { %v6241_v37 = vpop.f32.mrf.mxu0 }
0x22d1   :  { %v6242_v24 = vadd.f32 %v10812_v16, %v6241_v37  ;;  %v6942_v37 = vld [vmem:[%s11010_s13 + $0xb8] sm:$0xff] }
0x22d2   :  { %v8170_v20 = vpop.f32.mrf.mxu0 }
0x22d3   :  { %v10816_v50 = vadd.f32 %v6242_v24, %v10416_v45  ;;  %v6941_v24 = vld [vmem:[%s11010_s13 + $0xb0] sm:$0xff]  ;;  %v6940_v20 = vld [vmem:[%s11010_s13 + $0xa8] sm:$0xff] }
0x22d5   :  { %v6260_v26 = vsel %vm166_vm2, %v10816_v50, 0.0  ;;  %v6272_v32 = vmul.f32 %v10816_v50, %v10816_v50 }
0x22d6   :  { %6261 = vadd.xlane.f32.xlu0 %v6260_v26  ;;  %v6128_v33 = vpop.permute.xlu1 %6127  ;;  %v6939_v26 = vld [vmem:[%s11010_s13 + $0xa0] sm:$0xff] }
0x22d7   :  { %v6275_v52 = vsel %vm166_vm2, %v6272_v32, 0.0  ;;  %v6150_v19 = vsel %vm1316_vm8, %v6147_v39, %v6128_v33  ;;  %v6938_v32 = vld [vmem:[%s11010_s13 + $0x98] sm:$0xff]  ;;  %v6935_v33 = vld [vmem:[%s11010_s13 + $0x80] sm:$0xff] }
0x22d8   :  { %6276 = vadd.xlane.f32.xlu1 %v6275_v52  ;;  %v6937_v52 = vld [vmem:[%s11010_s13 + $0x90] sm:$0xff] }
0x22da   :  { %v6118_v47 = vpop.permute.xlu1 %6117 }
0x22db   :  { %v6148_v17 = vsel %vm359_vm4, %v10764_v21, %v6118_v47  ;;  %v6928_v21 = vld [vmem:[%s11008_s11 + $0x30] sm:$0xff] }
0x22dc   :  { %8180 = vmatpush3.msra.mxu1 %v6928_v21 }
0x22dd   :  { %8181 = vmatprep.subr.mxu1 %v8558_v1 }
0x22de   :  { %8182 = vmatpush3.msra.mxu1 %v6927_v28 }
0x22df   :  { %8183 = vmatprep.subr.mxu1 %v8558_v1 }
0x22e0   :  { %v6140_v48 = vpop.permute.xlu0 %6139  ;;  %8184 = vmatpush3.msra.mxu1 %v6926_v23 }
0x22e1   :  { %v6153_v45 = vsel %vm1320_vm9, %v6150_v19, %v6140_v48  ;;  %8235 = vmatprep.subr.mxu1 %v8558_v1 }
0x22e2   :  { %8172 = vmatmul.mubr.msk.f32.gmra.mxu0 %vm166_vm2, %v6153_v45 }
0x22e3   :  { %8174 = vmatprep.mubr.msk.f32.mxu0 %vm8559_vm0, %v8558_v1 }
0x22e4   :  { %v6130_v38 = vpop.permute.xlu0 %6129 }
0x22e5   :  { %v6151_v34 = vsel %vm1316_vm8, %v6148_v17, %v6130_v38 }
0x22e8   :  { %v6142_v36 = vpop.permute.xlu1 %6141 }
0x22e9   :  { %v6154_v43 = vsel %vm1320_vm9, %v6151_v34, %v6142_v36 }
0x22ea   :  { %8175 = vmatmul.mubr.msk.f32.gmra.mxu0 %vm166_vm2, %v6154_v43  ;;  %v6931_v43 = vld [vmem:[%s11009_s12 + $0x1] ss:$0 sm:$0xff] }
0x22eb   :  { %8226 = vmatprep.mubr.msk.f32.mxu0 %vm8559_vm0, %v8558_v1 }
0x235f   :  { %v6262_v35 = vpop.xlane.xlu0 %6261 }
0x2360   :  { %v6269_v30 = vmul.f32 0.03125, %v6262_v35 }
0x2361   :  { %v6277_v13 = vpop.xlane.xlu1 %6276 }
0x2362   :  { %v6287_v41 = vmul.f32 %v6269_v30, %v6269_v30  ;;  %v6284_v57 = vmul.f32 0.03125, %v6277_v13  ;;  %v6293_v46 = vsub.f32 %v10816_v50, %v6269_v30 }
0x2364   :  { %v6290_v2 = vsub.f32 %v6284_v57, %v6287_v41 }
0x2366   :  { %v6296_v40 = vadd.f32 1e-06, %v6290_v2 }
0x2368   :  { %8510 = vrsqrt.f32 %v6296_v40 }
0x2375   :  { %v8511_v42 = vpop.eup %8510 }
0x2376   :  { %v6302_v31 = vmul.f32 %v8511_v42, %v6293_v46 }
0x2378   :  { %v6311_v0 = vmul.f32 %v10857_v51, %v6302_v31 }
0x237a   :  { %v6320_v6 = vadd.f32 %v10862_v53, %v6311_v0 }
0x237c   :  { %8186 = vmatmul.mubr.msk.f32.vlgmr.msra.gmra.mxu1 %vm166_vm2, %v6320_v6 }
0x237d   :  { %8188 = vmatprep.mubr.msk.f32.mxu1 %vm8559_vm0, %v8558_v1  ;;  %8236 = vmatpush3.msra.mxu1 %v8531_v22 }
0x237e   :  { %8237 = vmatprep.subr.mxu1 %v8558_v1 }
0x237f   :  { %8238 = vmatpush3.msra.mxu1 %v8532_v7 }
0x2380   :  { %8239 = vmatprep.subr.mxu1 %v8558_v1 }
0x2381   :  { %8240 = vmatpush3.msra.mxu1 %v8533_v9 }
0x2382   :  { %8241 = vmatprep.subr.mxu1 %v8558_v1 }
0x2383   :  { %8242 = vmatpush3.msra.mxu1 %v8534_v56 }
0x23a2   :  { %v6246_v49 = vpop.f32.mrf.mxu0 }
0x23a3   :  { %v6247_v29 = vadd.f32 %v10812_v16, %v6246_v49 }
0x23a4   :  { %v8173_v58 = vpop.f32.mrf.mxu0 }
0x23a5   :  { %v10886_v59 = vadd.f32 %v6247_v29, %v10424_v27 }
0x23a7   :  { %v6263_v60 = vsel %vm166_vm2, %v10886_v59, 0.0  ;;  %v6273_v62 = vmul.f32 %v10886_v59, %v10886_v59 }
0x23a8   :  { %6264 = vadd.xlane.f32.xlu0 %v6263_v60 }
0x23a9   :  { %v6278_v4 = vsel %vm166_vm2, %v6273_v62, 0.0 }
0x23aa   :  { %v6251_v61 = vpop.f32.mrf.mxu0 }
0x23ab   :  { %v6252_v3 = vadd.f32 %v10812_v16, %v6251_v61  ;;  %v6943_v16 = vld [vmem:[%s11010_s13 + $0xc0] sm:$0xff] }
0x23ac   :  { %6279 = vadd.xlane.f32.xlu0 %v6278_v4  ;;  %v8176_v5 = vpop.f32.mrf.mxu0 }
0x23ad   :  { %v10895_v12 = vadd.f32 %v6252_v3, %v10432_v54  ;;  %v6949_v54 = vld [vmem:[%s11010_s13 + $0xf0] sm:$0xff] }
0x23ae   :  { %8197 = vmatpush3.msra.mxu0 %v6949_v54 }
0x23af   :  { %v6266_v27 = vsel %vm173_vm3, %v10895_v12, 0.0  ;;  %v6274_v8 = vmul.f32 %v10895_v12, %v10895_v12  ;;  %8198 = vmatprep.subr.mxu0 %v8558_v1 }
0x23b0   :  { %6267 = vadd.xlane.f32.xlu0 %v6266_v27  ;;  %8199 = vmatpush3.msra.mxu0 %v6948_v18  ;;  %v6952_v18 = vld [vmem:[%s11011_s14 + $0x1] ss:$0 sm:$0xff]  ;;  %s8568_s14 = smov [#allocation2]  }
0x23b1   :  { %v6281_v11 = vsel %vm173_vm3, %v6274_v8, 0.0  ;;  %8200 = vmatprep.subr.mxu0 %v8558_v1  ;;  %s6632_s25 = sshll.u32 %s8568_s14, 4  ;;  %s6633_s25 = int_to_ptr.vmem [resolvable:$true] %s6632_s25 }
0x23b2   :  { %6282 = vadd.xlane.f32.xlu1 %v6281_v11  ;;  %8201 = vmatpush3.msra.mxu0 %v6947_v63  ;;  %s8536_s21 = scalar_lea.vmem %s6633_s25, 32  ;;  %p8541_p1 = scmp.lt.s32.totalorder %s6633_s25, %s6633_s25 }
0x23b3   :  { %8202 = vmatprep.subr.mxu0 %v8558_v1  ;;  %p8537_p0 = scmp.ne.s32.totalorder %s6633_s25, %s8536_s21  ;;  %p8542_p2 = scmp.lt.s32.totalorder %s8536_s21, %s8536_s21 }
0x23b4   :  { %8203 = vmatpush3.msra.mxu0 %v6946_v14 }
0x23b5   :  { %8204 = vmatprep.subr.mxu0 %v8558_v1  ;;  %p8543_p3 = por %p8542_p2, %p8541_p1 }
0x23b6   :  { %8205 = vmatpush3.msra.mxu0 %v6945_v15 }
0x23b7   :  { %8206 = vmatprep.subr.mxu0 %v8558_v1  ;;  %p8544_p4 = pnand %p8543_p3, %p8537_p0 }
0x23b8   :  { %8207 = vmatpush3.msra.mxu0 %v6944_v25 }
0x23b9   :  { %8208 = vmatprep.subr.mxu0 %v8558_v1 }
0x23ba   :  { %8209 = vmatpush3.msra.mxu0 %v6943_v16 }
0x23bb   :  { %8210 = vmatprep.subr.mxu0 %v8558_v1 }
0x23bc   :  { %8211 = vmatpush3.msra.mxu0 %v6942_v37 }
0x23bd   :  { %8212 = vmatprep.subr.mxu0 %v8558_v1 }
0x23be   :  { %8213 = vmatpush3.msra.mxu0 %v6941_v24 }
0x23bf   :  { %8214 = vmatprep.subr.mxu0 %v8558_v1 }
0x23c0   :  { %8215 = vmatpush3.msra.mxu0 %v6940_v20 }
0x23c1   :  { %8216 = vmatprep.subr.mxu0 %v8558_v1 }
0x23c2   :  { %8217 = vmatpush3.msra.mxu0 %v6939_v26 }
0x23c3   :  { %8218 = vmatprep.subr.mxu0 %v8558_v1 }
0x23c4   :  { %8219 = vmatpush3.msra.mxu0 %v6938_v32 }
0x23c5   :  { %8220 = vmatprep.subr.mxu0 %v8558_v1 }
0x23c6   :  { %8221 = vmatpush3.msra.mxu0 %v6937_v52 }
0x23c7   :  { %8222 = vmatprep.subr.mxu0 %v8558_v1 }
0x23c8   :  { %8223 = vmatpush3.msra.mxu0 %v6936_v55 }
0x23c9   :  { %8224 = vmatprep.subr.mxu0 %v8558_v1 }
0x23ca   :  { %8225 = vmatpush3.msra.mxu0 %v6935_v33 }
0x2431   :  { %v6265_v39 = vpop.xlane.xlu0 %6264 }
0x2432   :  { %v6270_v19 = vmul.f32 0.03125, %v6265_v39 }
0x2434   :  { %v6288_v45 = vmul.f32 %v6270_v19, %v6270_v19  ;;  %v6294_v31 = vsub.f32 %v10886_v59, %v6270_v19 }
0x2435   :  { %v6280_v48 = vpop.xlane.xlu0 %6279 }
0x2436   :  { %v6285_v47 = vmul.f32 0.03125, %v6280_v48 }
0x2438   :  { %v6291_v38 = vsub.f32 %v6285_v47, %v6288_v45  ;;  %v8535_v47 = vld [vmem:[%s11013_s16] sm:$0x1] }
0x2439   :  { %v6268_v17 = vpop.xlane.xlu0 %6267 }
0x243a   :  { %v6297_v34 = vadd.f32 1e-06, %v6291_v38  ;;  %v6271_v36 = vmul.f32 0.03125, %v6268_v17 }
0x243b   :  { %v6283_v44 = vpop.xlane.xlu1 %6282 }
0x243c   :  { %8512 = vrsqrt.f32 %v6297_v34  ;;  %v6289_v21 = vmul.f32 %v6271_v36, %v6271_v36  ;;  %v6286_v28 = vmul.f32 0.03125, %v6283_v44  ;;  %v6409_v23 = vpop.f32.mrf.mxu1  ;;  %v6295_v7 = vsub.f32 %v10895_v12, %v6271_v36 }
0x243d   :  { %v6410_v35 = vadd.f32 %v6931_v43, %v6409_v23 }
0x243e   :  { %v6292_v30 = vsub.f32 %v6286_v28, %v6289_v21  ;;  %v8187_v13 = vpop.f32.mrf.mxu1 }
0x243f   :  { %v6426_v41 = vmul.f32 %v6410_v35, %v6410_v35  ;;  %v6423_v60 = vmul.f32 0.5, %v6410_v35 }
0x2440   :  { %v6298_v57 = vadd.f32 1e-06, %v6292_v30 }
0x2441   :  { %v6429_v2 = vmul.f32 %v6426_v41, %v6410_v35 }
0x2442   :  { %8514 = vrsqrt.f32 %v6298_v57 }
0x2443   :  { %v6432_v40 = vmul.f32 0.044715, %v6429_v2 }
0x2445   :  { %v6435_v46 = vadd.f32 %v6432_v40, %v6410_v35 }
0x2447   :  { %v6438_v42 = vmul.f32 0.7978846, %v6435_v46 }
0x2449   :  { %v8513_v0 = vpop.eup %8512  ;;  %8516 = vtanh.f32 %v6438_v42 }
0x244a   :  { %v6303_v6 = vmul.f32 %v8513_v0, %v6294_v31 }
0x244c   :  { %v6312_v22 = vmul.f32 %v10857_v51, %v6303_v6 }
0x244e   :  { %v6321_v9 = vadd.f32 %v10862_v53, %v6312_v22 }
0x244f   :  { %v8515_v56 = vpop.eup %8514 }
0x2450   :  { %8189 = vmatmul.mubr.msk.f32.gmra.mxu1 %vm166_vm2, %v6321_v9  ;;  %v6304_v49 = vmul.f32 %v8515_v56, %v6295_v7 }
0x2451   :  { %8191 = vmatprep.mubr.msk.f32.mxu1 %vm8559_vm0, %v8558_v1 }
0x2452   :  { %v6313_v29 = vmul.f32 %v10857_v51, %v6304_v49 }
0x2454   :  { %v6322_v58 = vadd.f32 %v10862_v53, %v6313_v29 }
0x2456   :  { %v8517_v59 = vpop.eup %8516  ;;  %8192 = vmatmul.mubr.msk.f32.gmra.mxu1 %vm166_vm2, %v6322_v58 }
0x2457   :  { %v6444_v62 = vadd.f32 1.0, %v8517_v59  ;;  %8243 = vmatprep.mubr.msk.f32.mxu1 %vm8559_vm0, %v8558_v1 }
0x2459   :  { %v6447_v61 = vmul.f32 %v6444_v62, %v6423_v60 }
0x245b   :  { %8227 = vmatmul.mubr.f32.vlgmr.msra.gmra.mxu0 %v6447_v61 }
0x245c   :  { %8229 = vmatprep.mubr.msk.f32.mxu0 %vm8559_vm0, %v8558_v1 }
0x2510   :  { %v6414_v3 = vpop.f32.mrf.mxu1 }
0x2511   :  { %v6415_v4 = vadd.f32 %v6931_v43, %v6414_v3 }
0x2512   :  { %v8190_v5 = vpop.f32.mrf.mxu1 }
0x2513   :  { %v6427_v12 = vmul.f32 %v6415_v4, %v6415_v4  ;;  %v6424_v52 = vmul.f32 0.5, %v6415_v4 }
0x2515   :  { %v6430_v51 = vmul.f32 %v6427_v12, %v6415_v4 }
0x2516   :  { %v6419_v27 = vpop.f32.mrf.mxu1 }
0x2517   :  { %v6433_v53 = vmul.f32 0.044715, %v6430_v51  ;;  %v6420_v8 = vadd.f32 %v6931_v43, %v6419_v27 }
0x2518   :  { %v8193_v11 = vpop.f32.mrf.mxu1 }
0x2519   :  { %v6436_v10 = vadd.f32 %v6433_v53, %v6415_v4  ;;  %v6428_v54 = vmul.f32 %v6420_v8, %v6420_v8  ;;  %v6425_v19 = vmul.f32 0.5, %v6420_v8 }
0x251b   :  { %v6439_v63 = vmul.f32 0.7978846, %v6436_v10  ;;  %v6431_v14 = vmul.f32 %v6428_v54, %v6420_v8  ;;  %v6539_v15 = vpop.f32.mrf.mxu0 }
0x251c   :  { %v6540_v25 = vadd.f32 %v6952_v18, %v6539_v15 }
0x251d   :  { %8518 = vtanh.f32 %v6439_v63  ;;  %v6434_v16 = vmul.f32 0.044715, %v6431_v14  ;;  %v8228_v37 = vpop.f32.mrf.mxu0 }
0x251e   :  { %v6551_v24 = vadd.f32 %v6540_v25, %v10816_v50 }
0x251f   :  { %v6437_v20 = vadd.f32 %v6434_v16, %v6420_v8 }
0x2520   :  { %8244 = vmatmul.mubr.msk.f32.vlgmr.msra.gmra.mxu1 %vm166_vm2, %v6551_v24 }
0x2521   :  { %v6440_v26 = vmul.f32 0.7978846, %v6437_v20 }
0x2523   :  { %8520 = vtanh.f32 %v6440_v26 }
0x252a   :  { %v8519_v32 = vpop.eup %8518 }
0x252b   :  { %v6445_v55 = vadd.f32 1.0, %v8519_v32 }
0x252d   :  { %v6448_v33 = vmul.f32 %v6445_v55, %v6424_v52 }
0x252f   :  { %8230 = vmatmul.mubr.f32.gmra.mxu0 %v6448_v33 }
0x2530   :  { %v8521_v39 = vpop.eup %8520  ;;  %8232 = vmatprep.mubr.msk.f32.mxu0 %vm8559_vm0, %v8558_v1 }
0x2531   :  { %v6446_v48 = vadd.f32 1.0, %v8521_v39 }
0x2533   :  { %v6449_v45 = vmul.f32 %v6446_v48, %v6425_v19 }
0x2535   :  { %8233 = vmatmul.mubr.f32.gmra.mxu0 %v6449_v45 }
0x25e0   :  { %v6621_v50 = vpop.f32.mrf.mxu1 }
0x25e1   :  { %v6622_v38 = vadd.f32 %v8535_v47, %v6621_v50 }
0x25e2   :  { %v8245_v17 = vpop.f32.mrf.mxu1 }
0x25e3   :  { %6626 = vst [vmem:[#allocation2 + $0x1] sm:$0x1] %v6622_v38 }
0x25e4   :  { %8547 = shalt.err (!%p8544_p4)
}
0x25e5   :  { %s8569_s18 = smov 1  }
0x25e6   :  { %6638 = dma.vmem_to_hbm [thread:$0]  %s6633_s25, 32, %s11014_s17, [#allocation3], %s11034_s1, %s11034_s1, %s8569_s18  }
0x25ef   :  { %v6544_v1 = vpop.f32.mrf.mxu0 }
0x25f1   :  { %v8231_v34 = vpop.f32.mrf.mxu0 }
0x25f5   :  { %v6548_v36 = vpop.f32.mrf.mxu0 }
0x25f7   :  { %v8234_v43 = vpop.f32.mrf.mxu0 }
0x25f8   :  { %8556 = dma.done.wait [#allocation3], 32  }
0x25f9   :  { %8557 = vsyncadd [#allocation3], 4294967264 }
0x25fa   :  { %6642 = vsyncpa [#allocation3], 1 }

</bundles_post_ra>
